<compile_context>
chip_gen: v5e
topology: v5e:2x2
jax: 0.10.0
libtpu: 0.0.40
codegen_flags: <defaults>
</compile_context>

<pallas_src>
import functools
import numpy as np

import jax
import jax.numpy as jnp
from jax import lax
from jax.experimental import pallas as pl
from jax.experimental.pallas import tpu as pltpu

# ----------------- small synthetic CLIP configuration -----------------
B = 2                        # batch
C_IN = 3                     # image channels
IMG = 16                     # image resolution
PATCH = 8                    # patch size
NP = (IMG // PATCH) ** 2     # 4 patches
S_VIS = NP + 1               # 5 visual tokens (cls + patches)
PDIM = C_IN * PATCH * PATCH  # 192 flattened patch dim
D_VIS = 32                   # vision transformer width
H_VIS = 2                    # vision heads
N_CLS = 4                    # number of classes
N_CTX = 4                    # learnable context tokens
L_TXT = 8                    # text sequence length
SUF = L_TXT - 1 - N_CTX      # suffix tokens (3)
D_TXT = 32                   # text transformer width (ctx_dim)
H_TXT = 2                    # text heads
EMB = 32                     # joint embedding dim (vis_dim)
META_HID = EMB // 16         # meta_net hidden (2)
R_TXT = N_CLS * L_TXT        # text rows per image (32)
RV = B * S_VIS               # stacked vision rows (10)
RT = B * R_TXT               # stacked text rows (64)
OUT_LANES = 128              # lane-dense logits slab width
NEG = -1e9                   # additive mask value
DTYPE = jnp.float32


# ======================= in-kernel helpers =======================

def _ln(x, g, b):
    mu = jnp.mean(x, axis=-1, keepdims=True)
    var = jnp.mean(jnp.square(x - mu), axis=-1, keepdims=True)
    return (x - mu) * lax.rsqrt(var + 1e-5) * g + b


def _attn_block(x, W, p, n_heads, dh, mask):
    """Pre-LN CLIP ResidualAttentionBlock on stacked rows x: (R, D).

    QKV and the output projection are single full-width matmuls; per-head
    softmax uses the precomputed additive `mask` (block-diag [+causal])."""
    f32 = jnp.float32
    scale = 1.0 / float(dh) ** 0.5
    D = x.shape[-1]

    h1 = _ln(x, W(p + "ln1_g"), W(p + "ln1_b"))
    qkv = jnp.dot(h1, W(p + "wqkv"), preferred_element_type=f32) + W(p + "bqkv")
    q, k, v = qkv[:, 0:D], qkv[:, D:2 * D], qkv[:, 2 * D:3 * D]

    heads = []
    for h in range(n_heads):
        sl = slice(h * dh, (h + 1) * dh)
        s = lax.dot_general(q[:, sl], k[:, sl], (((1,), (1,)), ((), ())),
                            preferred_element_type=f32) * scale + mask
        s = s - jnp.max(s, axis=-1, keepdims=True)
        e = jnp.exp(s)
        pmat = e * pl.reciprocal(jnp.sum(e, axis=-1, keepdims=True), approx=True)
        heads.append(jnp.dot(pmat, v[:, sl], preferred_element_type=f32))
    o = heads[0] if n_heads == 1 else jnp.concatenate(heads, axis=-1)   # (R, D)

    x = x + jnp.dot(o, W(p + "wo"), preferred_element_type=f32) + W(p + "bo")

    h2 = _ln(x, W(p + "ln2_g"), W(p + "ln2_b"))
    m = jnp.dot(h2, W(p + "w1"), preferred_element_type=f32) + W(p + "b1")
    m = m * jax.nn.sigmoid(1.702 * m)                                   # QuickGELU
    m = jnp.dot(m, W(p + "w2"), preferred_element_type=f32) + W(p + "b2")
    return x + m


# ======================= fused forward kernel =======================

def _fused_clip_kernel(patches_ref, slab_ref, scale_ref, o_ref, *, offs):
    f32 = jnp.float32

    def W(name):                       # static slice into the packed constant slab
        r0, nr, nc = offs[name]
        return slab_ref[r0:r0 + nr, 0:nc]

    # ---------------- vision tower (whole batch stacked: RV rows) ----------------
    patches = patches_ref[...].astype(f32)                                # (B*NP, PDIM)
    xp = jnp.dot(patches, W("v_conv_w"), preferred_element_type=f32)      # (B*NP, D_VIS)
    x = jnp.dot(W("v_sel_pat"), xp, preferred_element_type=f32) + W("v_pos")  # (RV, D)
    x = _ln(x, W("v_lnpre_g"), W("v_lnpre_b"))
    x = _attn_block(x, W, "v_", H_VIS, D_VIS // H_VIS, W("v_mask"))
    cls_tok = jnp.dot(W("v_cls_sel"), x, preferred_element_type=f32)      # (B, D_VIS)
    cls_tok = _ln(cls_tok, W("v_lnpost_g"), W("v_lnpost_b"))
    imf = jnp.dot(cls_tok, W("v_proj"), preferred_element_type=f32)       # (B, EMB)
    imf = imf * lax.rsqrt(jnp.sum(imf * imf, axis=-1, keepdims=True) + 1e-12)

    # ---------------- prompt learner: meta_net -> ctx shift -> prompts -----------
    h = jnp.maximum(
        jnp.dot(imf, W("m_w1"), preferred_element_type=f32) + W("m_b1"), 0.0)
    bias = jnp.dot(h, W("m_w2"), preferred_element_type=f32) + W("m_b2")  # (B, D_TXT)
    # t_base holds prefix/ctx/suffix token embeddings + positional embedding;
    # the per-image meta-net bias is added only on ctx rows via a 0/1 matmul.
    xt = W("t_base") + jnp.dot(W("t_ctxsel"), bias, preferred_element_type=f32)  # (RT, D)

    # ---------------- text tower (all B*N_CLS sequences stacked) -----------------
    xt = _attn_block(xt, W, "t_", H_TXT, D_TXT // H_TXT, W("t_mask"))
    xt = _ln(xt, W("t_lnf_g"), W("t_lnf_b"))
    g = jnp.dot(W("t_eot"), xt, preferred_element_type=f32)               # (B*N_CLS, D)
    txf = jnp.dot(g, W("t_proj"), preferred_element_type=f32)             # (B*N_CLS, EMB)
    txf = txf * lax.rsqrt(jnp.sum(txf * txf, axis=-1, keepdims=True) + 1e-12)

    # ---------------- cosine logits, lane-dense (B, 128) output ------------------
    big = lax.dot_general(imf, txf, (((1,), (1,)), ((), ())),
                          preferred_element_type=f32)                     # (B, B*N_CLS)
    big = big * W("l_diag")                                                # keep own image
    out = jnp.dot(big, W("l_place"), preferred_element_type=f32)           # (B, 128)
    o_ref[...] = (out * scale_ref[0]).astype(o_ref.dtype)


# ======================= host-side constant packing =======================

def _round8(n):
    return (n + 7) // 8 * 8


def _build_constant_slab(params):
    """Pack every constant operand into one (rows, 128) f32 slab.

    Returns (slab, offs) where offs[name] = (row_offset, rows, cols) with all
    row offsets 8-aligned so in-kernel static slices stay tile aligned."""
    f = np.float32

    # ---- vision constants ----
    sel_pat = np.zeros((RV, B * NP), f)      # token assembly (cls rows stay zero)
    cls_sel = np.zeros((B, RV), f)           # cls-token extraction
    v_mask = np.full((RV, RV), NEG, f)       # block-diagonal (per image) attention
    for b in range(B):
        cls_sel[b, b * S_VIS] = 1.0
        v_mask[b * S_VIS:(b + 1) * S_VIS, b * S_VIS:(b + 1) * S_VIS] = 0.0
        for j in range(NP):
            sel_pat[b * S_VIS + 1 + j, b * NP + j] = 1.0
    pos_eff = params["v_pos_emb"].at[0].add(params["v_class_emb"])        # cls baked in
    v_pos = jnp.tile(pos_eff, (B, 1))                                     # (RV, D_VIS)

    # ---- text constants ----
    pos = params["t_pos_emb"]                                             # (L_TXT, D)
    prefix = params["token_prefix"][:, 0, :]                              # (N_CLS, D)
    base_cls = jnp.concatenate(
        [prefix[:, None, :],
         jnp.broadcast_to(params["ctx"][None], (N_CLS, N_CTX, D_TXT)),
         params["token_suffix"]], axis=1) + pos[None]                     # (N_CLS, L, D)
    t_base = jnp.tile(base_cls.reshape(R_TXT, D_TXT), (B, 1))             # (RT, D)

    t_ctxsel = np.zeros((RT, B), f)          # rows that receive the meta-net bias
    t_mask = np.full((RT, RT), NEG, f)       # block-diagonal + causal
    for b in range(B):
        for c in range(N_CLS):
            r0 = b * R_TXT + c * L_TXT
            for i in range(L_TXT):
                t_mask[r0 + i, r0:r0 + i + 1] = 0.0
            for j in range(N_CTX):
                t_ctxsel[r0 + 1 + j, b] = 1.0

    # EOT gather (assumes EOT token id is the max id in every prompt — true
    # for the real CLIP vocab and for the synthetic tokenization here).
    eot_pos = jnp.argmax(params["tokenized_prompts"], axis=-1)            # (N_CLS,)
    idx = jnp.arange(B * N_CLS)
    eot_rows = (idx // N_CLS) * R_TXT + (idx % N_CLS) * L_TXT + eot_pos[idx % N_CLS]
    t_eot = jax.nn.one_hot(eot_rows, RT, dtype=DTYPE)                     # (B*N_CLS, RT)

    l_diag = np.zeros((B, B * N_CLS), f)     # keep only own image's text features
    l_place = np.zeros((B * N_CLS, OUT_LANES), f)   # place class c into lane c
    for b in range(B):
        l_diag[b, b * N_CLS:(b + 1) * N_CLS] = 1.0
        for c in range(N_CLS):
            l_place[b * N_CLS + c, c] = 1.0

    def row(v):
        return v.reshape(1, -1)

    vb, tb = params["v_block"], params["t_block"]
    entries = [
        # vision tower
        ("v_conv_w", params["v_conv_w"]),
        ("v_sel_pat", jnp.asarray(sel_pat)),
        ("v_pos", v_pos),
        ("v_lnpre_g", row(params["v_ln_pre_g"])), ("v_lnpre_b", row(params["v_ln_pre_b"])),
        ("v_ln1_g", row(vb["ln1_g"])), ("v_ln1_b", row(vb["ln1_b"])),
        ("v_wqkv", vb["qkv_w"]), ("v_bqkv", row(vb["qkv_b"])),
        ("v_wo", vb["out_w"]), ("v_bo", row(vb["out_b"])),
        ("v_ln2_g", row(vb["ln2_g"])), ("v_ln2_b", row(vb["ln2_b"])),
        ("v_w1", vb["mlp_w1"]), ("v_b1", row(vb["mlp_b1"])),
        ("v_w2", vb["mlp_w2"]), ("v_b2", row(vb["mlp_b2"])),
        ("v_mask", jnp.asarray(v_mask)),
        ("v_cls_sel", jnp.asarray(cls_sel)),
        ("v_lnpost_g", row(params["v_ln_post_g"])), ("v_lnpost_b", row(params["v_ln_post_b"])),
        ("v_proj", params["v_proj"]),
        # prompt learner / meta_net
        ("m_w1", params["meta_w1"]), ("m_b1", row(params["meta_b1"])),
        ("m_w2", params["meta_w2"]), ("m_b2", row(params["meta_b2"])),
        ("t_base", t_base),
        ("t_ctxsel", jnp.asarray(t_ctxsel)),
        # text transformer
        ("t_ln1_g", row(tb["ln1_g"])), ("t_ln1_b", row(tb["ln1_b"])),
        ("t_wqkv", tb["qkv_w"]), ("t_bqkv", row(tb["qkv_b"])),
        ("t_wo", tb["out_w"]), ("t_bo", row(tb["out_b"])),
        ("t_ln2_g", row(tb["ln2_g"])), ("t_ln2_b", row(tb["ln2_b"])),
        ("t_w1", tb["mlp_w1"]), ("t_b1", row(tb["mlp_b1"])),
        ("t_w2", tb["mlp_w2"]), ("t_b2", row(tb["mlp_b2"])),
        ("t_mask", jnp.asarray(t_mask)),
        ("t_lnf_g", row(params["t_ln_final_g"])), ("t_lnf_b", row(params["t_ln_final_b"])),
        ("t_eot", t_eot),
        ("t_proj", params["t_proj"]),
        ("l_diag", jnp.asarray(l_diag)),
        ("l_place", jnp.asarray(l_place)),
    ]

    offs = {}
    blocks = []
    r = 0
    for name, arr in entries:
        arr = jnp.asarray(arr, DTYPE)
        nr, nc = arr.shape
        assert nc <= OUT_LANES, (name, arr.shape)
        offs[name] = (r, nr, nc)
        pad_r = _round8(nr)
        blocks.append(jnp.zeros((pad_r, OUT_LANES), DTYPE).at[:nr, :nc].set(arr))
        r += pad_r
    slab = jnp.concatenate(blocks, axis=0)
    return slab, offs


# ======================= forward wrapper =======================

def custom_clip_forward(params, image):
    """image: (B, C, H, W) NCHW -> logits (B, n_cls)."""
    Bn = image.shape[0]
    assert Bn == B
    gh = gw = IMG // PATCH
    # patchify = conv1 with kernel=stride=PATCH (bias-free); glue reshape only.
    patches = image.reshape(Bn, C_IN, gh, PATCH, gw, PATCH)
    patches = patches.transpose(0, 2, 4, 1, 3, 5).reshape(Bn * NP, PDIM).astype(DTYPE)

    slab, offs = _build_constant_slab(params)
    scale = jnp.exp(params["logit_scale"]).reshape(1).astype(DTYPE)

    kernel = functools.partial(_fused_clip_kernel, offs=offs)
    # Single grid step for the whole batch; all operands are whole-array VMEM
    # blocks (constants in one packed slab), logit scale in SMEM.
    # NOTE(v7x): a 2-way "parallel" batch axis could be reintroduced to use the
    # second TensorCore, but only if a trace shows it idle — skipped by default.
    out = pl.pallas_call(
        kernel,
        out_shape=jax.ShapeDtypeStruct((Bn, OUT_LANES), DTYPE),
        in_specs=[
            pl.BlockSpec(memory_space=pltpu.MemorySpace.VMEM),   # patches
            pl.BlockSpec(memory_space=pltpu.MemorySpace.VMEM),   # constant slab
            pl.BlockSpec(memory_space=pltpu.MemorySpace.SMEM),   # logit scale
        ],
        out_specs=pl.BlockSpec(memory_space=pltpu.MemorySpace.VMEM),
    )(patches, slab, scale)
    return out[:, :N_CLS]


# ======================= deterministic parameter init =======================

def make_params(key):
    keys = iter(jax.random.split(key, 64))

    def nrm(shape, std=0.02):
        return (std * jax.random.normal(next(keys), shape)).astype(DTYPE)

    def block(dim):
        return dict(
            ln1_g=jnp.ones((dim,), DTYPE), ln1_b=jnp.zeros((dim,), DTYPE),
            qkv_w=nrm((dim, 3 * dim)), qkv_b=nrm((3 * dim,)),
            out_w=nrm((dim, dim)), out_b=nrm((dim,)),
            ln2_g=jnp.ones((dim,), DTYPE), ln2_b=jnp.zeros((dim,), DTYPE),
            mlp_w1=nrm((dim, 4 * dim)), mlp_b1=nrm((4 * dim,)),
            mlp_w2=nrm((4 * dim, dim)), mlp_b2=nrm((dim,)),
        )

    tok = jax.random.randint(next(keys), (N_CLS, L_TXT), 1, 1000, dtype=jnp.int32)
    eot_pos = jnp.array([7, 6, 5, 7], dtype=jnp.int32)
    tok = tok.at[jnp.arange(N_CLS), eot_pos].set(49407)   # EOT token = max id

    return dict(
        # vision tower
        v_conv_w=nrm((PDIM, D_VIS)),
        v_class_emb=nrm((D_VIS,)),
        v_pos_emb=nrm((S_VIS, D_VIS)),
        v_ln_pre_g=jnp.ones((D_VIS,), DTYPE), v_ln_pre_b=jnp.zeros((D_VIS,), DTYPE),
        v_block=block(D_VIS),
        v_ln_post_g=jnp.ones((D_VIS,), DTYPE), v_ln_post_b=jnp.zeros((D_VIS,), DTYPE),
        v_proj=nrm((D_VIS, EMB)),
        # text tower
        t_pos_emb=nrm((L_TXT, D_TXT)),
        t_block=block(D_TXT),
        t_ln_final_g=jnp.ones((D_TXT,), DTYPE), t_ln_final_b=jnp.zeros((D_TXT,), DTYPE),
        t_proj=nrm((D_TXT, EMB)),
        # prompt learner
        ctx=nrm((N_CTX, D_TXT)),
        token_prefix=nrm((N_CLS, 1, D_TXT)),
        token_suffix=nrm((N_CLS, SUF, D_TXT)),
        meta_w1=nrm((EMB, META_HID)), meta_b1=nrm((META_HID,)),
        meta_w2=nrm((META_HID, D_TXT)), meta_b2=nrm((D_TXT,)),
        tokenized_prompts=tok,
        logit_scale=jnp.asarray(jnp.log(1.0 / 0.07), DTYPE),
    )


# ======================= main =======================

if __name__ == "__main__":
    root = jax.random.PRNGKey(0)
    k_img, k_params = jax.random.split(root)
    params = make_params(k_params)
    image = jax.random.normal(k_img, (B, C_IN, IMG, IMG), dtype=DTYPE)  # NCHW

    logits = jax.jit(custom_clip_forward)(params, image)
    logits = jax.block_until_ready(logits)

    assert logits.shape == (B, N_CLS), logits.shape
    assert bool(jnp.all(jnp.isfinite(logits)))
    print("KERNEL_OK")
</pallas_src>

<mosaic_0001>
module attributes {stable_mosaic.version = 11 : i64} {
  func.func @_fused_clip_kernel(%arg0: memref<8x192xf32, #tpu.memory_space<vmem>>, %arg1: memref<1208x128xf32, #tpu.memory_space<vmem>>, %arg2: memref<1xf32, #tpu.memory_space<smem>>, %arg3: memref<2x128xf32, #tpu.memory_space<vmem>>) attributes {dimension_semantics = [], scalar_prefetch = 0 : i64, scratch_operands = 0 : i64, tpu.core_type = #tpu.core_type<tc>} {
    %c0 = arith.constant 0 : index
    %c0_0 = arith.constant 0 : index
    %0 = vector.load %arg0[%c0, %c0_0] : memref<8x192xf32, #tpu.memory_space<vmem>>, vector<8x192xf32>
    %c0_1 = arith.constant 0 : index
    %c0_2 = arith.constant 0 : index
    %1 = vector.load %arg1[%c0_1, %c0_2] : memref<1208x128xf32, #tpu.memory_space<vmem>>, vector<192x32xf32>
    %cst = arith.constant dense<0.000000e+00> : vector<8x32xf32>
    %2 = tpu.matmul %0, %1, %cst {dimension_numbers = #tpu.dot_dimension_numbers<[1], [0], [0], [1], [0, 0, 1, 1], [], []>} : vector<8x192xf32>, vector<192x32xf32>, vector<8x32xf32> -> vector<8x32xf32>
    %c192 = arith.constant 192 : index
    %c0_3 = arith.constant 0 : index
    %3 = vector.load %arg1[%c192, %c0_3] : memref<1208x128xf32, #tpu.memory_space<vmem>>, vector<10x8xf32>
    %cst_4 = arith.constant dense<0.000000e+00> : vector<10x32xf32>
    %4 = tpu.matmul %3, %2, %cst_4 {dimension_numbers = #tpu.dot_dimension_numbers<[1], [0], [0], [1], [0, 0, 1, 1], [], []>} : vector<10x8xf32>, vector<8x32xf32>, vector<10x32xf32> -> vector<10x32xf32>
    %c208 = arith.constant 208 : index
    %c0_5 = arith.constant 0 : index
    %5 = vector.load %arg1[%c208, %c0_5] : memref<1208x128xf32, #tpu.memory_space<vmem>>, vector<10x32xf32>
    %6 = arith.addf %4, %5 : vector<10x32xf32>
    %c224 = arith.constant 224 : index
    %c0_6 = arith.constant 0 : index
    %7 = vector.load %arg1[%c224, %c0_6] : memref<1208x128xf32, #tpu.memory_space<vmem>>, vector<1x32xf32>
    %c232 = arith.constant 232 : index
    %c0_7 = arith.constant 0 : index
    %8 = vector.load %arg1[%c232, %c0_7] : memref<1208x128xf32, #tpu.memory_space<vmem>>, vector<1x32xf32>
    %cst_8 = arith.constant dense<0.000000e+00> : vector<10xf32>
    %9 = vector.multi_reduction <add>, %6, %cst_8 [1] : vector<10x32xf32> to vector<10xf32>
    %10 = vector.shape_cast %9 : vector<10xf32> to vector<10x1xf32>
    %cst_9 = arith.constant 3.200000e+01 : f32
    %11 = vector.broadcast %cst_9 : f32 to vector<10x1xf32>
    %12 = arith.divf %10, %11 : vector<10x1xf32>
    %13 = vector.broadcast %12 : vector<10x1xf32> to vector<10x32xf32>
    %14 = arith.subf %6, %13 : vector<10x32xf32>
    %15 = arith.mulf %14, %14 : vector<10x32xf32>
    %cst_10 = arith.constant dense<0.000000e+00> : vector<10xf32>
    %16 = vector.multi_reduction <add>, %15, %cst_10 [1] : vector<10x32xf32> to vector<10xf32>
    %17 = vector.shape_cast %16 : vector<10xf32> to vector<10x1xf32>
    %cst_11 = arith.constant 3.200000e+01 : f32
    %18 = vector.broadcast %cst_11 : f32 to vector<10x1xf32>
    %19 = arith.divf %17, %18 : vector<10x1xf32>
    %20 = vector.broadcast %12 : vector<10x1xf32> to vector<10x32xf32>
    %21 = arith.subf %6, %20 : vector<10x32xf32>
    %cst_12 = arith.constant 9.99999974E-6 : f32
    %22 = vector.broadcast %cst_12 : f32 to vector<10x1xf32>
    %23 = arith.addf %19, %22 : vector<10x1xf32>
    %24 = math.rsqrt %23 : vector<10x1xf32>
    %25 = vector.broadcast %24 : vector<10x1xf32> to vector<10x32xf32>
    %26 = arith.mulf %21, %25 : vector<10x32xf32>
    %27 = vector.broadcast %7 : vector<1x32xf32> to vector<10x32xf32>
    %28 = arith.mulf %26, %27 : vector<10x32xf32>
    %29 = vector.broadcast %8 : vector<1x32xf32> to vector<10x32xf32>
    %30 = arith.addf %28, %29 : vector<10x32xf32>
    %c528 = arith.constant 528 : index
    %c0_13 = arith.constant 0 : index
    %31 = vector.load %arg1[%c528, %c0_13] : memref<1208x128xf32, #tpu.memory_space<vmem>>, vector<10x10xf32>
    %c240 = arith.constant 240 : index
    %c0_14 = arith.constant 0 : index
    %32 = vector.load %arg1[%c240, %c0_14] : memref<1208x128xf32, #tpu.memory_space<vmem>>, vector<1x32xf32>
    %c248 = arith.constant 248 : index
    %c0_15 = arith.constant 0 : index
    %33 = vector.load %arg1[%c248, %c0_15] : memref<1208x128xf32, #tpu.memory_space<vmem>>, vector<1x32xf32>
    %cst_16 = arith.constant dense<0.000000e+00> : vector<10xf32>
    %34 = vector.multi_reduction <add>, %30, %cst_16 [1] : vector<10x32xf32> to vector<10xf32>
    %35 = vector.shape_cast %34 : vector<10xf32> to vector<10x1xf32>
    %cst_17 = arith.constant 3.200000e+01 : f32
    %36 = vector.broadcast %cst_17 : f32 to vector<10x1xf32>
    %37 = arith.divf %35, %36 : vector<10x1xf32>
    %38 = vector.broadcast %37 : vector<10x1xf32> to vector<10x32xf32>
    %39 = arith.subf %30, %38 : vector<10x32xf32>
    %40 = arith.mulf %39, %39 : vector<10x32xf32>
    %cst_18 = arith.constant dense<0.000000e+00> : vector<10xf32>
    %41 = vector.multi_reduction <add>, %40, %cst_18 [1] : vector<10x32xf32> to vector<10xf32>
    %42 = vector.shape_cast %41 : vector<10xf32> to vector<10x1xf32>
    %cst_19 = arith.constant 3.200000e+01 : f32
    %43 = vector.broadcast %cst_19 : f32 to vector<10x1xf32>
    %44 = arith.divf %42, %43 : vector<10x1xf32>
    %45 = vector.broadcast %37 : vector<10x1xf32> to vector<10x32xf32>
    %46 = arith.subf %30, %45 : vector<10x32xf32>
    %cst_20 = arith.constant 9.99999974E-6 : f32
    %47 = vector.broadcast %cst_20 : f32 to vector<10x1xf32>
    %48 = arith.addf %44, %47 : vector<10x1xf32>
    %49 = math.rsqrt %48 : vector<10x1xf32>
    %50 = vector.broadcast %49 : vector<10x1xf32> to vector<10x32xf32>
    %51 = arith.mulf %46, %50 : vector<10x32xf32>
    %52 = vector.broadcast %32 : vector<1x32xf32> to vector<10x32xf32>
    %53 = arith.mulf %51, %52 : vector<10x32xf32>
    %54 = vector.broadcast %33 : vector<1x32xf32> to vector<10x32xf32>
    %55 = arith.addf %53, %54 : vector<10x32xf32>
    %c256 = arith.constant 256 : index
    %c0_21 = arith.constant 0 : index
    %56 = vector.load %arg1[%c256, %c0_21] : memref<1208x128xf32, #tpu.memory_space<vmem>>, vector<32x96xf32>
    %cst_22 = arith.constant dense<0.000000e+00> : vector<10x96xf32>
    %57 = tpu.matmul %55, %56, %cst_22 {dimension_numbers = #tpu.dot_dimension_numbers<[1], [0], [0], [1], [0, 0, 1, 1], [], []>} : vector<10x32xf32>, vector<32x96xf32>, vector<10x96xf32> -> vector<10x96xf32>
    %c288 = arith.constant 288 : index
    %c0_23 = arith.constant 0 : index
    %58 = vector.load %arg1[%c288, %c0_23] : memref<1208x128xf32, #tpu.memory_space<vmem>>, vector<1x96xf32>
    %59 = vector.broadcast %58 : vector<1x96xf32> to vector<10x96xf32>
    %60 = arith.addf %57, %59 : vector<10x96xf32>
    %61 = vector.extract_strided_slice %60 {offsets = [0, 0], sizes = [10, 32], strides = [1, 1]} : vector<10x96xf32> to vector<10x32xf32>
    %62 = vector.extract_strided_slice %60 {offsets = [0, 32], sizes = [10, 32], strides = [1, 1]} : vector<10x96xf32> to vector<10x32xf32>
    %63 = vector.extract_strided_slice %60 {offsets = [0, 64], sizes = [10, 32], strides = [1, 1]} : vector<10x96xf32> to vector<10x32xf32>
    %64 = vector.extract_strided_slice %61 {offsets = [0, 0], sizes = [10, 16], strides = [1, 1]} : vector<10x32xf32> to vector<10x16xf32>
    %65 = vector.extract_strided_slice %62 {offsets = [0, 0], sizes = [10, 16], strides = [1, 1]} : vector<10x32xf32> to vector<10x16xf32>
    %cst_24 = arith.constant dense<0.000000e+00> : vector<10x10xf32>
    %66 = tpu.matmul %64, %65, %cst_24 {dimension_numbers = #tpu.dot_dimension_numbers<[1], [1], [0], [0], [0, 0, 1, 0], [], []>} : vector<10x16xf32>, vector<10x16xf32>, vector<10x10xf32> -> vector<10x10xf32>
    %cst_25 = arith.constant 2.500000e-01 : f32
    %67 = vector.broadcast %cst_25 : f32 to vector<10x10xf32>
    %68 = arith.mulf %66, %67 : vector<10x10xf32>
    %69 = arith.addf %68, %31 : vector<10x10xf32>
    %cst_26 = arith.constant dense<0xFF800000> : vector<10xf32>
    %70 = vector.multi_reduction <maximumf>, %69, %cst_26 [1] : vector<10x10xf32> to vector<10xf32>
    %71 = vector.shape_cast %70 : vector<10xf32> to vector<10x1xf32>
    %72 = vector.broadcast %71 : vector<10x1xf32> to vector<10x10xf32>
    %73 = arith.subf %69, %72 : vector<10x10xf32>
    %74 = math.exp %73 : vector<10x10xf32>
    %cst_27 = arith.constant dense<0.000000e+00> : vector<10xf32>
    %75 = vector.multi_reduction <add>, %74, %cst_27 [1] : vector<10x10xf32> to vector<10xf32>
    %76 = vector.shape_cast %75 : vector<10xf32> to vector<10x1xf32>
    %77 = tpu.reciprocal %76 {approx = true} : vector<10x1xf32> -> vector<10x1xf32>
    %78 = vector.broadcast %77 : vector<10x1xf32> to vector<10x10xf32>
    %79 = arith.mulf %74, %78 : vector<10x10xf32>
    %80 = vector.extract_strided_slice %63 {offsets = [0, 0], sizes = [10, 16], strides = [1, 1]} : vector<10x32xf32> to vector<10x16xf32>
    %cst_28 = arith.constant dense<0.000000e+00> : vector<10x16xf32>
    %81 = tpu.matmul %79, %80, %cst_28 {dimension_numbers = #tpu.dot_dimension_numbers<[1], [0], [0], [1], [0, 0, 1, 1], [], []>} : vector<10x10xf32>, vector<10x16xf32>, vector<10x16xf32> -> vector<10x16xf32>
    %82 = vector.extract_strided_slice %61 {offsets = [0, 16], sizes = [10, 16], strides = [1, 1]} : vector<10x32xf32> to vector<10x16xf32>
    %83 = vector.extract_strided_slice %62 {offsets = [0, 16], sizes = [10, 16], strides = [1, 1]} : vector<10x32xf32> to vector<10x16xf32>
    %cst_29 = arith.constant dense<0.000000e+00> : vector<10x10xf32>
    %84 = tpu.matmul %82, %83, %cst_29 {dimension_numbers = #tpu.dot_dimension_numbers<[1], [1], [0], [0], [0, 0, 1, 0], [], []>} : vector<10x16xf32>, vector<10x16xf32>, vector<10x10xf32> -> vector<10x10xf32>
    %cst_30 = arith.constant 2.500000e-01 : f32
    %85 = vector.broadcast %cst_30 : f32 to vector<10x10xf32>
    %86 = arith.mulf %84, %85 : vector<10x10xf32>
    %87 = arith.addf %86, %31 : vector<10x10xf32>
    %cst_31 = arith.constant dense<0xFF800000> : vector<10xf32>
    %88 = vector.multi_reduction <maximumf>, %87, %cst_31 [1] : vector<10x10xf32> to vector<10xf32>
    %89 = vector.shape_cast %88 : vector<10xf32> to vector<10x1xf32>
    %90 = vector.broadcast %89 : vector<10x1xf32> to vector<10x10xf32>
    %91 = arith.subf %87, %90 : vector<10x10xf32>
    %92 = math.exp %91 : vector<10x10xf32>
    %cst_32 = arith.constant dense<0.000000e+00> : vector<10xf32>
    %93 = vector.multi_reduction <add>, %92, %cst_32 [1] : vector<10x10xf32> to vector<10xf32>
    %94 = vector.shape_cast %93 : vector<10xf32> to vector<10x1xf32>
    %95 = tpu.reciprocal %94 {approx = true} : vector<10x1xf32> -> vector<10x1xf32>
    %96 = vector.broadcast %95 : vector<10x1xf32> to vector<10x10xf32>
    %97 = arith.mulf %92, %96 : vector<10x10xf32>
    %98 = vector.extract_strided_slice %63 {offsets = [0, 16], sizes = [10, 16], strides = [1, 1]} : vector<10x32xf32> to vector<10x16xf32>
    %cst_33 = arith.constant dense<0.000000e+00> : vector<10x16xf32>
    %99 = tpu.matmul %97, %98, %cst_33 {dimension_numbers = #tpu.dot_dimension_numbers<[1], [0], [0], [1], [0, 0, 1, 1], [], []>} : vector<10x10xf32>, vector<10x16xf32>, vector<10x16xf32> -> vector<10x16xf32>
    %100 = tpu.concatenate %81, %99 in 1 : vector<10x16xf32>, vector<10x16xf32> -> vector<10x32xf32>
    %c296 = arith.constant 296 : index
    %c0_34 = arith.constant 0 : index
    %101 = vector.load %arg1[%c296, %c0_34] : memref<1208x128xf32, #tpu.memory_space<vmem>>, vector<32x32xf32>
    %cst_35 = arith.constant dense<0.000000e+00> : vector<10x32xf32>
    %102 = tpu.matmul %100, %101, %cst_35 {dimension_numbers = #tpu.dot_dimension_numbers<[1], [0], [0], [1], [0, 0, 1, 1], [], []>} : vector<10x32xf32>, vector<32x32xf32>, vector<10x32xf32> -> vector<10x32xf32>
    %103 = arith.addf %30, %102 : vector<10x32xf32>
    %c328 = arith.constant 328 : index
    %c0_36 = arith.constant 0 : index
    %104 = vector.load %arg1[%c328, %c0_36] : memref<1208x128xf32, #tpu.memory_space<vmem>>, vector<1x32xf32>
    %105 = vector.broadcast %104 : vector<1x32xf32> to vector<10x32xf32>
    %106 = arith.addf %103, %105 : vector<10x32xf32>
    %c336 = arith.constant 336 : index
    %c0_37 = arith.constant 0 : index
    %107 = vector.load %arg1[%c336, %c0_37] : memref<1208x128xf32, #tpu.memory_space<vmem>>, vector<1x32xf32>
    %c344 = arith.constant 344 : index
    %c0_38 = arith.constant 0 : index
    %108 = vector.load %arg1[%c344, %c0_38] : memref<1208x128xf32, #tpu.memory_space<vmem>>, vector<1x32xf32>
    %cst_39 = arith.constant dense<0.000000e+00> : vector<10xf32>
    %109 = vector.multi_reduction <add>, %106, %cst_39 [1] : vector<10x32xf32> to vector<10xf32>
    %110 = vector.shape_cast %109 : vector<10xf32> to vector<10x1xf32>
    %cst_40 = arith.constant 3.200000e+01 : f32
    %111 = vector.broadcast %cst_40 : f32 to vector<10x1xf32>
    %112 = arith.divf %110, %111 : vector<10x1xf32>
    %113 = vector.broadcast %112 : vector<10x1xf32> to vector<10x32xf32>
    %114 = arith.subf %106, %113 : vector<10x32xf32>
    %115 = arith.mulf %114, %114 : vector<10x32xf32>
    %cst_41 = arith.constant dense<0.000000e+00> : vector<10xf32>
    %116 = vector.multi_reduction <add>, %115, %cst_41 [1] : vector<10x32xf32> to vector<10xf32>
    %117 = vector.shape_cast %116 : vector<10xf32> to vector<10x1xf32>
    %cst_42 = arith.constant 3.200000e+01 : f32
    %118 = vector.broadcast %cst_42 : f32 to vector<10x1xf32>
    %119 = arith.divf %117, %118 : vector<10x1xf32>
    %120 = vector.broadcast %112 : vector<10x1xf32> to vector<10x32xf32>
    %121 = arith.subf %106, %120 : vector<10x32xf32>
    %cst_43 = arith.constant 9.99999974E-6 : f32
    %122 = vector.broadcast %cst_43 : f32 to vector<10x1xf32>
    %123 = arith.addf %119, %122 : vector<10x1xf32>
    %124 = math.rsqrt %123 : vector<10x1xf32>
    %125 = vector.broadcast %124 : vector<10x1xf32> to vector<10x32xf32>
    %126 = arith.mulf %121, %125 : vector<10x32xf32>
    %127 = vector.broadcast %107 : vector<1x32xf32> to vector<10x32xf32>
    %128 = arith.mulf %126, %127 : vector<10x32xf32>
    %129 = vector.broadcast %108 : vector<1x32xf32> to vector<10x32xf32>
    %130 = arith.addf %128, %129 : vector<10x32xf32>
    %c352 = arith.constant 352 : index
    %c0_44 = arith.constant 0 : index
    %131 = vector.load %arg1[%c352, %c0_44] : memref<1208x128xf32, #tpu.memory_space<vmem>>, vector<32x128xf32>
    %cst_45 = arith.constant dense<0.000000e+00> : vector<10x128xf32>
    %132 = tpu.matmul %130, %131, %cst_45 {dimension_numbers = #tpu.dot_dimension_numbers<[1], [0], [0], [1], [0, 0, 1, 1], [], []>} : vector<10x32xf32>, vector<32x128xf32>, vector<10x128xf32> -> vector<10x128xf32>
    %c384 = arith.constant 384 : index
    %c0_46 = arith.constant 0 : index
    %133 = vector.load %arg1[%c384, %c0_46] : memref<1208x128xf32, #tpu.memory_space<vmem>>, vector<1x128xf32>
    %134 = vector.broadcast %133 : vector<1x128xf32> to vector<10x128xf32>
    %135 = arith.addf %132, %134 : vector<10x128xf32>
    %cst_47 = arith.constant 1.702000e+00 : f32
    %136 = vector.broadcast %cst_47 : f32 to vector<10x128xf32>
    %137 = arith.mulf %136, %135 : vector<10x128xf32>
    %138 = arith.negf %137 : vector<10x128xf32>
    %139 = math.exp %138 : vector<10x128xf32>
    %cst_48 = arith.constant 1.000000e+00 : f32
    %140 = vector.broadcast %cst_48 : f32 to vector<10x128xf32>
    %141 = arith.addf %140, %139 : vector<10x128xf32>
    %142 = arith.divf %140, %141 : vector<10x128xf32>
    %143 = arith.mulf %135, %142 : vector<10x128xf32>
    %c392 = arith.constant 392 : index
    %c0_49 = arith.constant 0 : index
    %144 = vector.load %arg1[%c392, %c0_49] : memref<1208x128xf32, #tpu.memory_space<vmem>>, vector<128x32xf32>
    %cst_50 = arith.constant dense<0.000000e+00> : vector<10x32xf32>
    %145 = tpu.matmul %143, %144, %cst_50 {dimension_numbers = #tpu.dot_dimension_numbers<[1], [0], [0], [1], [0, 0, 1, 1], [], []>} : vector<10x128xf32>, vector<128x32xf32>, vector<10x32xf32> -> vector<10x32xf32>
    %c520 = arith.constant 520 : index
    %c0_51 = arith.constant 0 : index
    %146 = vector.load %arg1[%c520, %c0_51] : memref<1208x128xf32, #tpu.memory_space<vmem>>, vector<1x32xf32>
    %147 = vector.broadcast %146 : vector<1x32xf32> to vector<10x32xf32>
    %148 = arith.addf %145, %147 : vector<10x32xf32>
    %149 = arith.addf %106, %148 : vector<10x32xf32>
    %c544 = arith.constant 544 : index
    %c0_52 = arith.constant 0 : index
    %150 = vector.load %arg1[%c544, %c0_52] : memref<1208x128xf32, #tpu.memory_space<vmem>>, vector<2x10xf32>
    %cst_53 = arith.constant dense<0.000000e+00> : vector<2x32xf32>
    %151 = tpu.matmul %150, %149, %cst_53 {dimension_numbers = #tpu.dot_dimension_numbers<[1], [0], [0], [1], [0, 0, 1, 1], [], []>} : vector<2x10xf32>, vector<10x32xf32>, vector<2x32xf32> -> vector<2x32xf32>
    %c552 = arith.constant 552 : index
    %c0_54 = arith.constant 0 : index
    %152 = vector.load %arg1[%c552, %c0_54] : memref<1208x128xf32, #tpu.memory_space<vmem>>, vector<1x32xf32>
    %c560 = arith.constant 560 : index
    %c0_55 = arith.constant 0 : index
    %153 = vector.load %arg1[%c560, %c0_55] : memref<1208x128xf32, #tpu.memory_space<vmem>>, vector<1x32xf32>
    %cst_56 = arith.constant dense<0.000000e+00> : vector<2xf32>
    %154 = vector.multi_reduction <add>, %151, %cst_56 [1] : vector<2x32xf32> to vector<2xf32>
    %155 = vector.shape_cast %154 : vector<2xf32> to vector<2x1xf32>
    %cst_57 = arith.constant 3.200000e+01 : f32
    %156 = vector.broadcast %cst_57 : f32 to vector<2x1xf32>
    %157 = arith.divf %155, %156 : vector<2x1xf32>
    %158 = vector.broadcast %157 : vector<2x1xf32> to vector<2x32xf32>
    %159 = arith.subf %151, %158 : vector<2x32xf32>
    %160 = arith.mulf %159, %159 : vector<2x32xf32>
    %cst_58 = arith.constant dense<0.000000e+00> : vector<2xf32>
    %161 = vector.multi_reduction <add>, %160, %cst_58 [1] : vector<2x32xf32> to vector<2xf32>
    %162 = vector.shape_cast %161 : vector<2xf32> to vector<2x1xf32>
    %cst_59 = arith.constant 3.200000e+01 : f32
    %163 = vector.broadcast %cst_59 : f32 to vector<2x1xf32>
    %164 = arith.divf %162, %163 : vector<2x1xf32>
    %165 = vector.broadcast %157 : vector<2x1xf32> to vector<2x32xf32>
    %166 = arith.subf %151, %165 : vector<2x32xf32>
    %cst_60 = arith.constant 9.99999974E-6 : f32
    %167 = vector.broadcast %cst_60 : f32 to vector<2x1xf32>
    %168 = arith.addf %164, %167 : vector<2x1xf32>
    %169 = math.rsqrt %168 : vector<2x1xf32>
    %170 = vector.broadcast %169 : vector<2x1xf32> to vector<2x32xf32>
    %171 = arith.mulf %166, %170 : vector<2x32xf32>
    %172 = vector.broadcast %152 : vector<1x32xf32> to vector<2x32xf32>
    %173 = arith.mulf %171, %172 : vector<2x32xf32>
    %174 = vector.broadcast %153 : vector<1x32xf32> to vector<2x32xf32>
    %175 = arith.addf %173, %174 : vector<2x32xf32>
    %c568 = arith.constant 568 : index
    %c0_61 = arith.constant 0 : index
    %176 = vector.load %arg1[%c568, %c0_61] : memref<1208x128xf32, #tpu.memory_space<vmem>>, vector<32x32xf32>
    %cst_62 = arith.constant dense<0.000000e+00> : vector<2x32xf32>
    %177 = tpu.matmul %175, %176, %cst_62 {dimension_numbers = #tpu.dot_dimension_numbers<[1], [0], [0], [1], [0, 0, 1, 1], [], []>} : vector<2x32xf32>, vector<32x32xf32>, vector<2x32xf32> -> vector<2x32xf32>
    %178 = arith.mulf %177, %177 : vector<2x32xf32>
    %cst_63 = arith.constant dense<0.000000e+00> : vector<2xf32>
    %179 = vector.multi_reduction <add>, %178, %cst_63 [1] : vector<2x32xf32> to vector<2xf32>
    %180 = vector.shape_cast %179 : vector<2xf32> to vector<2x1xf32>
    %cst_64 = arith.constant 9.99999996E-13 : f32
    %181 = vector.broadcast %cst_64 : f32 to vector<2x1xf32>
    %182 = arith.addf %180, %181 : vector<2x1xf32>
    %183 = math.rsqrt %182 : vector<2x1xf32>
    %184 = vector.broadcast %183 : vector<2x1xf32> to vector<2x32xf32>
    %185 = arith.mulf %177, %184 : vector<2x32xf32>
    %c600 = arith.constant 600 : index
    %c0_65 = arith.constant 0 : index
    %186 = vector.load %arg1[%c600, %c0_65] : memref<1208x128xf32, #tpu.memory_space<vmem>>, vector<32x2xf32>
    %cst_66 = arith.constant dense<0.000000e+00> : vector<2x2xf32>
    %187 = tpu.matmul %185, %186, %cst_66 {dimension_numbers = #tpu.dot_dimension_numbers<[1], [0], [0], [1], [0, 0, 1, 1], [], []>} : vector<2x32xf32>, vector<32x2xf32>, vector<2x2xf32> -> vector<2x2xf32>
    %c632 = arith.constant 632 : index
    %c0_67 = arith.constant 0 : index
    %188 = vector.load %arg1[%c632, %c0_67] : memref<1208x128xf32, #tpu.memory_space<vmem>>, vector<1x2xf32>
    %189 = vector.broadcast %188 : vector<1x2xf32> to vector<2x2xf32>
    %190 = arith.addf %187, %189 : vector<2x2xf32>
    %cst_68 = arith.constant 0.000000e+00 : f32
    %191 = vector.broadcast %cst_68 : f32 to vector<2x2xf32>
    %192 = arith.maximumf %190, %191 : vector<2x2xf32>
    %c640 = arith.constant 640 : index
    %c0_69 = arith.constant 0 : index
    %193 = vector.load %arg1[%c640, %c0_69] : memref<1208x128xf32, #tpu.memory_space<vmem>>, vector<2x32xf32>
    %cst_70 = arith.constant dense<0.000000e+00> : vector<2x32xf32>
    %194 = tpu.matmul %192, %193, %cst_70 {dimension_numbers = #tpu.dot_dimension_numbers<[1], [0], [0], [1], [0, 0, 1, 1], [], []>} : vector<2x2xf32>, vector<2x32xf32>, vector<2x32xf32> -> vector<2x32xf32>
    %c648 = arith.constant 648 : index
    %c0_71 = arith.constant 0 : index
    %195 = vector.load %arg1[%c648, %c0_71] : memref<1208x128xf32, #tpu.memory_space<vmem>>, vector<1x32xf32>
    %196 = vector.broadcast %195 : vector<1x32xf32> to vector<2x32xf32>
    %197 = arith.addf %194, %196 : vector<2x32xf32>
    %c656 = arith.constant 656 : index
    %c0_72 = arith.constant 0 : index
    %198 = vector.load %arg1[%c656, %c0_72] : memref<1208x128xf32, #tpu.memory_space<vmem>>, vector<64x32xf32>
    %c720 = arith.constant 720 : index
    %c0_73 = arith.constant 0 : index
    %199 = vector.load %arg1[%c720, %c0_73] : memref<1208x128xf32, #tpu.memory_space<vmem>>, vector<64x2xf32>
    %cst_74 = arith.constant dense<0.000000e+00> : vector<64x32xf32>
    %200 = tpu.matmul %199, %197, %cst_74 {dimension_numbers = #tpu.dot_dimension_numbers<[1], [0], [0], [1], [0, 0, 1, 1], [], []>} : vector<64x2xf32>, vector<2x32xf32>, vector<64x32xf32> -> vector<64x32xf32>
    %201 = arith.addf %198, %200 : vector<64x32xf32>
    %c1072 = arith.constant 1072 : index
    %c0_75 = arith.constant 0 : index
    %202 = vector.load %arg1[%c1072, %c0_75] : memref<1208x128xf32, #tpu.memory_space<vmem>>, vector<64x64xf32>
    %c784 = arith.constant 784 : index
    %c0_76 = arith.constant 0 : index
    %203 = vector.load %arg1[%c784, %c0_76] : memref<1208x128xf32, #tpu.memory_space<vmem>>, vector<1x32xf32>
    %c792 = arith.constant 792 : index
    %c0_77 = arith.constant 0 : index
    %204 = vector.load %arg1[%c792, %c0_77] : memref<1208x128xf32, #tpu.memory_space<vmem>>, vector<1x32xf32>
    %cst_78 = arith.constant dense<0.000000e+00> : vector<64xf32>
    %205 = vector.multi_reduction <add>, %201, %cst_78 [1] : vector<64x32xf32> to vector<64xf32>
    %206 = vector.shape_cast %205 : vector<64xf32> to vector<64x1xf32>
    %cst_79 = arith.constant 3.200000e+01 : f32
    %207 = vector.broadcast %cst_79 : f32 to vector<64x1xf32>
    %208 = arith.divf %206, %207 : vector<64x1xf32>
    %209 = vector.broadcast %208 : vector<64x1xf32> to vector<64x32xf32>
    %210 = arith.subf %201, %209 : vector<64x32xf32>
    %211 = arith.mulf %210, %210 : vector<64x32xf32>
    %cst_80 = arith.constant dense<0.000000e+00> : vector<64xf32>
    %212 = vector.multi_reduction <add>, %211, %cst_80 [1] : vector<64x32xf32> to vector<64xf32>
    %213 = vector.shape_cast %212 : vector<64xf32> to vector<64x1xf32>
    %cst_81 = arith.constant 3.200000e+01 : f32
    %214 = vector.broadcast %cst_81 : f32 to vector<64x1xf32>
    %215 = arith.divf %213, %214 : vector<64x1xf32>
    %216 = vector.broadcast %208 : vector<64x1xf32> to vector<64x32xf32>
    %217 = arith.subf %201, %216 : vector<64x32xf32>
    %cst_82 = arith.constant 9.99999974E-6 : f32
    %218 = vector.broadcast %cst_82 : f32 to vector<64x1xf32>
    %219 = arith.addf %215, %218 : vector<64x1xf32>
    %220 = math.rsqrt %219 : vector<64x1xf32>
    %221 = vector.broadcast %220 : vector<64x1xf32> to vector<64x32xf32>
    %222 = arith.mulf %217, %221 : vector<64x32xf32>
    %223 = vector.broadcast %203 : vector<1x32xf32> to vector<64x32xf32>
    %224 = arith.mulf %222, %223 : vector<64x32xf32>
    %225 = vector.broadcast %204 : vector<1x32xf32> to vector<64x32xf32>
    %226 = arith.addf %224, %225 : vector<64x32xf32>
    %c800 = arith.constant 800 : index
    %c0_83 = arith.constant 0 : index
    %227 = vector.load %arg1[%c800, %c0_83] : memref<1208x128xf32, #tpu.memory_space<vmem>>, vector<32x96xf32>
    %cst_84 = arith.constant dense<0.000000e+00> : vector<64x96xf32>
    %228 = tpu.matmul %226, %227, %cst_84 {dimension_numbers = #tpu.dot_dimension_numbers<[1], [0], [0], [1], [0, 0, 1, 1], [], []>} : vector<64x32xf32>, vector<32x96xf32>, vector<64x96xf32> -> vector<64x96xf32>
    %c832 = arith.constant 832 : index
    %c0_85 = arith.constant 0 : index
    %229 = vector.load %arg1[%c832, %c0_85] : memref<1208x128xf32, #tpu.memory_space<vmem>>, vector<1x96xf32>
    %230 = vector.broadcast %229 : vector<1x96xf32> to vector<64x96xf32>
    %231 = arith.addf %228, %230 : vector<64x96xf32>
    %232 = vector.extract_strided_slice %231 {offsets = [0, 0], sizes = [64, 32], strides = [1, 1]} : vector<64x96xf32> to vector<64x32xf32>
    %233 = vector.extract_strided_slice %231 {offsets = [0, 32], sizes = [64, 32], strides = [1, 1]} : vector<64x96xf32> to vector<64x32xf32>
    %234 = vector.extract_strided_slice %231 {offsets = [0, 64], sizes = [64, 32], strides = [1, 1]} : vector<64x96xf32> to vector<64x32xf32>
    %235 = vector.extract_strided_slice %232 {offsets = [0, 0], sizes = [64, 16], strides = [1, 1]} : vector<64x32xf32> to vector<64x16xf32>
    %236 = vector.extract_strided_slice %233 {offsets = [0, 0], sizes = [64, 16], strides = [1, 1]} : vector<64x32xf32> to vector<64x16xf32>
    %cst_86 = arith.constant dense<0.000000e+00> : vector<64x64xf32>
    %237 = tpu.matmul %235, %236, %cst_86 {dimension_numbers = #tpu.dot_dimension_numbers<[1], [1], [0], [0], [0, 0, 1, 0], [], []>} : vector<64x16xf32>, vector<64x16xf32>, vector<64x64xf32> -> vector<64x64xf32>
    %cst_87 = arith.constant 2.500000e-01 : f32
    %238 = vector.broadcast %cst_87 : f32 to vector<64x64xf32>
    %239 = arith.mulf %237, %238 : vector<64x64xf32>
    %240 = arith.addf %239, %202 : vector<64x64xf32>
    %cst_88 = arith.constant dense<0xFF800000> : vector<64xf32>
    %241 = vector.multi_reduction <maximumf>, %240, %cst_88 [1] : vector<64x64xf32> to vector<64xf32>
    %242 = vector.shape_cast %241 : vector<64xf32> to vector<64x1xf32>
    %243 = vector.broadcast %242 : vector<64x1xf32> to vector<64x64xf32>
    %244 = arith.subf %240, %243 : vector<64x64xf32>
    %245 = math.exp %244 : vector<64x64xf32>
    %cst_89 = arith.constant dense<0.000000e+00> : vector<64xf32>
    %246 = vector.multi_reduction <add>, %245, %cst_89 [1] : vector<64x64xf32> to vector<64xf32>
    %247 = vector.shape_cast %246 : vector<64xf32> to vector<64x1xf32>
    %248 = tpu.reciprocal %247 {approx = true} : vector<64x1xf32> -> vector<64x1xf32>
    %249 = vector.broadcast %248 : vector<64x1xf32> to vector<64x64xf32>
    %250 = arith.mulf %245, %249 : vector<64x64xf32>
    %251 = vector.extract_strided_slice %234 {offsets = [0, 0], sizes = [64, 16], strides = [1, 1]} : vector<64x32xf32> to vector<64x16xf32>
    %cst_90 = arith.constant dense<0.000000e+00> : vector<64x16xf32>
    %252 = tpu.matmul %250, %251, %cst_90 {dimension_numbers = #tpu.dot_dimension_numbers<[1], [0], [0], [1], [0, 0, 1, 1], [], []>} : vector<64x64xf32>, vector<64x16xf32>, vector<64x16xf32> -> vector<64x16xf32>
    %253 = vector.extract_strided_slice %232 {offsets = [0, 16], sizes = [64, 16], strides = [1, 1]} : vector<64x32xf32> to vector<64x16xf32>
    %254 = vector.extract_strided_slice %233 {offsets = [0, 16], sizes = [64, 16], strides = [1, 1]} : vector<64x32xf32> to vector<64x16xf32>
    %cst_91 = arith.constant dense<0.000000e+00> : vector<64x64xf32>
    %255 = tpu.matmul %253, %254, %cst_91 {dimension_numbers = #tpu.dot_dimension_numbers<[1], [1], [0], [0], [0, 0, 1, 0], [], []>} : vector<64x16xf32>, vector<64x16xf32>, vector<64x64xf32> -> vector<64x64xf32>
    %cst_92 = arith.constant 2.500000e-01 : f32
    %256 = vector.broadcast %cst_92 : f32 to vector<64x64xf32>
    %257 = arith.mulf %255, %256 : vector<64x64xf32>
    %258 = arith.addf %257, %202 : vector<64x64xf32>
    %cst_93 = arith.constant dense<0xFF800000> : vector<64xf32>
    %259 = vector.multi_reduction <maximumf>, %258, %cst_93 [1] : vector<64x64xf32> to vector<64xf32>
    %260 = vector.shape_cast %259 : vector<64xf32> to vector<64x1xf32>
    %261 = vector.broadcast %260 : vector<64x1xf32> to vector<64x64xf32>
    %262 = arith.subf %258, %261 : vector<64x64xf32>
    %263 = math.exp %262 : vector<64x64xf32>
    %cst_94 = arith.constant dense<0.000000e+00> : vector<64xf32>
    %264 = vector.multi_reduction <add>, %263, %cst_94 [1] : vector<64x64xf32> to vector<64xf32>
    %265 = vector.shape_cast %264 : vector<64xf32> to vector<64x1xf32>
    %266 = tpu.reciprocal %265 {approx = true} : vector<64x1xf32> -> vector<64x1xf32>
    %267 = vector.broadcast %266 : vector<64x1xf32> to vector<64x64xf32>
    %268 = arith.mulf %263, %267 : vector<64x64xf32>
    %269 = vector.extract_strided_slice %234 {offsets = [0, 16], sizes = [64, 16], strides = [1, 1]} : vector<64x32xf32> to vector<64x16xf32>
    %cst_95 = arith.constant dense<0.000000e+00> : vector<64x16xf32>
    %270 = tpu.matmul %268, %269, %cst_95 {dimension_numbers = #tpu.dot_dimension_numbers<[1], [0], [0], [1], [0, 0, 1, 1], [], []>} : vector<64x64xf32>, vector<64x16xf32>, vector<64x16xf32> -> vector<64x16xf32>
    %271 = tpu.concatenate %252, %270 in 1 : vector<64x16xf32>, vector<64x16xf32> -> vector<64x32xf32>
    %c840 = arith.constant 840 : index
    %c0_96 = arith.constant 0 : index
    %272 = vector.load %arg1[%c840, %c0_96] : memref<1208x128xf32, #tpu.memory_space<vmem>>, vector<32x32xf32>
    %cst_97 = arith.constant dense<0.000000e+00> : vector<64x32xf32>
    %273 = tpu.matmul %271, %272, %cst_97 {dimension_numbers = #tpu.dot_dimension_numbers<[1], [0], [0], [1], [0, 0, 1, 1], [], []>} : vector<64x32xf32>, vector<32x32xf32>, vector<64x32xf32> -> vector<64x32xf32>
    %274 = arith.addf %201, %273 : vector<64x32xf32>
    %c872 = arith.constant 872 : index
    %c0_98 = arith.constant 0 : index
    %275 = vector.load %arg1[%c872, %c0_98] : memref<1208x128xf32, #tpu.memory_space<vmem>>, vector<1x32xf32>
    %276 = vector.broadcast %275 : vector<1x32xf32> to vector<64x32xf32>
    %277 = arith.addf %274, %276 : vector<64x32xf32>
    %c880 = arith.constant 880 : index
    %c0_99 = arith.constant 0 : index
    %278 = vector.load %arg1[%c880, %c0_99] : memref<1208x128xf32, #tpu.memory_space<vmem>>, vector<1x32xf32>
    %c888 = arith.constant 888 : index
    %c0_100 = arith.constant 0 : index
    %279 = vector.load %arg1[%c888, %c0_100] : memref<1208x128xf32, #tpu.memory_space<vmem>>, vector<1x32xf32>
    %cst_101 = arith.constant dense<0.000000e+00> : vector<64xf32>
    %280 = vector.multi_reduction <add>, %277, %cst_101 [1] : vector<64x32xf32> to vector<64xf32>
    %281 = vector.shape_cast %280 : vector<64xf32> to vector<64x1xf32>
    %cst_102 = arith.constant 3.200000e+01 : f32
    %282 = vector.broadcast %cst_102 : f32 to vector<64x1xf32>
    %283 = arith.divf %281, %282 : vector<64x1xf32>
    %284 = vector.broadcast %283 : vector<64x1xf32> to vector<64x32xf32>
    %285 = arith.subf %277, %284 : vector<64x32xf32>
    %286 = arith.mulf %285, %285 : vector<64x32xf32>
    %cst_103 = arith.constant dense<0.000000e+00> : vector<64xf32>
    %287 = vector.multi_reduction <add>, %286, %cst_103 [1] : vector<64x32xf32> to vector<64xf32>
    %288 = vector.shape_cast %287 : vector<64xf32> to vector<64x1xf32>
    %cst_104 = arith.constant 3.200000e+01 : f32
    %289 = vector.broadcast %cst_104 : f32 to vector<64x1xf32>
    %290 = arith.divf %288, %289 : vector<64x1xf32>
    %291 = vector.broadcast %283 : vector<64x1xf32> to vector<64x32xf32>
    %292 = arith.subf %277, %291 : vector<64x32xf32>
    %cst_105 = arith.constant 9.99999974E-6 : f32
    %293 = vector.broadcast %cst_105 : f32 to vector<64x1xf32>
    %294 = arith.addf %290, %293 : vector<64x1xf32>
    %295 = math.rsqrt %294 : vector<64x1xf32>
    %296 = vector.broadcast %295 : vector<64x1xf32> to vector<64x32xf32>
    %297 = arith.mulf %292, %296 : vector<64x32xf32>
    %298 = vector.broadcast %278 : vector<1x32xf32> to vector<64x32xf32>
    %299 = arith.mulf %297, %298 : vector<64x32xf32>
    %300 = vector.broadcast %279 : vector<1x32xf32> to vector<64x32xf32>
    %301 = arith.addf %299, %300 : vector<64x32xf32>
    %c896 = arith.constant 896 : index
    %c0_106 = arith.constant 0 : index
    %302 = vector.load %arg1[%c896, %c0_106] : memref<1208x128xf32, #tpu.memory_space<vmem>>, vector<32x128xf32>
    %cst_107 = arith.constant dense<0.000000e+00> : vector<64x128xf32>
    %303 = tpu.matmul %301, %302, %cst_107 {dimension_numbers = #tpu.dot_dimension_numbers<[1], [0], [0], [1], [0, 0, 1, 1], [], []>} : vector<64x32xf32>, vector<32x128xf32>, vector<64x128xf32> -> vector<64x128xf32>
    %c928 = arith.constant 928 : index
    %c0_108 = arith.constant 0 : index
    %304 = vector.load %arg1[%c928, %c0_108] : memref<1208x128xf32, #tpu.memory_space<vmem>>, vector<1x128xf32>
    %305 = vector.broadcast %304 : vector<1x128xf32> to vector<64x128xf32>
    %306 = arith.addf %303, %305 : vector<64x128xf32>
    %cst_109 = arith.constant 1.702000e+00 : f32
    %307 = vector.broadcast %cst_109 : f32 to vector<64x128xf32>
    %308 = arith.mulf %307, %306 : vector<64x128xf32>
    %309 = arith.negf %308 : vector<64x128xf32>
    %310 = math.exp %309 : vector<64x128xf32>
    %cst_110 = arith.constant 1.000000e+00 : f32
    %311 = vector.broadcast %cst_110 : f32 to vector<64x128xf32>
    %312 = arith.addf %311, %310 : vector<64x128xf32>
    %313 = arith.divf %311, %312 : vector<64x128xf32>
    %314 = arith.mulf %306, %313 : vector<64x128xf32>
    %c936 = arith.constant 936 : index
    %c0_111 = arith.constant 0 : index
    %315 = vector.load %arg1[%c936, %c0_111] : memref<1208x128xf32, #tpu.memory_space<vmem>>, vector<128x32xf32>
    %cst_112 = arith.constant dense<0.000000e+00> : vector<64x32xf32>
    %316 = tpu.matmul %314, %315, %cst_112 {dimension_numbers = #tpu.dot_dimension_numbers<[1], [0], [0], [1], [0, 0, 1, 1], [], []>} : vector<64x128xf32>, vector<128x32xf32>, vector<64x32xf32> -> vector<64x32xf32>
    %c1064 = arith.constant 1064 : index
    %c0_113 = arith.constant 0 : index
    %317 = vector.load %arg1[%c1064, %c0_113] : memref<1208x128xf32, #tpu.memory_space<vmem>>, vector<1x32xf32>
    %318 = vector.broadcast %317 : vector<1x32xf32> to vector<64x32xf32>
    %319 = arith.addf %316, %318 : vector<64x32xf32>
    %320 = arith.addf %277, %319 : vector<64x32xf32>
    %c1136 = arith.constant 1136 : index
    %c0_114 = arith.constant 0 : index
    %321 = vector.load %arg1[%c1136, %c0_114] : memref<1208x128xf32, #tpu.memory_space<vmem>>, vector<1x32xf32>
    %c1144 = arith.constant 1144 : index
    %c0_115 = arith.constant 0 : index
    %322 = vector.load %arg1[%c1144, %c0_115] : memref<1208x128xf32, #tpu.memory_space<vmem>>, vector<1x32xf32>
    %cst_116 = arith.constant dense<0.000000e+00> : vector<64xf32>
    %323 = vector.multi_reduction <add>, %320, %cst_116 [1] : vector<64x32xf32> to vector<64xf32>
    %324 = vector.shape_cast %323 : vector<64xf32> to vector<64x1xf32>
    %cst_117 = arith.constant 3.200000e+01 : f32
    %325 = vector.broadcast %cst_117 : f32 to vector<64x1xf32>
    %326 = arith.divf %324, %325 : vector<64x1xf32>
    %327 = vector.broadcast %326 : vector<64x1xf32> to vector<64x32xf32>
    %328 = arith.subf %320, %327 : vector<64x32xf32>
    %329 = arith.mulf %328, %328 : vector<64x32xf32>
    %cst_118 = arith.constant dense<0.000000e+00> : vector<64xf32>
    %330 = vector.multi_reduction <add>, %329, %cst_118 [1] : vector<64x32xf32> to vector<64xf32>
    %331 = vector.shape_cast %330 : vector<64xf32> to vector<64x1xf32>
    %cst_119 = arith.constant 3.200000e+01 : f32
    %332 = vector.broadcast %cst_119 : f32 to vector<64x1xf32>
    %333 = arith.divf %331, %332 : vector<64x1xf32>
    %334 = vector.broadcast %326 : vector<64x1xf32> to vector<64x32xf32>
    %335 = arith.subf %320, %334 : vector<64x32xf32>
    %cst_120 = arith.constant 9.99999974E-6 : f32
    %336 = vector.broadcast %cst_120 : f32 to vector<64x1xf32>
    %337 = arith.addf %333, %336 : vector<64x1xf32>
    %338 = math.rsqrt %337 : vector<64x1xf32>
    %339 = vector.broadcast %338 : vector<64x1xf32> to vector<64x32xf32>
    %340 = arith.mulf %335, %339 : vector<64x32xf32>
    %341 = vector.broadcast %321 : vector<1x32xf32> to vector<64x32xf32>
    %342 = arith.mulf %340, %341 : vector<64x32xf32>
    %343 = vector.broadcast %322 : vector<1x32xf32> to vector<64x32xf32>
    %344 = arith.addf %342, %343 : vector<64x32xf32>
    %c1152 = arith.constant 1152 : index
    %c0_121 = arith.constant 0 : index
    %345 = vector.load %arg1[%c1152, %c0_121] : memref<1208x128xf32, #tpu.memory_space<vmem>>, vector<8x64xf32>
    %cst_122 = arith.constant dense<0.000000e+00> : vector<8x32xf32>
    %346 = tpu.matmul %345, %344, %cst_122 {dimension_numbers = #tpu.dot_dimension_numbers<[1], [0], [0], [1], [0, 0, 1, 1], [], []>} : vector<8x64xf32>, vector<64x32xf32>, vector<8x32xf32> -> vector<8x32xf32>
    %c1160 = arith.constant 1160 : index
    %c0_123 = arith.constant 0 : index
    %347 = vector.load %arg1[%c1160, %c0_123] : memref<1208x128xf32, #tpu.memory_space<vmem>>, vector<32x32xf32>
    %cst_124 = arith.constant dense<0.000000e+00> : vector<8x32xf32>
    %348 = tpu.matmul %346, %347, %cst_124 {dimension_numbers = #tpu.dot_dimension_numbers<[1], [0], [0], [1], [0, 0, 1, 1], [], []>} : vector<8x32xf32>, vector<32x32xf32>, vector<8x32xf32> -> vector<8x32xf32>
    %349 = arith.mulf %348, %348 : vector<8x32xf32>
    %cst_125 = arith.constant dense<0.000000e+00> : vector<8xf32>
    %350 = vector.multi_reduction <add>, %349, %cst_125 [1] : vector<8x32xf32> to vector<8xf32>
    %351 = vector.shape_cast %350 : vector<8xf32> to vector<8x1xf32>
    %cst_126 = arith.constant 9.99999996E-13 : f32
    %352 = vector.broadcast %cst_126 : f32 to vector<8x1xf32>
    %353 = arith.addf %351, %352 : vector<8x1xf32>
    %354 = math.rsqrt %353 : vector<8x1xf32>
    %355 = vector.broadcast %354 : vector<8x1xf32> to vector<8x32xf32>
    %356 = arith.mulf %348, %355 : vector<8x32xf32>
    %cst_127 = arith.constant dense<0.000000e+00> : vector<2x8xf32>
    %357 = tpu.matmul %185, %356, %cst_127 {dimension_numbers = #tpu.dot_dimension_numbers<[1], [1], [0], [0], [0, 0, 1, 0], [], []>} : vector<2x32xf32>, vector<8x32xf32>, vector<2x8xf32> -> vector<2x8xf32>
    %c1192 = arith.constant 1192 : index
    %c0_128 = arith.constant 0 : index
    %358 = vector.load %arg1[%c1192, %c0_128] : memref<1208x128xf32, #tpu.memory_space<vmem>>, vector<2x8xf32>
    %359 = arith.mulf %357, %358 : vector<2x8xf32>
    %c1200 = arith.constant 1200 : index
    %c0_129 = arith.constant 0 : index
    %360 = vector.load %arg1[%c1200, %c0_129] : memref<1208x128xf32, #tpu.memory_space<vmem>>, vector<8x128xf32>
    %cst_130 = arith.constant dense<0.000000e+00> : vector<2x128xf32>
    %361 = tpu.matmul %359, %360, %cst_130 {dimension_numbers = #tpu.dot_dimension_numbers<[1], [0], [0], [1], [0, 0, 1, 1], [], []>} : vector<2x8xf32>, vector<8x128xf32>, vector<2x128xf32> -> vector<2x128xf32>
    %c0_131 = arith.constant 0 : index
    %362 = memref.load %arg2[%c0_131] : memref<1xf32, #tpu.memory_space<smem>>
    %363 = vector.broadcast %362 : f32 to vector<2x128xf32>
    %364 = arith.mulf %361, %363 : vector<2x128xf32>
    %c0_132 = arith.constant 0 : index
    %c0_133 = arith.constant 0 : index
    %365 = vector.load %arg3[%c0_132, %c0_133] : memref<2x128xf32, #tpu.memory_space<vmem>>, vector<2x128xf32>
    tpu.vector_store %arg3[%c0_132, %c0_133], %364 {strides = array<i32>} : memref<2x128xf32, #tpu.memory_space<vmem>>, vector<2x128xf32>,
    return
  }
}

</mosaic_0001>

<bundles_post_ra>
// kernel: custom_clip_forward.1
= control target key start
LH: loop header
LB: loop body
LE: loop exit
PB: predicated region body
PF: predicated region fallthrough
CT: control target
= control target key end

     0   :  { %vm42_vm0 = vcmask 523264   ;;  %s4601_s0 = inlined_call_operand.vmem [shape: f32[8,192], index: 0, kind: input, shape index: {}]   ;;  %s4602_s1 = inlined_call_operand.vmem [shape: f32[1208,128], index: 1, kind: input, shape index: {}]   ;;  %s4603_s2 = inlined_call_operand.<no memory space> [shape: f32[1], index: 2, kind: input, shape index: {}]   ;;  %s4604_s3 = inlined_call_operand.hbm [shape: f32[2,128], index: 3, kind: output, shape index: {}]  }
   0x1   :  { %v33_v0 = vld [vmem:[%s4602_s1 + $0x78] sm:$0xff]  ;;  %v32_v1 = vld [vmem:[%s4602_s1 + $0x70] sm:$0xff]  ;;  %v31_v2 = vld [vmem:[%s4602_s1 + $0x68] sm:$0xff] }
   0x2   :  { %46 = vmatpush.msra.mxu0 %v33_v0  ;;  %v41_v3 = vld [vmem:[%s4602_s1 + $0xb8] sm:$0xff]  ;;  %v40_v4 = vld [vmem:[%s4602_s1 + $0xb0] sm:$0xff]  ;;  %v30_v5 = vld [vmem:[%s4602_s1 + $0x60] sm:$0xff] }
   0x3   :  { %74 = vmatpush.msra.mxu1 %v41_v3  ;;  %v39_v6 = vld [vmem:[%s4602_s1 + $0xa8] sm:$0xff]  ;;  %v29_v7 = vld [vmem:[%s4602_s1 + $0x58] sm:$0xff]  ;;  %v28_v8 = vld [vmem:[%s4602_s1 + $0x50] sm:$0xff] }
   0x4   :  { %47 = vmatpush.msra.mxu0 %v32_v1  ;;  %v38_v9 = vld [vmem:[%s4602_s1 + $0xa0] sm:$0xff]  ;;  %v27_v10 = vld [vmem:[%s4602_s1 + $0x48] sm:$0xff]  ;;  %v37_v11 = vld [vmem:[%s4602_s1 + $0x98] sm:$0xff] }
   0x5   :  { %75 = vmatpush.msra.mxu1 %v40_v4  ;;  %v36_v12 = vld [vmem:[%s4602_s1 + $0x90] sm:$0xff]  ;;  %v26_v13 = vld [vmem:[%s4602_s1 + $0x40] sm:$0xff]  ;;  %v35_v14 = vld [vmem:[%s4602_s1 + $0x88] sm:$0xff] }
   0x6   :  { %48 = vmatpush.msra.mxu0 %v31_v2  ;;  %v25_v15 = vld [vmem:[%s4602_s1 + $0x38] sm:$0xff]  ;;  %v34_v16 = vld [vmem:[%s4602_s1 + $0x80] sm:$0xff]  ;;  %v24_v17 = vld [vmem:[%s4602_s1 + $0x30] sm:$0xff] }
   0x7   :  { %76 = vmatpush.msra.mxu1 %v39_v6  ;;  %v17_v18 = vld [vmem:[%s4601_s0 + $0x8] sm:$0xff] }
   0x8   :  { %49 = vmatpush.msra.mxu0 %v30_v5 }
   0x9   :  { %77 = vmatpush.msra.mxu1 %v38_v9 }
   0xa   :  { %50 = vmatpush.msra.mxu0 %v29_v7 }
   0xb   :  { %78 = vmatpush.msra.mxu1 %v37_v11 }
   0xc   :  { %51 = vmatpush.msra.mxu0 %v28_v8 }
   0xd   :  { %79 = vmatpush.msra.mxu1 %v36_v12 }
   0xe   :  { %52 = vmatpush.msra.mxu0 %v27_v10 }
   0xf   :  { %80 = vmatpush.msra.mxu1 %v35_v14 }
  0x10   :  { %53 = vmatpush.msra.mxu0 %v26_v13 }
  0x11   :  { %9 = vsyncpa [#allocation4], 0  ;;  %v23_v19 = vld [vmem:[%s4602_s1 + $0x28] sm:$0xff]  ;;  %81 = vmatpush.msra.mxu1 %v34_v16  ;;  %v22_v20 = vld [vmem:[%s4602_s1 + $0x20] sm:$0xff]  ;;  %vm90_vm1 = vcmask 64512   ;;  %vm122_vm2 = vcmask 261120  }
  0x12   :  { %54 = vmatpush.msra.mxu0 %v25_v15  ;;  %2769 = vmatmul.msk.f32.vlgmr.msra.gmra.mxu1 %vm42_vm0, %v17_v18  ;;  %v21_v21 = vld [vmem:[%s4602_s1 + $0x18] sm:$0xff]  ;;  %v20_v22 = vld [vmem:[%s4602_s1 + $0x10] sm:$0xff]  ;;  %v19_v23 = vld [vmem:[%s4602_s1 + $0x8] sm:$0xff]  ;;  %vm126_vm3 = vcmask 254976   ;;  %v3182_v39 = vmov 32.0   ;;  %s3183_s8 = smov 112  }
  0x13   :  { %v18_v24 = vld [vmem:[%s4602_s1] sm:$0xff]  ;;  %v87_v30 = vld [vmem:[%s4602_s1 + $0xc8] sm:$0x3]  ;;  %v88_v31 = vld [vmem:[%s4602_s1 + $0xd0] sm:$0xff]  ;;  %2968 = vrcp.f32 %v3182_v39  ;;  %s3184_s9 = smov 80   ;;  %s3185_s10 = smov 96  }
  0x14   :  { %55 = vmatpush.msra.mxu0 %v24_v17  ;;  %v16_v25 = vld [vmem:[%s4601_s0] sm:$0xff]  ;;  %v89_v35 = vld [vmem:[%s4602_s1 + $0xd8] sm:$0x3]  ;;  %v2945_v10 = vld [vmem:[%s4602_s1 + $0xe8] ss:$0 sm:$0xff]  ;;  %s3186_s14 = smov 48  }
  0x15   :  { %v86_v29 = vld [vmem:[%s4602_s1 + $0xc0] sm:$0xff]  ;;  %s3187_s15 = smov 64   ;;  %s3188_s16 = smov 16  }
  0x16   :  { %56 = vmatpush.msra.mxu0 %v23_v19  ;;  %v2944_v6 = vld [vmem:[%s4602_s1 + $0xe0] ss:$0 sm:$0xff]  ;;  %s3189_s23 = smov [#allocation3]   ;;  %s2760_s27 = sshll.u32 %s4604_s3, 4  ;;  %s2761_s27 = int_to_ptr.hbm [resolvable:$true] %s2760_s27 }
  0x17   :  { %s2758_s24 = sshll.u32 %s3189_s23, 4  ;;  %s2759_s24 = int_to_ptr.vmem [resolvable:$true] %s2758_s24 }
  0x18   :  { %57 = vmatpush.msra.mxu0 %v22_v20 }
  0x19   :  { %v2969_v40 = vpop.eup %2968 }
  0x1a   :  { %58 = vmatpush.msra.mxu0 %v21_v21  ;;  %v131_v41 = vmul.f32 32.0, %v2969_v40  ;;  %vm135_vm4 = vweird.f32 %v2969_v40 }
  0x1c   :  { %59 = vmatpush.msra.mxu0 %v20_v22  ;;  %v132_v42 = vsub.f32 1.0, %v131_v41 }
  0x1e   :  { %60 = vmatpush.msra.mxu0 %v19_v23  ;;  %v133_v43 = vmul.f32 %v2969_v40, %v132_v42 }
  0x20   :  { %61 = vmatpush.msra.mxu0 %v18_v24  ;;  %v134_v44 = vadd.f32 %v2969_v40, %v133_v43 }
  0x21   :  { %62 = vmatmul.f32.vlgmr.msra.gmra.mxu0 %v16_v25 }
  0x22   :  { %v3305_v45 = vsel %vm135_vm4, %v2969_v40, %v134_v44 }
  0x8f   :  { %v83_v26 = vpop.f32.mrf.mxu1 }
  0x9e   :  { %v63_v27 = vpop.f32.mrf.mxu0 }
  0x9f   :  { %v84_v28 = vadd.f32 %v83_v26, %v63_v27 }
  0xa1   :  { %112 = vmatpush.msrb.mxu1 %v84_v28  ;;  %2894 = vmatpush.msra.mxu3 %v84_v28 }
  0xa2   :  { %2770 = vmatmul.msk.f32.vlgmr.msrb.gmra.mxu1 %vm90_vm1, %v86_v29  ;;  %2771 = vmatmul.msk.f32.vlgmr.msra.gmra.mxu3 %vm90_vm1, %v87_v30 }
 0x11f   :  { %v114_v32 = vpop.f32.mrf.mxu1 }
 0x120   :  { %v115_v33 = vadd.f32 %v114_v32, %v88_v31  ;;  %v238_v32 = vld [vmem:[%s4602_s1 + $0x118] sm:$0xff] }
 0x121   :  { %259 = vmatpush.msrb.mxu3 %v238_v32 }
 0x122   :  { %v123_v34 = vsel %vm122_vm2, %v115_v33, 0.0 }
 0x123   :  { %124 = vadd.xlane.f32.xlu0 %v123_v34  ;;  %v236_v34 = vld [vmem:[%s4602_s1 + $0x108] sm:$0xff] }
 0x125   :  { %v117_v36 = vpop.f32.mrf.mxu3 }
 0x126   :  { %v118_v37 = vadd.f32 %v117_v36, %v89_v35  ;;  %v235_v35 = vld [vmem:[%s4602_s1 + $0x100] sm:$0xff] }
 0x128   :  { %v127_v38 = vsel %vm126_vm3, %v118_v37, 0.0 }
 0x12b   :  { %128 = vadd.xlane.f32.xlu0 %v127_v38 }
 0x196   :  { %v125_v46 = vpop.xlane.xlu0 %124 }
 0x197   :  { %v137_v47 = vmul.f32 %v3305_v45, %v125_v46 }
 0x199   :  { %v139_v48 = vsub.f32 %v115_v33, %v137_v47  ;;  %v237_v33 = vld [vmem:[%s4602_s1 + $0x110] sm:$0xff] }
 0x19a   :  { %260 = vmatpush.msrb.mxu3 %v237_v33 }
 0x19b   :  { %v141_v49 = vmul.f32 %v139_v48, %v139_v48 }
 0x19c   :  { %261 = vmatpush.msrb.mxu3 %v236_v34 }
 0x19d   :  { %v143_v50 = vsel %vm122_vm2, %v141_v49, 0.0 }
 0x19e   :  { %144 = vadd.xlane.f32.xlu1 %v143_v50  ;;  %v129_v51 = vpop.xlane.xlu0 %128  ;;  %262 = vmatpush.msrb.mxu3 %v235_v35 }
 0x19f   :  { %v138_v52 = vmul.f32 %v3305_v45, %v129_v51  ;;  %v2946_v51 = vld [vmem:[%s4602_s1 + $0xf0] ss:$0 sm:$0xff] }
 0x1a1   :  { %v140_v53 = vsub.f32 %v118_v37, %v138_v52 }
 0x1a3   :  { %v142_v54 = vmul.f32 %v140_v53, %v140_v53 }
 0x1a5   :  { %v146_v55 = vsel %vm126_vm3, %v142_v54, 0.0 }
 0x1a6   :  { %147 = vadd.xlane.f32.xlu1 %v146_v55  ;;  %v2947_v55 = vld [vmem:[%s4602_s1 + $0xf8] ss:$0 sm:$0xff] }
 0x211   :  { %v145_v56 = vpop.xlane.xlu1 %144 }
 0x212   :  { %v149_v57 = vmul.f32 %v145_v56, %v3305_v45 }
 0x214   :  { %v151_v58 = vadd.f32 1e-05, %v149_v57 }
 0x216   :  { %2970 = vrsqrt.f32 %v151_v58  ;;  %vm159_vm6 = vweird.f32 %v151_v58 }
 0x219   :  { %v148_v59 = vpop.xlane.xlu1 %147 }
 0x21a   :  { %v150_v60 = vmul.f32 %v148_v59, %v3305_v45 }
 0x21c   :  { %v2971_v61 = vpop.eup %2970  ;;  %v152_v62 = vadd.f32 1e-05, %v150_v60 }
 0x21d   :  { %v154_v63 = vmul.f32 %v2971_v61, %v151_v58  ;;  %vm160_vm5 = vweird.f32 %v2971_v61 }
 0x21e   :  { %2972 = vrsqrt.f32 %v152_v62  ;;  %vm161_vm7 = vmor %vm159_vm6, %vm160_vm5  ;;  %vm169_vm9 = vweird.f32 %v152_v62  ;;  %vm276_vm5 = vcmask 130048   ;;  %vm312_vm6 = vcmask 80896  }
 0x21f   :  { %v155_v0 = vmul.f32 %v2971_v61, %v154_v63 }
 0x221   :  { %v156_v1 = vmul.f32 0.5, %v155_v0 }
 0x223   :  { %v157_v2 = vsub.f32 1.5, %v156_v1  ;;  %v2948_v1 = vld [vmem:[%s4602_s1 + $0x120] ss:$0 sm:$0xff] }
 0x224   :  { %v2973_v3 = vpop.eup %2972 }
 0x225   :  { %v158_v4 = vmul.f32 %v2971_v61, %v157_v2  ;;  %v164_v5 = vmul.f32 %v2973_v3, %v152_v62  ;;  %vm170_vm8 = vweird.f32 %v2973_v3 }
 0x226   :  { %vm171_vm10 = vmor %vm169_vm9, %vm170_vm8  ;;  %vm347_vm8 = vcmask 1041408  }
 0x227   :  { %v162_v7 = vsel %vm161_vm7, %v2971_v61, %v158_v4  ;;  %v165_v8 = vmul.f32 %v2973_v3, %v164_v5  ;;  %vm316_vm7 = vcmask 74752  }
 0x228   :  { %v173_v9 = vmul.f32 %v162_v7, %v139_v48 }
 0x229   :  { %v166_v11 = vmul.f32 0.5, %v165_v8 }
 0x22a   :  { %v176_v12 = vmul.f32 %v2944_v6, %v173_v9 }
 0x22b   :  { %v167_v13 = vsub.f32 1.5, %v166_v11 }
 0x22c   :  { %v3319_v14 = vadd.f32 %v2945_v10, %v176_v12 }
 0x22d   :  { %v168_v15 = vmul.f32 %v2973_v3, %v167_v13  ;;  %v181_v13 = vld [vmem:[%s4602_s1 + $0x210] sm:$0xff] }
 0x22e   :  { %v185_v16 = vsel %vm122_vm2, %v3319_v14, 0.0 }
 0x22f   :  { %v172_v17 = vsel %vm171_vm10, %v2973_v3, %v168_v15  ;;  %186 = vadd.xlane.f32.xlu2 %v185_v16 }
 0x230   :  { %v174_v18 = vmul.f32 %v172_v17, %v140_v53 }
 0x232   :  { %v177_v19 = vmul.f32 %v2944_v6, %v174_v18 }
 0x234   :  { %v3323_v20 = vadd.f32 %v2945_v10, %v177_v19  ;;  %v182_v19 = vld [vmem:[%s4602_s1 + $0x218] sm:$0x3] }
 0x236   :  { %v188_v21 = vsel %vm126_vm3, %v3323_v20, 0.0 }
 0x237   :  { %189 = vadd.xlane.f32.xlu2 %v188_v21 }
 0x2a2   :  { %v187_v22 = vpop.xlane.xlu2 %186 }
 0x2a3   :  { %v191_v23 = vmul.f32 %v187_v22, %v3305_v45 }
 0x2a5   :  { %v193_v24 = vsub.f32 %v3319_v14, %v191_v23 }
 0x2a7   :  { %v195_v25 = vmul.f32 %v193_v24, %v193_v24 }
 0x2a9   :  { %v197_v26 = vsel %vm122_vm2, %v195_v25, 0.0 }
 0x2aa   :  { %198 = vadd.xlane.f32.xlu0 %v197_v26  ;;  %v190_v27 = vpop.xlane.xlu2 %189 }
 0x2ab   :  { %v192_v28 = vmul.f32 %v190_v27, %v3305_v45 }
 0x2ad   :  { %v194_v29 = vsub.f32 %v3323_v20, %v192_v28 }
 0x2af   :  { %v196_v30 = vmul.f32 %v194_v29, %v194_v29 }
 0x2b1   :  { %v200_v31 = vsel %vm126_vm3, %v196_v30, 0.0 }
 0x2b2   :  { %201 = vadd.xlane.f32.xlu1 %v200_v31 }
 0x31d   :  { %v199_v36 = vpop.xlane.xlu0 %198 }
 0x31e   :  { %v203_v37 = vmul.f32 %v199_v36, %v3305_v45 }
 0x320   :  { %v205_v38 = vadd.f32 1e-05, %v203_v37 }
 0x322   :  { %2974 = vrsqrt.f32 %v205_v38  ;;  %vm213_vm12 = vweird.f32 %v205_v38 }
 0x325   :  { %v202_v39 = vpop.xlane.xlu1 %201 }
 0x326   :  { %v204_v40 = vmul.f32 %v202_v39, %v3305_v45 }
 0x328   :  { %v2975_v41 = vpop.eup %2974  ;;  %v206_v42 = vadd.f32 1e-05, %v204_v40 }
 0x329   :  { %v208_v43 = vmul.f32 %v2975_v41, %v205_v38  ;;  %vm214_vm11 = vweird.f32 %v2975_v41 }
 0x32a   :  { %2976 = vrsqrt.f32 %v206_v42  ;;  %vm215_vm13 = vmor %vm213_vm12, %vm214_vm11  ;;  %vm223_vm15 = vweird.f32 %v206_v42 }
 0x32b   :  { %v209_v44 = vmul.f32 %v2975_v41, %v208_v43 }
 0x32d   :  { %v210_v46 = vmul.f32 0.5, %v209_v44 }
 0x32f   :  { %v211_v47 = vsub.f32 1.5, %v210_v46 }
 0x330   :  { %v2977_v48 = vpop.eup %2976 }
 0x331   :  { %v212_v49 = vmul.f32 %v2975_v41, %v211_v47  ;;  %v218_v50 = vmul.f32 %v2977_v48, %v206_v42  ;;  %vm224_vm14 = vweird.f32 %v2977_v48 }
 0x332   :  { %vm225_vm4 = vmor %vm223_vm15, %vm224_vm14 }
 0x333   :  { %v216_v52 = vsel %vm215_vm13, %v2975_v41, %v212_v49  ;;  %v219_v53 = vmul.f32 %v2977_v48, %v218_v50 }
 0x334   :  { %v227_v54 = vmul.f32 %v216_v52, %v193_v24 }
 0x335   :  { %v220_v56 = vmul.f32 0.5, %v219_v53 }
 0x336   :  { %v230_v57 = vmul.f32 %v2946_v51, %v227_v54 }
 0x337   :  { %v221_v58 = vsub.f32 1.5, %v220_v56 }
 0x338   :  { %v233_v59 = vadd.f32 %v2947_v55, %v230_v57 }
 0x339   :  { %v222_v60 = vmul.f32 %v2977_v48, %v221_v58 }
 0x33a   :  { %2772 = vmatmul.msk.f32.vlgmr.msrb.gmra.mxu3 %vm122_vm2, %v233_v59 }
 0x33b   :  { %v226_v61 = vsel %vm225_vm4, %v2977_v48, %v222_v60 }
 0x33c   :  { %v228_v62 = vmul.f32 %v226_v61, %v194_v29 }
 0x33e   :  { %v231_v63 = vmul.f32 %v2946_v51, %v228_v62 }
 0x340   :  { %v234_v0 = vadd.f32 %v2947_v55, %v231_v63 }
 0x342   :  { %2773 = vmatmul.msk.f32.gmra.mxu3 %vm122_vm2, %v234_v0 }
 0x3bd   :  { %v264_v2 = vpop.f32.mrf.mxu3 }
 0x3be   :  { %v265_v3 = vadd.f32 %v2948_v1, %v264_v2 }
 0x3c0   :  { %373 = vrot.lane.b32.xlu1 %v265_v3, %s3183_s8  ;;  %377 = vrot.lane.b32.xlu0 %v265_v3, %s3184_s9 }
 0x3c5   :  { %v267_v4 = vpop.f32.mrf.mxu3 }
 0x3c6   :  { %v3360_v5 = vadd.f32 %v2948_v1, %v267_v4 }
 0x3c8   :  { %379 = vrot.lane.b32.xlu2 %v3360_v5, %s3184_s9  ;;  %274 = vrot.lane.b32.xlu0 %v3360_v5, %s3185_s10 }
 0x3d0   :  { %375 = vrot.lane.b32.xlu2 %v3360_v5, %s3183_s8 }
 0x3d8   :  { %272 = vrot.lane.b32.xlu2 %v265_v3, %s3185_s10 }
 0x422   :  { %v380_v6 = vpop.permute.xlu2 %379 }
 0x423   :  { %2781 = vmatpush.xpose.msk.msra.mxu3 %vm276_vm5, %v380_v6  ;;  %v487_v6 = vld [vmem:[%s4602_s1 + $0x140] sm:$0xff] }
 0x424   :  { %506 = vmatpush.msrb.mxu0 %v487_v6  ;;  %v666_v6 = vld [vmem:[%s4602_s1 + $0x1f8] sm:$0xff] }
 0x42a   :  { %v376_v8 = vpop.permute.xlu2 %375 }
 0x432   :  { %v378_v7 = vpop.permute.xlu0 %377  ;;  %v374_v9 = vpop.permute.xlu1 %373 }
 0x433   :  { %2782 = vmatpush.xpose.msk.msra.mxu3 %vm276_vm5, %v378_v7  ;;  %v273_v11 = vpop.permute.xlu2 %272  ;;  %v486_v7 = vld [vmem:[%s4602_s1 + $0x138] sm:$0xff] }
 0x434   :  { %507 = vmatpush.msrb.mxu0 %v486_v7  ;;  %v665_v7 = vld [vmem:[%s4602_s1 + $0x1f0] sm:$0xff] }
 0x436   :  { %2783 = vmatmul.msk.f32.vlgmr.msra.gmra.mxu3 %vm276_vm5, %v374_v9 }
 0x43a   :  { %v275_v10 = vpop.permute.xlu0 %274 }
 0x43b   :  { %2774 = vmatpush.xpose.msk.msra.mxu2 %vm276_vm5, %v275_v10  ;;  %v484_v10 = vld [vmem:[%s4602_s1 + $0x128] sm:$0xff] }
 0x43e   :  { %2784 = vmatmul.msk.f32.gmra.mxu3 %vm276_vm5, %v376_v8  ;;  %v485_v8 = vld [vmem:[%s4602_s1 + $0x130] sm:$0xff] }
 0x43f   :  { %2775 = vmatpush.xpose.msk.msra.mxu2 %vm276_vm5, %v273_v11  ;;  %508 = vmatpush.msrb.mxu0 %v485_v8  ;;  %v664_v8 = vld [vmem:[%s4602_s1 + $0x1e8] sm:$0xff] }
 0x441   :  { %509 = vmatpush.msrb.mxu0 %v484_v10  ;;  %v662_v10 = vld [vmem:[%s4602_s1 + $0x1d8] sm:$0xff] }
 0x442   :  { %2776 = vmatmul.msk.f32.vlgmr.msra.gmra.mxu2 %vm276_vm5, %v265_v3 }
 0x44a   :  { %2777 = vmatmul.msk.f32.gmra.mxu2 %vm276_vm5, %v3360_v5 }
 0x4b9   :  { %v406_v12 = vpop.f32.mrf.mxu3 }
 0x4ba   :  { %v412_v15 = vmul.f32 0.25, %v406_v12 }
 0x4bc   :  { %v414_v16 = vadd.f32 %v412_v15, %v181_v13 }
 0x4be   :  { %v416_v17 = vsel %vm312_vm6, %v414_v16, -inf }
 0x4bf   :  { %417 = vmax.xlane.f32.xlu1 %v416_v17 }
 0x4c1   :  { %v409_v18 = vpop.f32.mrf.mxu3 }
 0x4c2   :  { %v413_v21 = vmul.f32 0.25, %v409_v18  ;;  %v2949_v18 = vld [vmem:[%s4602_s1 + $0x148] ss:$0 sm:$0xff] }
 0x4c4   :  { %v415_v22 = vadd.f32 %v413_v21, %v182_v19 }
 0x4c5   :  { %v302_v23 = vpop.f32.mrf.mxu2 }
 0x4c6   :  { %v308_v24 = vmul.f32 0.25, %v302_v23  ;;  %v419_v25 = vsel %vm316_vm7, %v415_v22, -inf }
 0x4c7   :  { %420 = vmax.xlane.f32.xlu0 %v419_v25 }
 0x4c8   :  { %v310_v26 = vadd.f32 %v308_v24, %v181_v13 }
 0x4ca   :  { %v313_v27 = vsel %vm312_vm6, %v310_v26, -inf }
 0x4cb   :  { %314 = vmax.xlane.f32.xlu2 %v313_v27 }
 0x4cd   :  { %v305_v28 = vpop.f32.mrf.mxu2 }
 0x4ce   :  { %v309_v29 = vmul.f32 0.25, %v305_v28 }
 0x4d0   :  { %v311_v30 = vadd.f32 %v309_v29, %v182_v19 }
 0x4d2   :  { %v317_v31 = vsel %vm316_vm7, %v311_v30, -inf }
 0x4d3   :  { %318 = vmax.xlane.f32.xlu0 %v317_v31 }
 0x4e3   :  { %440 = vrot.lane.b32.xlu2 %v3360_v5, %s3186_s14 }
 0x4e7   :  { %438 = vrot.lane.b32.xlu0 %v265_v3, %s3186_s14 }
 0x4ef   :  { %336 = vrot.lane.b32.xlu0 %v265_v3, %s3187_s15 }
 0x532   :  { %v418_v32 = vpop.xlane.xlu1 %417 }
 0x533   :  { %v422_v33 = vsub.f32 %v414_v16, %v418_v32 }
 0x535   :  { %v424_v34 = vmul.f32 1.442695, %v422_v33 }
 0x537   :  { %2978 = vpow2.f32 %v424_v34 }
 0x53a   :  { %v421_v35 = vpop.xlane.xlu0 %420 }
 0x53b   :  { %v423_v36 = vsub.f32 %v415_v22, %v421_v35 }
 0x53d   :  { %v2979_v37 = vpop.eup %2978  ;;  %v426_v38 = vmul.f32 1.442695, %v423_v36  ;;  %v578_v36 = vld [vmem:[%s4602_s1 + $0x178] sm:$0xff] }
 0x53e   :  { %v315_v39 = vpop.xlane.xlu2 %314  ;;  %v428_v40 = vsel %vm312_vm6, %v2979_v37, 0.0 }
 0x53f   :  { %2980 = vpow2.f32 %v426_v38  ;;  %v320_v41 = vsub.f32 %v310_v26, %v315_v39  ;;  %429 = vadd.xlane.f32.xlu1 %v428_v40  ;;  %v576_v38 = vld [vmem:[%s4602_s1 + $0x168] sm:$0xff]  ;;  %v575_v39 = vld [vmem:[%s4602_s1 + $0x160] sm:$0xff] }
 0x541   :  { %v322_v42 = vmul.f32 1.442695, %v320_v41 }
 0x543   :  { %2982 = vpow2.f32 %v322_v42 }
 0x545   :  { %v2981_v43 = vpop.eup %2980 }
 0x546   :  { %v441_v44 = vpop.permute.xlu2 %440  ;;  %v319_v46 = vpop.xlane.xlu0 %318  ;;  %v431_v47 = vsel %vm316_vm7, %v2981_v43, 0.0 }
 0x547   :  { %v321_v48 = vsub.f32 %v311_v30, %v319_v46  ;;  %2785 = vmatpush.msk.msrb.mxu2 %vm347_vm8, %v441_v44  ;;  %432 = vadd.xlane.f32.xlu1 %v431_v47 }
 0x549   :  { %v324_v49 = vmul.f32 1.442695, %v321_v48  ;;  %v2983_v50 = vpop.eup %2982 }
 0x54a   :  { %v326_v51 = vsel %vm312_vm6, %v2983_v50, 0.0 }
 0x54b   :  { %2984 = vpow2.f32 %v324_v49 }
 0x54f   :  { %327 = vadd.xlane.f32.xlu1 %v326_v51 }
 0x551   :  { %v2985_v52 = vpop.eup %2984 }
 0x552   :  { %v329_v53 = vsel %vm316_vm7, %v2985_v52, 0.0 }
 0x553   :  { %330 = vadd.xlane.f32.xlu2 %v329_v53 }
 0x559   :  { %v439_v54 = vpop.permute.xlu0 %438 }
 0x55a   :  { %466 = vmatpush.msrb.mxu2 %v439_v54 }
 0x561   :  { %v337_v1 = vpop.permute.xlu0 %336 }
 0x568   :  { %338 = vrot.lane.b32.xlu1 %v3360_v5, %s3187_s15 }
 0x5b2   :  { %v430_v55 = vpop.xlane.xlu1 %429 }
 0x5b3   :  { %2986 = vrcp.f32 %v430_v55  ;;  %v2950_v55 = vld [vmem:[%s4602_s1 + $0x150] ss:$0 sm:$0xff] }
 0x5b9   :  { %v2987_v56 = vpop.eup %2986 }
 0x5ba   :  { %v433_v57 = vpop.xlane.xlu1 %432  ;;  %v436_v58 = vmul.f32 %v2987_v56, %v2979_v37  ;;  %v577_v37 = vld [vmem:[%s4602_s1 + $0x170] sm:$0xff] }
 0x5bb   :  { %2988 = vrcp.f32 %v433_v57 }
 0x5bc   :  { %2786 = vmatmul.msk.f32.vlgmr.msrb.gmra.mxu2 %vm312_vm6, %v436_v58 }
 0x5c1   :  { %v2989_v59 = vpop.eup %2988 }
 0x5c2   :  { %v437_v60 = vmul.f32 %v2989_v59, %v2981_v43  ;;  %v328_v61 = vpop.xlane.xlu1 %327  ;;  %v2951_v59 = vld [vmem:[%s4602_s1 + $0x158] ss:$0 sm:$0xff] }
 0x5c3   :  { %2990 = vrcp.f32 %v328_v61 }
 0x5c4   :  { %2787 = vmatmul.msk.f32.gmra.mxu2 %vm312_vm6, %v437_v60 }
 0x5c6   :  { %v331_v62 = vpop.xlane.xlu2 %330 }
 0x5c7   :  { %2992 = vrcp.f32 %v331_v62 }
 0x5c9   :  { %v2991_v63 = vpop.eup %2990 }
 0x5ca   :  { %v334_v2 = vmul.f32 %v2991_v63, %v2983_v50 }
 0x5cd   :  { %v2993_v3 = vpop.eup %2992 }
 0x5ce   :  { %v335_v4 = vmul.f32 %v2993_v3, %v2985_v52 }
 0x5da   :  { %v339_v0 = vpop.permute.xlu1 %338 }
 0x5db   :  { %2778 = vmatpush.msk.msra.mxu1 %vm347_vm8, %v339_v0 }
 0x5dd   :  { %365 = vmatpush.msra.mxu1 %v337_v1 }
 0x5de   :  { %2779 = vmatmul.msk.f32.vlgmr.msra.gmra.mxu1 %vm312_vm6, %v334_v2 }
 0x5df   :  { %599 = vmatpush.msrb.mxu1 %v578_v36 }
 0x5e1   :  { %600 = vmatpush.msrb.mxu1 %v577_v37 }
 0x5e3   :  { %601 = vmatpush.msrb.mxu1 %v576_v38 }
 0x5e5   :  { %602 = vmatpush.msrb.mxu1 %v575_v39 }
 0x5e6   :  { %2780 = vmatmul.msk.f32.gmra.mxu1 %vm312_vm6, %v335_v4 }
 0x63f   :  { %v468_v5 = vpop.f32.mrf.mxu2 }
 0x640   :  { %476 = vrot.lane.b32.xlu0 %v468_v5, %s3188_s16  ;;  %v667_v5 = vld [vmem:[%s4602_s1 + $0x200] sm:$0xff] }
 0x641   :  { %670 = vmatpush.msrb.mxu3 %v667_v5 }
 0x643   :  { %671 = vmatpush.msrb.mxu3 %v666_v6 }
 0x645   :  { %672 = vmatpush.msrb.mxu3 %v665_v7 }
 0x647   :  { %v471_v9 = vpop.f32.mrf.mxu2  ;;  %673 = vmatpush.msrb.mxu3 %v664_v8  ;;  %v753_v8 = vld [vmem:[%s4602_s1 + $0x250] sm:$0xff] }
 0x648   :  { %478 = vrot.lane.b32.xlu0 %v471_v9, %s3188_s16  ;;  %v663_v9 = vld [vmem:[%s4602_s1 + $0x1e0] sm:$0xff]  ;;  %769 = vmatpush.msra.mxu0 %v753_v8 }
 0x649   :  { %674 = vmatpush.msrb.mxu3 %v663_v9  ;;  %v752_v9 = vld [vmem:[%s4602_s1 + $0x248] sm:$0xff]  ;;  %v855_v8 = vld [vmem:[%s4602_s1 + $0x2a0] sm:$0xff] }
 0x64a   :  { %770 = vmatpush.msra.mxu0 %v752_v9 }
 0x64b   :  { %675 = vmatpush.msrb.mxu3 %v662_v10  ;;  %v751_v10 = vld [vmem:[%s4602_s1 + $0x240] sm:$0xff] }
 0x64c   :  { %771 = vmatpush.msra.mxu0 %v751_v10 }
 0x65b   :  { %v367_v11 = vpop.f32.mrf.mxu1 }
 0x663   :  { %v370_v15 = vpop.f32.mrf.mxu1 }
 0x6b2   :  { %v477_v12 = vpop.permute.xlu0 %476 }
 0x6b3   :  { %v482_v13 = vsel %vm276_vm5, %v367_v11, %v477_v12  ;;  %v661_v11 = vld [vmem:[%s4602_s1 + $0x1d0] sm:$0xff]  ;;  %v660_v12 = vld [vmem:[%s4602_s1 + $0x1c8] sm:$0xff] }
 0x6b4   :  { %2788 = vmatmul.msk.f32.vlgmr.msrb.gmra.mxu0 %vm122_vm2, %v482_v13  ;;  %676 = vmatpush.msrb.mxu3 %v661_v11  ;;  %v659_v13 = vld [vmem:[%s4602_s1 + $0x1c0] sm:$0xff]  ;;  %v750_v11 = vld [vmem:[%s4602_s1 + $0x238] sm:$0xff] }
 0x6b5   :  { %772 = vmatpush.msra.mxu0 %v750_v11 }
 0x6b6   :  { %677 = vmatpush.msrb.mxu3 %v660_v12 }
 0x6b8   :  { %678 = vmatpush.msrb.mxu3 %v659_v13 }
 0x6ba   :  { %v479_v16 = vpop.permute.xlu0 %478 }
 0x6bb   :  { %v483_v17 = vsel %vm276_vm5, %v370_v15, %v479_v16  ;;  %v658_v15 = vld [vmem:[%s4602_s1 + $0x1b8] sm:$0xff]  ;;  %v657_v16 = vld [vmem:[%s4602_s1 + $0x1b0] sm:$0xff] }
 0x6bc   :  { %2789 = vmatmul.msk.f32.gmra.mxu0 %vm122_vm2, %v483_v17  ;;  %679 = vmatpush.msrb.mxu3 %v658_v15  ;;  %v656_v17 = vld [vmem:[%s4602_s1 + $0x1a8] sm:$0xff] }
 0x6be   :  { %680 = vmatpush.msrb.mxu3 %v657_v16 }
 0x6c0   :  { %681 = vmatpush.msrb.mxu3 %v656_v17 }
 0x731   :  { %v511_v19 = vpop.f32.mrf.mxu0 }
 0x732   :  { %v517_v21 = vadd.f32 %v511_v19, %v3319_v14  ;;  %v2952_v19 = vld [vmem:[%s4602_s1 + $0x180] ss:$0 sm:$0xff] }
 0x734   :  { %v3426_v22 = vadd.f32 %v2949_v18, %v517_v21  ;;  %v654_v21 = vld [vmem:[%s4602_s1 + $0x198] sm:$0xff] }
 0x736   :  { %v525_v23 = vsel %vm122_vm2, %v3426_v22, 0.0 }
 0x737   :  { %526 = vadd.xlane.f32.xlu1 %v525_v23  ;;  %v653_v23 = vld [vmem:[%s4602_s1 + $0x190] sm:$0xff] }
 0x739   :  { %v514_v24 = vpop.f32.mrf.mxu0 }
 0x73a   :  { %v518_v25 = vadd.f32 %v514_v24, %v3323_v20 }
 0x73c   :  { %v3431_v26 = vadd.f32 %v2949_v18, %v518_v25  ;;  %v655_v18 = vld [vmem:[%s4602_s1 + $0x1a0] sm:$0xff] }
 0x73d   :  { %682 = vmatpush.msrb.mxu3 %v655_v18 }
 0x73e   :  { %v528_v27 = vsel %vm126_vm3, %v3431_v26, 0.0 }
 0x73f   :  { %529 = vadd.xlane.f32.xlu0 %v528_v27  ;;  %683 = vmatpush.msrb.mxu3 %v654_v21  ;;  %v652_v27 = vld [vmem:[%s4602_s1 + $0x188] sm:$0xff] }
 0x741   :  { %684 = vmatpush.msrb.mxu3 %v653_v23 }
 0x743   :  { %685 = vmatpush.msrb.mxu3 %v652_v27 }
 0x7aa   :  { %v527_v28 = vpop.xlane.xlu1 %526 }
 0x7ab   :  { %v531_v29 = vmul.f32 %v527_v28, %v3305_v45 }
 0x7ad   :  { %v533_v14 = vsub.f32 %v3426_v22, %v531_v29 }
 0x7af   :  { %v535_v30 = vmul.f32 %v533_v14, %v533_v14 }
 0x7b1   :  { %v537_v31 = vsel %vm122_vm2, %v535_v30, 0.0 }
 0x7b2   :  { %538 = vadd.xlane.f32.xlu2 %v537_v31  ;;  %v530_v32 = vpop.xlane.xlu0 %529 }
 0x7b3   :  { %v532_v33 = vmul.f32 %v530_v32, %v3305_v45 }
 0x7b5   :  { %v534_v20 = vsub.f32 %v3431_v26, %v532_v33 }
 0x7b7   :  { %v536_v34 = vmul.f32 %v534_v20, %v534_v20 }
 0x7b9   :  { %v540_v35 = vsel %vm126_vm3, %v536_v34, 0.0 }
 0x7ba   :  { %541 = vadd.xlane.f32.xlu2 %v540_v35 }
 0x825   :  { %v539_v40 = vpop.xlane.xlu2 %538 }
 0x826   :  { %v543_v41 = vmul.f32 %v539_v40, %v3305_v45 }
 0x828   :  { %v545_v42 = vadd.f32 1e-05, %v543_v41 }
 0x82a   :  { %2994 = vrsqrt.f32 %v545_v42  ;;  %vm553_vm10 = vweird.f32 %v545_v42 }
 0x82d   :  { %v542_v43 = vpop.xlane.xlu2 %541 }
 0x82e   :  { %v544_v44 = vmul.f32 %v542_v43, %v3305_v45 }
 0x830   :  { %v2995_v46 = vpop.eup %2994  ;;  %v546_v47 = vadd.f32 1e-05, %v544_v44 }
 0x831   :  { %v548_v48 = vmul.f32 %v2995_v46, %v545_v42  ;;  %vm554_vm9 = vweird.f32 %v2995_v46 }
 0x832   :  { %2996 = vrsqrt.f32 %v546_v47  ;;  %vm555_vm11 = vmor %vm553_vm10, %vm554_vm9  ;;  %vm563_vm13 = vweird.f32 %v546_v47 }
 0x833   :  { %v549_v49 = vmul.f32 %v2995_v46, %v548_v48 }
 0x835   :  { %v550_v50 = vmul.f32 0.5, %v549_v49 }
 0x837   :  { %v551_v51 = vsub.f32 1.5, %v550_v50 }
 0x838   :  { %v2997_v52 = vpop.eup %2996 }
 0x839   :  { %v552_v53 = vmul.f32 %v2995_v46, %v551_v51  ;;  %v558_v54 = vmul.f32 %v2997_v52, %v546_v47  ;;  %vm564_vm12 = vweird.f32 %v2997_v52 }
 0x83a   :  { %vm565_vm14 = vmor %vm563_vm13, %vm564_vm12 }
 0x83b   :  { %v556_v56 = vsel %vm555_vm11, %v2995_v46, %v552_v53  ;;  %v559_v57 = vmul.f32 %v2997_v52, %v558_v54 }
 0x83c   :  { %v567_v58 = vmul.f32 %v556_v56, %v533_v14 }
 0x83d   :  { %v560_v60 = vmul.f32 0.5, %v559_v57 }
 0x83e   :  { %v570_v61 = vmul.f32 %v2950_v55, %v567_v58 }
 0x83f   :  { %v561_v62 = vsub.f32 1.5, %v560_v60  ;;  %v2953_v60 = vld [vmem:[%s4602_s1 + $0x208] ss:$0 sm:$0xff] }
 0x840   :  { %v573_v63 = vadd.f32 %v2951_v59, %v570_v61 }
 0x841   :  { %v562_v0 = vmul.f32 %v2997_v52, %v561_v62 }
 0x842   :  { %2790 = vmatmul.msk.f32.vlgmr.msrb.gmra.mxu1 %vm122_vm2, %v573_v63 }
 0x843   :  { %v566_v1 = vsel %vm565_vm14, %v2997_v52, %v562_v0 }
 0x844   :  { %v568_v2 = vmul.f32 %v566_v1, %v534_v20 }
 0x846   :  { %v571_v3 = vmul.f32 %v2950_v55, %v568_v2  ;;  %v695_v2 = vld [vmem:[%s4602_s1 + $0x220] sm:$0x3] }
 0x848   :  { %v574_v4 = vadd.f32 %v2951_v59, %v571_v3 }
 0x84a   :  { %2791 = vmatmul.msk.f32.gmra.mxu1 %vm122_vm2, %v574_v4 }
 0x8bf   :  { %v604_v24 = vpop.f32.mrf.mxu1 }
 0x8c0   :  { %v605_v25 = vadd.f32 %v2952_v19, %v604_v24  ;;  %v2954_v24 = vld [vmem:[%s4602_s1 + $0x228] ss:$0 sm:$0xff] }
 0x8c2   :  { %v2792_v28 = vmul.f32 -1.702, %v605_v25 }
 0x8c4   :  { %v614_v29 = vmul.f32 1.442695, %v2792_v28  ;;  %v2955_v28 = vld [vmem:[%s4602_s1 + $0x230] ss:$0 sm:$0xff] }
 0x8c6   :  { %2998 = vpow2.f32 %v614_v29 }
 0x8c7   :  { %v607_v14 = vpop.f32.mrf.mxu1 }
 0x8c8   :  { %v608_v30 = vadd.f32 %v2952_v19, %v607_v14 }
 0x8ca   :  { %v2793_v31 = vmul.f32 -1.702, %v608_v30 }
 0x8cc   :  { %v2999_v32 = vpop.eup %2998  ;;  %v616_v33 = vmul.f32 1.442695, %v2793_v31 }
 0x8cd   :  { %v618_v20 = vadd.f32 1.0, %v2999_v32 }
 0x8ce   :  { %3000 = vpow2.f32 %v616_v33  ;;  %v796_v33 = vld [vmem:[%s4602_s1 + $0x270] sm:$0xff] }
 0x8cf   :  { %3002 = vrcp.f32 %v618_v20  ;;  %v631_v39 = vand.u32 2147483648, %v618_v20  ;;  %v629_v41 = vand.u32 2147483647, %v618_v20  ;;  %vm625_vm4 = vweird.f32 %v618_v20  ;;  %814 = vmatpush.msra.mxu1 %v796_v33 }
 0x8d1   :  { %v632_v44 = vor.u32 1.1754944e-38, %v631_v39  ;;  %vm630_vm9 = vcmp.eq.f32.partialorder %v629_v41, 8.507059e+37 }
 0x8d4   :  { %v3001_v34 = vpop.eup %3000 }
 0x8d5   :  { %v3003_v35 = vpop.eup %3002  ;;  %v619_v36 = vadd.f32 1.0, %v3001_v34  ;;  %v794_v34 = vld [vmem:[%s4602_s1 + $0x260] sm:$0xff] }
 0x8d6   :  { %v621_v37 = vmul.f32 %v3003_v35, %v618_v20  ;;  %vm626_vm15 = vweird.f32 %v3003_v35  ;;  %v795_v20 = vld [vmem:[%s4602_s1 + $0x268] sm:$0xff] }
 0x8d7   :  { %3004 = vrcp.f32 %v619_v36  ;;  %vm627_vm7 = vmor %vm625_vm4, %vm626_vm15  ;;  %v646_v51 = vand.u32 2147483648, %v619_v36  ;;  %v644_v53 = vand.u32 2147483647, %v619_v36  ;;  %vm640_vm11 = vweird.f32 %v619_v36  ;;  %815 = vmatpush.msra.mxu1 %v795_v20 }
 0x8d8   :  { %v622_v38 = vsub.f32 1.0, %v621_v37 }
 0x8d9   :  { %v647_v55 = vor.u32 1.1754944e-38, %v646_v51  ;;  %vm645_vm13 = vcmp.eq.f32.partialorder %v644_v53, 8.507059e+37  ;;  %816 = vmatpush.msra.mxu1 %v794_v34 }
 0x8da   :  { %v623_v40 = vmul.f32 %v3003_v35, %v622_v38 }
 0x8dc   :  { %v624_v42 = vadd.f32 %v3003_v35, %v623_v40 }
 0x8dd   :  { %v3005_v43 = vpop.eup %3004 }
 0x8de   :  { %v628_v46 = vsel %vm627_vm7, %v3003_v35, %v624_v42  ;;  %v636_v47 = vmul.f32 %v3005_v43, %v619_v36  ;;  %vm641_vm10 = vweird.f32 %v3005_v43  ;;  %v793_v35 = vld [vmem:[%s4602_s1 + $0x258] sm:$0xff] }
 0x8df   :  { %v633_v48 = vsel %vm630_vm9, %v632_v44, %v628_v46  ;;  %vm642_vm12 = vmor %vm640_vm11, %vm641_vm10  ;;  %817 = vmatpush.msra.mxu1 %v793_v35  ;;  %vm826_vm9 = vcmask 15360  }
 0x8e0   :  { %v650_v49 = vmul.f32 %v633_v48, %v605_v25  ;;  %v637_v50 = vsub.f32 1.0, %v636_v47  ;;  %v823_v47 = vld [vmem:[%s4602_s1 + $0x280] sm:$0x3]  ;;  %v2956_v48 = vld [vmem:[%s4602_s1 + $0x278] ss:$0 sm:$0xff] }
 0x8e2   :  { %686 = vmatmul.f32.vlgmr.msrb.gmra.mxu3 %v650_v49  ;;  %v638_v52 = vmul.f32 %v3005_v43, %v637_v50 }
 0x8e4   :  { %v639_v54 = vadd.f32 %v3005_v43, %v638_v52  ;;  %v2957_v52 = vld [vmem:[%s4602_s1 + $0x288] ss:$0 sm:$0xff] }
 0x8e6   :  { %v643_v56 = vsel %vm642_vm12, %v3005_v43, %v639_v54 }
 0x8e7   :  { %v648_v57 = vsel %vm645_vm13, %v647_v55, %v643_v56  ;;  %v861_v55 = vld [vmem:[%s4602_s1 + $0x2d0] sm:$0xff] }
 0x8e8   :  { %v651_v58 = vmul.f32 %v648_v57, %v608_v30  ;;  %v865_v56 = vld [vmem:[%s4602_s1 + $0x2f0] sm:$0xff]  ;;  %v862_v57 = vld [vmem:[%s4602_s1 + $0x2d8] sm:$0xff] }
 0x8ea   :  { %689 = vmatmul.f32.gmra.mxu3 %v651_v58  ;;  %v866_v58 = vld [vmem:[%s4602_s1 + $0x2f8] sm:$0xff] }
 0x965   :  { %v687_v59 = vpop.f32.mrf.mxu3 }
 0x966   :  { %v688_v62 = vadd.f32 %v2953_v60, %v687_v59  ;;  %v863_v59 = vld [vmem:[%s4602_s1 + $0x2e0] sm:$0xff] }
 0x968   :  { %v693_v1 = vadd.f32 %v688_v62, %v3426_v22  ;;  %v868_v62 = vld [vmem:[%s4602_s1 + $0x308] sm:$0xff] }
 0x96d   :  { %v690_v61 = vpop.f32.mrf.mxu3 }
 0x96e   :  { %v691_v63 = vadd.f32 %v2953_v60, %v690_v61  ;;  %v867_v60 = vld [vmem:[%s4602_s1 + $0x300] sm:$0xff]  ;;  %v864_v61 = vld [vmem:[%s4602_s1 + $0x2e8] sm:$0xff] }
 0x970   :  { %v694_v0 = vadd.f32 %v691_v63, %v3431_v26  ;;  %v853_v63 = vld [vmem:[%s4602_s1 + $0x290] sm:$0xff] }
 0x972   :  { %2794 = vmatpush.msk.msra.mxu2 %vm347_vm8, %v694_v0 }
 0x974   :  { %717 = vmatpush.msra.mxu2 %v693_v1 }
 0x975   :  { %2795 = vmatmul.msk.f32.vlgmr.msra.gmra.mxu2 %vm312_vm6, %v695_v2 }
 0x976   :  { %2798 = vmatpush.msk.msrb.mxu2 %vm347_vm8, %v823_v47 }
 0x9f8   :  { %v719_v3 = vpop.f32.mrf.mxu2 }
 0x9f9   :  { %v724_v4 = vsel %vm126_vm3, %v719_v3, 0.0 }
 0x9fa   :  { %725 = vadd.xlane.f32.xlu2 %v724_v4 }
 0xa6d   :  { %v726_v5 = vpop.xlane.xlu2 %725 }
 0xa6e   :  { %v727_v6 = vmul.f32 %v726_v5, %v3305_v45 }
 0xa70   :  { %v728_v7 = vsub.f32 %v719_v3, %v727_v6  ;;  %v854_v3 = vld [vmem:[%s4602_s1 + $0x298] sm:$0xff] }
 0xa72   :  { %v729_v26 = vmul.f32 %v728_v7, %v728_v7 }
 0xa74   :  { %v730_v22 = vsel %vm126_vm3, %v729_v26, 0.0 }
 0xa75   :  { %731 = vadd.xlane.f32.xlu1 %v730_v22 }
 0xae8   :  { %v732_v12 = vpop.xlane.xlu1 %731 }
 0xae9   :  { %v733_v13 = vmul.f32 %v732_v12, %v3305_v45 }
 0xaeb   :  { %v734_v15 = vadd.f32 1e-05, %v733_v13  ;;  %v858_v13 = vld [vmem:[%s4602_s1 + $0x2b8] sm:$0xff] }
 0xaed   :  { %3006 = vrsqrt.f32 %v734_v15  ;;  %vm741_vm14 = vweird.f32 %v734_v15 }
 0xaf3   :  { %v3007_v16 = vpop.eup %3006 }
 0xaf4   :  { %v736_v17 = vmul.f32 %v3007_v16, %v734_v15  ;;  %vm742_vm6 = vweird.f32 %v3007_v16 }
 0xaf5   :  { %vm743_vm15 = vmor %vm741_vm14, %vm742_vm6 }
 0xaf6   :  { %v737_v18 = vmul.f32 %v3007_v16, %v736_v17 }
 0xaf8   :  { %v738_v19 = vmul.f32 0.5, %v737_v18  ;;  %v856_v18 = vld [vmem:[%s4602_s1 + $0x2a8] sm:$0xff] }
 0xafa   :  { %v739_v21 = vsub.f32 1.5, %v738_v19 }
 0xafc   :  { %v740_v23 = vmul.f32 %v3007_v16, %v739_v21 }
 0xafe   :  { %v744_v25 = vsel %vm743_vm15, %v3007_v16, %v740_v23  ;;  %v859_v16 = vld [vmem:[%s4602_s1 + $0x2c0] sm:$0xff] }
 0xaff   :  { %v745_v27 = vmul.f32 %v744_v25, %v728_v7  ;;  %v857_v7 = vld [vmem:[%s4602_s1 + $0x2b0] sm:$0xff] }
 0xb01   :  { %v747_v29 = vmul.f32 %v2954_v24, %v745_v27 }
 0xb03   :  { %v749_v14 = vadd.f32 %v2955_v28, %v747_v29 }
 0xb05   :  { %2796 = vmatmul.msk.f32.vlgmr.msra.gmra.mxu0 %vm122_vm2, %v749_v14 }
 0xb82   :  { %v774_v30 = vpop.f32.mrf.mxu0 }
 0xb83   :  { %v777_v31 = vmul.f32 %v774_v30, %v774_v30 }
 0xb85   :  { %v778_v32 = vsel %vm126_vm3, %v777_v31, 0.0 }
 0xb86   :  { %779 = vadd.xlane.f32.xlu2 %v778_v32  ;;  %v860_v32 = vld [vmem:[%s4602_s1 + $0x2c8] sm:$0xff] }
 0xbf9   :  { %v780_v36 = vpop.xlane.xlu2 %779 }
 0xbfa   :  { %v781_v37 = vadd.f32 1e-12, %v780_v36 }
 0xbfc   :  { %3008 = vrsqrt.f32 %v781_v37  ;;  %vm788_vm4 = vweird.f32 %v781_v37 }
 0xc02   :  { %v3009_v38 = vpop.eup %3008 }
 0xc03   :  { %v783_v39 = vmul.f32 %v3009_v38, %v781_v37  ;;  %vm789_vm3 = vweird.f32 %v3009_v38 }
 0xc04   :  { %vm790_vm7 = vmor %vm788_vm4, %vm789_vm3 }
 0xc05   :  { %v784_v40 = vmul.f32 %v3009_v38, %v783_v39 }
 0xc07   :  { %v785_v41 = vmul.f32 0.5, %v784_v40 }
 0xc09   :  { %v786_v42 = vsub.f32 1.5, %v785_v41 }
 0xc0b   :  { %v787_v43 = vmul.f32 %v3009_v38, %v786_v42 }
 0xc0d   :  { %v791_v44 = vsel %vm790_vm7, %v3009_v38, %v787_v43 }
 0xc0e   :  { %v3560_v46 = vmul.f32 %v791_v44, %v774_v30 }
 0xc10   :  { %2797 = vmatmul.msk.f32.vlgmr.msra.gmra.mxu1 %vm122_vm2, %v3560_v46 }
 0xc8d   :  { %v819_v49 = vpop.f32.mrf.mxu1 }
 0xc8e   :  { %v820_v50 = vadd.f32 %v2956_v48, %v819_v49 }
 0xc90   :  { %v822_v51 = vmax.f32 %v820_v50, 0.0 }
 0xc92   :  { %2799 = vmatmul.msk.f32.vlgmr.msrb.gmra.mxu2 %vm826_vm9, %v822_v51 }
 0xd15   :  { %v850_v53 = vpop.f32.mrf.mxu2 }
 0xd16   :  { %v851_v54 = vadd.f32 %v2957_v52, %v850_v53 }
 0xd18   :  { %2800 = vmatpush.msk.msrb.mxu0 %vm347_vm8, %v851_v54  ;;  %2895 = vmatpush.msk.msra.mxu2 %vm347_vm8, %v851_v54 }
 0xd19   :  { %2801 = vmatmul.msk.f32.vlgmr.msrb.gmra.mxu0 %vm826_vm9, %v861_v55  ;;  %2805 = vmatmul.msk.f32.vlgmr.msra.gmra.mxu2 %vm826_vm9, %v865_v56 }
 0xd21   :  { %2802 = vmatmul.msk.f32.gmra.mxu0 %vm826_vm9, %v862_v57  ;;  %2806 = vmatmul.msk.f32.gmra.mxu2 %vm826_vm9, %v866_v58 }
 0xd29   :  { %2803 = vmatmul.msk.f32.gmra.mxu0 %vm826_vm9, %v863_v59  ;;  %2807 = vmatmul.msk.f32.gmra.mxu2 %vm826_vm9, %v867_v60 }
 0xd31   :  { %2804 = vmatmul.msk.f32.gmra.mxu0 %vm826_vm9, %v864_v61  ;;  %2808 = vmatmul.msk.f32.gmra.mxu2 %vm826_vm9, %v868_v62 }
 0xd96   :  { %v913_v0 = vpop.f32.mrf.mxu0 }
 0xd97   :  { %v3612_v1 = vadd.f32 %v913_v0, %v853_v63 }
 0xd99   :  { %v955_v2 = vsel %vm122_vm2, %v3612_v1, 0.0 }
 0xd9a   :  { %956 = vadd.xlane.f32.xlu0 %v955_v2 }
 0xd9c   :  { %v925_v4 = vpop.f32.mrf.mxu2 }
 0xd9d   :  { %v3626_v22 = vadd.f32 %v925_v4, %v857_v7  ;;  %v1151_v7 = vld [vmem:[%s4602_s1 + $0x330] sm:$0xff] }
 0xd9e   :  { %v916_v5 = vpop.f32.mrf.mxu0 }
 0xd9f   :  { %v3619_v6 = vadd.f32 %v916_v5, %v854_v3  ;;  %v967_v12 = vsel %vm122_vm2, %v3626_v22, 0.0  ;;  %v1152_v5 = vld [vmem:[%s4602_s1 + $0x338] sm:$0xff] }
 0xda0   :  { %1191 = vmatpush.msrb.mxu1 %v1152_v5 }
 0xda1   :  { %v958_v26 = vsel %vm122_vm2, %v3619_v6, 0.0 }
 0xda2   :  { %959 = vadd.xlane.f32.xlu1 %v958_v26  ;;  %1192 = vmatpush.msrb.mxu1 %v1151_v7  ;;  %v1150_v26 = vld [vmem:[%s4602_s1 + $0x328] sm:$0xff] }
 0xda4   :  { %v928_v9 = vpop.f32.mrf.mxu2  ;;  %1193 = vmatpush.msrb.mxu1 %v1150_v26 }
 0xda5   :  { %v3643_v17 = vadd.f32 %v928_v9, %v858_v13 }
 0xda6   :  { %v919_v10 = vpop.f32.mrf.mxu0 }
 0xda7   :  { %v3631_v11 = vadd.f32 %v919_v10, %v855_v8  ;;  %v970_v27 = vsel %vm122_vm2, %v3643_v17, 0.0  ;;  %v1149_v8 = vld [vmem:[%s4602_s1 + $0x320] sm:$0xff] }
 0xda8   :  { %1194 = vmatpush.msrb.mxu1 %v1149_v8 }
 0xda9   :  { %v961_v15 = vsel %vm122_vm2, %v3631_v11, 0.0 }
 0xdaa   :  { %968 = vadd.xlane.f32.xlu1 %v967_v12  ;;  %962 = vadd.xlane.f32.xlu2 %v961_v15 }
 0xdac   :  { %v931_v19 = vpop.f32.mrf.mxu2 }
 0xdad   :  { %v3648_v21 = vadd.f32 %v931_v19, %v859_v16 }
 0xdae   :  { %v922_v23 = vpop.f32.mrf.mxu0 }
 0xdaf   :  { %v3650_v24 = vadd.f32 %v922_v23, %v856_v18  ;;  %v973_v25 = vsel %vm122_vm2, %v3648_v21, 0.0 }
 0xdb1   :  { %v964_v28 = vsel %vm122_vm2, %v3650_v24, 0.0 }
 0xdb2   :  { %974 = vadd.xlane.f32.xlu1 %v973_v25  ;;  %971 = vadd.xlane.f32.xlu2 %v970_v27 }
 0xdb3   :  { %965 = vadd.xlane.f32.xlu0 %v964_v28 }
 0xdb4   :  { %v934_v33 = vpop.f32.mrf.mxu2 }
 0xdb5   :  { %v3669_v36 = vadd.f32 %v934_v33, %v860_v32 }
 0xdb7   :  { %v976_v39 = vsel %vm122_vm2, %v3669_v36, 0.0 }
 0xe0d   :  { %v957_v29 = vpop.xlane.xlu0 %956 }
 0xe0e   :  { %v979_v14 = vmul.f32 %v957_v29, %v3305_v45 }
 0xe10   :  { %v3660_v30 = vsub.f32 %v3612_v1, %v979_v14 }
 0xe12   :  { %v995_v31 = vmul.f32 %v3660_v30, %v3660_v30 }
 0xe14   :  { %v1003_v20 = vsel %vm122_vm2, %v995_v31, 0.0 }
 0xe15   :  { %v960_v34 = vpop.xlane.xlu1 %959  ;;  %1004 = vadd.xlane.f32.xlu0 %v1003_v20 }
 0xe16   :  { %v980_v35 = vmul.f32 %v960_v34, %v3305_v45 }
 0xe18   :  { %v3672_v37 = vsub.f32 %v3619_v6, %v980_v35 }
 0xe1a   :  { %v996_v38 = vmul.f32 %v3672_v37, %v3672_v37 }
 0xe1c   :  { %v1006_v40 = vsel %vm122_vm2, %v996_v38, 0.0 }
 0xe1d   :  { %v969_v41 = vpop.xlane.xlu1 %968  ;;  %1007 = vadd.xlane.f32.xlu2 %v1006_v40  ;;  %v963_v42 = vpop.xlane.xlu2 %962  ;;  %977 = vadd.xlane.f32.xlu0 %v976_v39 }
 0xe1e   :  { %v983_v43 = vmul.f32 %v969_v41, %v3305_v45  ;;  %v981_v44 = vmul.f32 %v963_v42, %v3305_v45 }
 0xe20   :  { %v3682_v47 = vsub.f32 %v3626_v22, %v983_v43  ;;  %v3685_v48 = vsub.f32 %v3631_v11, %v981_v44  ;;  %v3742_v43 = vld [vmem:[%s4602_s1 + $0x310] ss:$0 sm:$0xff] }
 0xe22   :  { %v997_v49 = vmul.f32 %v3685_v48, %v3685_v48  ;;  %v999_v50 = vmul.f32 %v3682_v47, %v3682_v47 }
 0xe24   :  { %v1009_v51 = vsel %vm122_vm2, %v997_v49, 0.0  ;;  %v1015_v52 = vsel %vm122_vm2, %v999_v50, 0.0 }
 0xe25   :  { %1010 = vadd.xlane.f32.xlu1 %v1009_v51  ;;  %v972_v53 = vpop.xlane.xlu2 %971  ;;  %1016 = vadd.xlane.f32.xlu0 %v1015_v52  ;;  %v975_v54 = vpop.xlane.xlu1 %974  ;;  %v3749_v51 = vld [vmem:[%s4602_s1 + $0x318] ss:$0 sm:$0xff] }
 0xe26   :  { %v984_v55 = vmul.f32 %v972_v53, %v3305_v45  ;;  %v966_v56 = vpop.xlane.xlu0 %965  ;;  %v985_v59 = vmul.f32 %v975_v54, %v3305_v45 }
 0xe27   :  { %v982_v57 = vmul.f32 %v966_v56, %v3305_v45 }
 0xe28   :  { %v3696_v58 = vsub.f32 %v3643_v17, %v984_v55  ;;  %v3708_v0 = vsub.f32 %v3648_v21, %v985_v59 }
 0xe29   :  { %v3700_v60 = vsub.f32 %v3650_v24, %v982_v57 }
 0xe2a   :  { %v1000_v61 = vmul.f32 %v3696_v58, %v3696_v58  ;;  %v1001_v3 = vmul.f32 %v3708_v0, %v3708_v0 }
 0xe2b   :  { %v998_v62 = vmul.f32 %v3700_v60, %v3700_v60 }
 0xe2c   :  { %v1018_v63 = vsel %vm122_vm2, %v1000_v61, 0.0  ;;  %v1021_v4 = vsel %vm122_vm2, %v1001_v3, 0.0 }
 0xe2d   :  { %1019 = vadd.xlane.f32.xlu1 %v1018_v63  ;;  %v1012_v2 = vsel %vm122_vm2, %v998_v62, 0.0 }
 0xe2e   :  { %1013 = vadd.xlane.f32.xlu2 %v1012_v2 }
 0xe36   :  { %1022 = vadd.xlane.f32.xlu2 %v1021_v4 }
 0xe88   :  { %v1005_v9 = vpop.xlane.xlu0 %1004 }
 0xe89   :  { %v1027_v10 = vmul.f32 %v1005_v9, %v3305_v45 }
 0xe8b   :  { %v1035_v12 = vadd.f32 1e-05, %v1027_v10 }
 0xe8d   :  { %3010 = vrsqrt.f32 %v1035_v12  ;;  %vm1049_vm10 = vweird.f32 %v1035_v12 }
 0xe90   :  { %v1008_v13 = vpop.xlane.xlu2 %1007  ;;  %v978_v15 = vpop.xlane.xlu0 %977 }
 0xe91   :  { %v1028_v16 = vmul.f32 %v1008_v13, %v3305_v45  ;;  %v986_v18 = vmul.f32 %v978_v15, %v3305_v45 }
 0xe93   :  { %v3011_v19 = vpop.eup %3010  ;;  %v1036_v23 = vadd.f32 1e-05, %v1028_v16  ;;  %v3730_v25 = vsub.f32 %v3669_v36, %v986_v18 }
 0xe94   :  { %v1044_v27 = vmul.f32 %v3011_v19, %v1035_v12  ;;  %vm1050_vm8 = vweird.f32 %v3011_v19 }
 0xe95   :  { %3012 = vrsqrt.f32 %v1036_v23  ;;  %v1002_v28 = vmul.f32 %v3730_v25, %v3730_v25  ;;  %vm1051_vm11 = vmor %vm1049_vm10, %vm1050_vm8  ;;  %vm1059_vm13 = vweird.f32 %v1036_v23 }
 0xe96   :  { %v1045_v29 = vmul.f32 %v3011_v19, %v1044_v27 }
 0xe97   :  { %v1024_v14 = vsel %vm122_vm2, %v1002_v28, 0.0 }
 0xe98   :  { %v1046_v31 = vmul.f32 0.5, %v1045_v29  ;;  %v1011_v32 = vpop.xlane.xlu1 %1010  ;;  %1025 = vadd.xlane.f32.xlu0 %v1024_v14  ;;  %v1017_v33 = vpop.xlane.xlu0 %1016 }
 0xe99   :  { %v1029_v20 = vmul.f32 %v1011_v32, %v3305_v45  ;;  %v1031_v34 = vmul.f32 %v1017_v33, %v3305_v45 }
 0xe9a   :  { %v1047_v35 = vsub.f32 1.5, %v1046_v31 }
 0xe9b   :  { %v3013_v38 = vpop.eup %3012  ;;  %v1037_v39 = vadd.f32 1e-05, %v1029_v20  ;;  %v3737_v40 = vadd.f32 1e-05, %v1031_v34 }
 0xe9c   :  { %v1048_v41 = vmul.f32 %v3011_v19, %v1047_v35  ;;  %v1054_v42 = vmul.f32 %v3013_v38, %v1036_v23  ;;  %vm1060_vm12 = vweird.f32 %v3013_v38 }
 0xe9d   :  { %3014 = vrsqrt.f32 %v1037_v39  ;;  %vm1061_vm6 = vmor %vm1059_vm13, %vm1060_vm12  ;;  %vm1069_vm15 = vweird.f32 %v1037_v39  ;;  %vm1089_vm10 = vweird.f32 %v3737_v40 }
 0xe9e   :  { %v1052_v44 = vsel %vm1051_vm11, %v3011_v19, %v1048_v41  ;;  %v1055_v49 = vmul.f32 %v3013_v38, %v1054_v42  ;;  %3016 = vrsqrt.f32 %v3737_v40 }
 0xe9f   :  { %v1123_v50 = vmul.f32 %v1052_v44, %v3660_v30 }
 0xea0   :  { %v1056_v52 = vmul.f32 0.5, %v1055_v49  ;;  %v1020_v53 = vpop.xlane.xlu1 %1019 }
 0xea1   :  { %v1132_v54 = vmul.f32 %v3742_v43, %v1123_v50  ;;  %v1032_v55 = vmul.f32 %v1020_v53, %v3305_v45  ;;  %v1014_v56 = vpop.xlane.xlu2 %1013 }
 0xea2   :  { %v1057_v57 = vsub.f32 1.5, %v1056_v52  ;;  %v1030_v59 = vmul.f32 %v1014_v56, %v3305_v45 }
 0xea3   :  { %v3015_v61 = vpop.eup %3014  ;;  %v3754_v62 = vadd.f32 1e-05, %v1032_v55  ;;  %v1141_v30 = vadd.f32 %v3749_v51, %v1132_v54 }
 0xea4   :  { %v3017_v63 = vpop.eup %3016  ;;  %v1058_v2 = vmul.f32 %v3013_v38, %v1057_v57  ;;  %v1064_v3 = vmul.f32 %v3015_v61, %v1037_v39  ;;  %v1038_v4 = vadd.f32 1e-05, %v1030_v59  ;;  %vm1070_vm14 = vweird.f32 %v3015_v61 }
 0xea5   :  { %v1084_v5 = vmul.f32 %v3017_v63, %v3737_v40  ;;  %3018 = vrsqrt.f32 %v3754_v62  ;;  %2809 = vmatmul.msk.f32.vlgmr.msrb.gmra.mxu1 %vm122_vm2, %v1141_v30  ;;  %vm1071_vm3 = vmor %vm1069_vm15, %vm1070_vm14  ;;  %vm1090_vm7 = vweird.f32 %v3017_v63  ;;  %vm1099_vm13 = vweird.f32 %v3754_v62 }
 0xea6   :  { %v1062_v7 = vsel %vm1061_vm6, %v3013_v38, %v1058_v2  ;;  %v1065_v26 = vmul.f32 %v3015_v61, %v1064_v3  ;;  %3020 = vrsqrt.f32 %v1038_v4  ;;  %vm1079_vm9 = vweird.f32 %v1038_v4  ;;  %vm1091_vm11 = vmor %vm1089_vm10, %vm1090_vm7 }
 0xea7   :  { %v1124_v8 = vmul.f32 %v1062_v7, %v3672_v37  ;;  %v1085_v10 = vmul.f32 %v3017_v63, %v1084_v5 }
 0xea8   :  { %v1066_v9 = vmul.f32 0.5, %v1065_v26 }
 0xea9   :  { %v1023_v12 = vpop.xlane.xlu2 %1022  ;;  %v1133_v13 = vmul.f32 %v3742_v43, %v1124_v8  ;;  %v1086_v29 = vmul.f32 0.5, %v1085_v10 }
 0xeaa   :  { %v1067_v15 = vsub.f32 1.5, %v1066_v9  ;;  %v1033_v16 = vmul.f32 %v1023_v12, %v3305_v45 }
 0xeab   :  { %v3019_v18 = vpop.eup %3018  ;;  %v1142_v19 = vadd.f32 %v3749_v51, %v1133_v13  ;;  %v1087_v20 = vsub.f32 1.5, %v1086_v29 }
 0xeac   :  { %v3021_v23 = vpop.eup %3020  ;;  %v1068_v27 = vmul.f32 %v3015_v61, %v1067_v15  ;;  %v1041_v28 = vadd.f32 1e-05, %v1033_v16  ;;  %v1094_v37 = vmul.f32 %v3019_v18, %v3754_v62  ;;  %vm1100_vm12 = vweird.f32 %v3019_v18 }
 0xead   :  { %v1074_v14 = vmul.f32 %v3021_v23, %v1038_v4  ;;  %2810 = vmatmul.msk.f32.gmra.mxu1 %vm122_vm2, %v1142_v19  ;;  %vm1080_vm4 = vweird.f32 %v3021_v23  ;;  %v1088_v44 = vmul.f32 %v3017_v63, %v1087_v20  ;;  %vm1101_vm6 = vmor %vm1099_vm13, %vm1100_vm12  ;;  %v2960_v20 = vld [vmem:[%s4602_s1 + $0x340] ss:$0 sm:$0xff] }
 0xeae   :  { %v1072_v31 = vsel %vm1071_vm3, %v3015_v61, %v1068_v27  ;;  %3022 = vrsqrt.f32 %v1041_v28  ;;  %v1095_v34 = vmul.f32 %v3019_v18, %v1094_v37  ;;  %vm1081_vm8 = vmor %vm1079_vm9, %vm1080_vm4  ;;  %vm1109_vm15 = vweird.f32 %v1041_v28 }
 0xeaf   :  { %v1075_v32 = vmul.f32 %v3021_v23, %v1074_v14  ;;  %v1125_v33 = vmul.f32 %v1072_v31, %v3685_v48  ;;  %v1092_v54 = vsel %vm1091_vm11, %v3017_v63, %v1088_v44 }
 0xeb0   :  { %v1096_v49 = vmul.f32 0.5, %v1095_v34  ;;  %v1127_v61 = vmul.f32 %v1092_v54, %v3682_v47 }
 0xeb1   :  { %v1076_v35 = vmul.f32 0.5, %v1075_v32  ;;  %v1134_v38 = vmul.f32 %v3742_v43, %v1125_v33 }
 0xeb2   :  { %v1097_v55 = vsub.f32 1.5, %v1096_v49  ;;  %v1136_v40 = vmul.f32 %v3742_v43, %v1127_v61 }
 0xeb3   :  { %v1077_v41 = vsub.f32 1.5, %v1076_v35  ;;  %v1143_v39 = vadd.f32 %v3749_v51, %v1134_v38 }
 0xeb4   :  { %v3023_v42 = vpop.eup %3022  ;;  %v1098_v30 = vmul.f32 %v3019_v18, %v1097_v55  ;;  %v1145_v3 = vadd.f32 %v3749_v51, %v1136_v40 }
 0xeb5   :  { %v1078_v50 = vmul.f32 %v3021_v23, %v1077_v41  ;;  %v1104_v52 = vmul.f32 %v3023_v42, %v1041_v28  ;;  %2811 = vmatmul.msk.f32.gmra.mxu1 %vm122_vm2, %v1143_v39  ;;  %vm1110_vm14 = vweird.f32 %v3023_v42 }
 0xeb6   :  { %vm1111_vm3 = vmor %vm1109_vm15, %vm1110_vm14 }
 0xeb7   :  { %v1082_v48 = vsel %vm1081_vm8, %v3021_v23, %v1078_v50  ;;  %v1105_v56 = vmul.f32 %v3023_v42, %v1104_v52 }
 0xeb8   :  { %v1126_v53 = vmul.f32 %v1082_v48, %v3700_v60  ;;  %v1102_v60 = vsel %vm1101_vm6, %v3019_v18, %v1098_v30 }
 0xeb9   :  { %v1106_v2 = vmul.f32 0.5, %v1105_v56  ;;  %v1128_v4 = vmul.f32 %v1102_v60, %v3696_v58 }
 0xeba   :  { %v1135_v57 = vmul.f32 %v3742_v43, %v1126_v53 }
 0xebb   :  { %v1107_v63 = vsub.f32 1.5, %v1106_v2  ;;  %v1137_v47 = vmul.f32 %v3742_v43, %v1128_v4 }
 0xebc   :  { %v1144_v59 = vadd.f32 %v3749_v51, %v1135_v57 }
 0xebd   :  { %v1108_v5 = vmul.f32 %v3023_v42, %v1107_v63  ;;  %v1146_v62 = vadd.f32 %v3749_v51, %v1137_v47 }
 0xebe   :  { %2812 = vmatmul.msk.f32.gmra.mxu1 %vm122_vm2, %v1144_v59 }
 0xebf   :  { %v1112_v7 = vsel %vm1111_vm3, %v3023_v42, %v1108_v5 }
 0xec0   :  { %v1129_v26 = vmul.f32 %v1112_v7, %v3708_v0 }
 0xec2   :  { %v1138_v8 = vmul.f32 %v3742_v43, %v1129_v26 }
 0xec4   :  { %v1147_v9 = vadd.f32 %v3749_v51, %v1138_v8 }
 0xec6   :  { %2813 = vmatmul.msk.f32.gmra.mxu1 %vm122_vm2, %v1145_v3 }
 0xece   :  { %2814 = vmatmul.msk.f32.gmra.mxu1 %vm122_vm2, %v1146_v62 }
 0xed6   :  { %2815 = vmatmul.msk.f32.gmra.mxu1 %vm122_vm2, %v1147_v9 }
 0xf0b   :  { %v1026_v58 = vpop.xlane.xlu0 %1025 }
 0xf0c   :  { %v1034_v10 = vmul.f32 %v1026_v58, %v3305_v45 }
 0xf0e   :  { %v1042_v12 = vadd.f32 1e-05, %v1034_v10 }
 0xf10   :  { %3024 = vrsqrt.f32 %v1042_v12  ;;  %vm1119_vm7 = vweird.f32 %v1042_v12 }
 0xf16   :  { %v3025_v13 = vpop.eup %3024 }
 0xf17   :  { %v1114_v15 = vmul.f32 %v3025_v13, %v1042_v12  ;;  %vm1120_vm4 = vweird.f32 %v3025_v13 }
 0xf18   :  { %vm1121_vm9 = vmor %vm1119_vm7, %vm1120_vm4 }
 0xf19   :  { %v1115_v16 = vmul.f32 %v3025_v13, %v1114_v15 }
 0xf1b   :  { %v1116_v18 = vmul.f32 0.5, %v1115_v16 }
 0xf1d   :  { %v1117_v19 = vsub.f32 1.5, %v1116_v18 }
 0xf1f   :  { %v1118_v0 = vmul.f32 %v3025_v13, %v1117_v19 }
 0xf21   :  { %v1122_v23 = vsel %vm1121_vm9, %v3025_v13, %v1118_v0 }
 0xf22   :  { %v1196_v27 = vpop.f32.mrf.mxu1  ;;  %v1130_v28 = vmul.f32 %v1122_v23, %v3730_v25 }
 0xf23   :  { %v3812_v41 = vadd.f32 %v2960_v20, %v1196_v27 }
 0xf24   :  { %v1139_v29 = vmul.f32 %v3742_v43, %v1130_v28 }
 0xf26   :  { %v1148_v37 = vadd.f32 %v3749_v51, %v1139_v29 }
 0xf28   :  { %2816 = vmatmul.msk.f32.gmra.mxu1 %vm122_vm2, %v1148_v37 }
 0xf2a   :  { %v1199_v14 = vpop.f32.mrf.mxu1 }
 0xf2b   :  { %v3820_v39 = vadd.f32 %v2960_v20, %v1199_v14 }
 0xf2d   :  { %v3869_v56 = vpack.i.bf16 %v3812_v41, %v3820_v39 }
 0xf32   :  { %v1202_v31 = vpop.f32.mrf.mxu1 }
 0xf33   :  { %v3808_v38 = vadd.f32 %v2960_v20, %v1202_v31 }
 0xf3b   :  { %v1205_v32 = vpop.f32.mrf.mxu1 }
 0xf3c   :  { %v3800_v43 = vadd.f32 %v2960_v20, %v1205_v32 }
 0xf3e   :  { %v3861_v54 = vpack.i.bf16 %v3808_v38, %v3800_v43 }
 0xf43   :  { %v1208_v33 = vpop.f32.mrf.mxu1 }
 0xf44   :  { %v3824_v42 = vadd.f32 %v2960_v20, %v1208_v33 }
 0xf4b   :  { %v1211_v34 = vpop.f32.mrf.mxu1 }
 0xf4c   :  { %v3796_v35 = vadd.f32 %v2960_v20, %v1211_v34 }
 0xf4e   :  { %1536 = vrot.lane.b32.xlu0 %v3796_v35, %s3184_s9  ;;  %v2919_v59 = vpack.i.bf16 %v3824_v42, %v3796_v35 }
 0xf53   :  { %v1214_v25 = vpop.f32.mrf.mxu1 }
 0xf54   :  { %v3802_v51 = vadd.f32 %v2960_v20, %v1214_v25 }
 0xf56   :  { %1538 = vrot.lane.b32.xlu2 %v3802_v51, %s3184_s9  ;;  %1532 = vrot.lane.b32.xlu0 %v3800_v43, %s3184_s9 }
 0xf5e   :  { %1530 = vrot.lane.b32.xlu2 %v3808_v38, %s3184_s9 }
 0xf66   :  { %1526 = vrot.lane.b32.xlu2 %v3812_v41, %s3184_s9 }
 0xf6e   :  { %1238 = vrot.lane.b32.xlu2 %v3796_v35, %s3185_s10 }
 0xf76   :  { %1234 = vrot.lane.b32.xlu2 %v3800_v43, %s3185_s10 }
 0xf7e   :  { %1230 = vrot.lane.b32.xlu2 %v3820_v39, %s3185_s10 }
 0xf86   :  { %1518 = vrot.lane.b32.xlu2 %v3824_v42, %s3183_s8 }
 0xfa5   :  { %v1217_v44 = vpop.f32.mrf.mxu1 }
 0xfa6   :  { %v3828_v49 = vadd.f32 %v2960_v20, %v1217_v44 }
 0xfa8   :  { %1524 = vrot.lane.b32.xlu2 %v3828_v49, %s3183_s8  ;;  %1242 = vrot.lane.b32.xlu0 %v3828_v49, %s3185_s10  ;;  %v2924_v50 = vpack.i.bf16 %v3802_v51, %v3828_v49 }
 0xfa9   :  { %1540 = vrot.lane.b32.xlu1 %v3828_v49, %s3184_s9 }
 0xfb0   :  { %2925 = vrot.lane.b32.xlu2 %v2924_v50, %s3186_s14  ;;  %1510 = vrot.lane.b32.xlu0 %v3812_v41, %s3183_s8  ;;  %v1539_v52 = vpop.permute.xlu2 %1538 }
 0xfb1   :  { %1534 = vrot.lane.b32.xlu1 %v3824_v42, %s3184_s9 }
 0xfb8   :  { %1512 = vrot.lane.b32.xlu0 %v3820_v39, %s3183_s8  ;;  %v1531_v48 = vpop.permute.xlu2 %1530 }
 0xfb9   :  { %1528 = vrot.lane.b32.xlu1 %v3820_v39, %s3184_s9 }
 0xfc0   :  { %1514 = vrot.lane.b32.xlu0 %v3808_v38, %s3183_s8  ;;  %v1527_v53 = vpop.permute.xlu2 %1526  ;;  %v1537_v40 = vpop.permute.xlu0 %1536 }
 0xfc1   :  { %1240 = vrot.lane.b32.xlu1 %v3802_v51, %s3185_s10 }
 0xfc8   :  { %1516 = vrot.lane.b32.xlu0 %v3800_v43, %s3183_s8  ;;  %v1239_v55 = vpop.permute.xlu2 %1238  ;;  %v1533_v4 = vpop.permute.xlu0 %1532 }
 0xfc9   :  { %1236 = vrot.lane.b32.xlu1 %v3824_v42, %s3185_s10 }
 0xfd0   :  { %1522 = vrot.lane.b32.xlu0 %v3802_v51, %s3183_s8  ;;  %v1235_v57 = vpop.permute.xlu2 %1234 }
 0xfd1   :  { %1232 = vrot.lane.b32.xlu1 %v3808_v38, %s3185_s10 }
 0xfd8   :  { %2910 = vrot.lane.b32.xlu0 %v3861_v54, %s3186_s14  ;;  %v1231_v61 = vpop.permute.xlu2 %1230 }
 0xfd9   :  { %1228 = vrot.lane.b32.xlu1 %v3812_v41, %s3185_s10 }
 0xfe0   :  { %2915 = vrot.lane.b32.xlu0 %v3869_v56, %s3186_s14  ;;  %v1519_v30 = vpop.permute.xlu2 %1518 }
 0xfe1   :  { %1520 = vrot.lane.b32.xlu1 %v3796_v35, %s3183_s8 }
 0xfe8   :  { %2920 = vrot.lane.b32.xlu0 %v2919_v59, %s3187_s15 }
 0xfe9   :  { %2905 = vrot.lane.b32.xlu1 %v2919_v59, %s3186_s14 }
 0xff1   :  { %2930 = vrot.lane.b32.xlu1 %v2924_v50, %s3187_s15 }
0x1002   :  { %v3880_v2 = vpop.permute.xlu2 %1524 }
0x100a   :  { %v2926_v60 = vpop.permute.xlu2 %2925 }
0x100b   :  { %v2927_v63 = vunpack.i.l.bf16 %v2926_v60  ;;  %v2928_v3 = vunpack.i.h.bf16 %v2926_v60 }
0x100d   :  { %1775 = vmatpush.msra.mxu1 %v2927_v63 }
0x100f   :  { %1776 = vmatpush.msra.mxu1 %v2928_v3  ;;  %v947_v3 = vld [vmem:[%s4602_s1 + $0x440] sm:$0xff] }
0x101a   :  { %v1243_v5 = vpop.permute.xlu0 %1242 }
0x101b   :  { %v1541_v47 = vpop.permute.xlu1 %1540  ;;  %2817 = vmatpush.xpose.msk.msra.mxu3 %vm276_vm5, %v1243_v5 }
0x101c   :  { %2841 = vmatpush.xpose.msk.msra.mxu0 %vm276_vm5, %v1541_v47 }
0x1020   :  { %2842 = vmatpush.xpose.msk.msra.mxu0 %vm276_vm5, %v1539_v52 }
0x1022   :  { %v1511_v7 = vpop.permute.xlu0 %1510 }
0x1023   :  { %v1535_v62 = vpop.permute.xlu1 %1534 }
0x1024   :  { %2843 = vmatpush.xpose.msk.msra.mxu0 %vm276_vm5, %v1537_v40 }
0x1028   :  { %2844 = vmatpush.xpose.msk.msra.mxu0 %vm276_vm5, %v1535_v62 }
0x102a   :  { %v1513_v26 = vpop.permute.xlu0 %1512 }
0x102b   :  { %v1529_v8 = vpop.permute.xlu1 %1528 }
0x102c   :  { %2845 = vmatpush.xpose.msk.msra.mxu0 %vm276_vm5, %v1533_v4 }
0x1030   :  { %2846 = vmatpush.xpose.msk.msra.mxu0 %vm276_vm5, %v1531_v48 }
0x1032   :  { %v1515_v58 = vpop.permute.xlu0 %1514 }
0x1033   :  { %v1241_v9 = vpop.permute.xlu1 %1240 }
0x1034   :  { %2818 = vmatpush.xpose.msk.msra.mxu3 %vm276_vm5, %v1241_v9  ;;  %2847 = vmatpush.xpose.msk.msra.mxu0 %vm276_vm5, %v1529_v8 }
0x1038   :  { %2819 = vmatpush.xpose.msk.msra.mxu3 %vm276_vm5, %v1239_v55  ;;  %2848 = vmatpush.xpose.msk.msra.mxu0 %vm276_vm5, %v1527_v53  ;;  %v948_v55 = vld [vmem:[%s4602_s1 + $0x448] sm:$0xff] }
0x103a   :  { %v1517_v12 = vpop.permute.xlu0 %1516 }
0x103b   :  { %v1237_v10 = vpop.permute.xlu1 %1236  ;;  %2849 = vmatmul.msk.f32.vlgmr.msra.gmra.mxu0 %vm276_vm5, %v1511_v7 }
0x103c   :  { %2820 = vmatpush.xpose.msk.msra.mxu3 %vm276_vm5, %v1237_v10 }
0x1040   :  { %2821 = vmatpush.xpose.msk.msra.mxu3 %vm276_vm5, %v1235_v57 }
0x1042   :  { %v1523_v15 = vpop.permute.xlu0 %1522 }
0x1043   :  { %v1233_v13 = vpop.permute.xlu1 %1232  ;;  %2850 = vmatmul.msk.f32.gmra.mxu0 %vm276_vm5, %v1513_v26 }
0x1044   :  { %2822 = vmatpush.xpose.msk.msra.mxu3 %vm276_vm5, %v1233_v13 }
0x1048   :  { %2823 = vmatpush.xpose.msk.msra.mxu3 %vm276_vm5, %v1231_v61 }
0x104a   :  { %v2911_v18 = vpop.permute.xlu0 %2910 }
0x104b   :  { %v1229_v16 = vpop.permute.xlu1 %1228  ;;  %2851 = vmatmul.msk.f32.gmra.mxu0 %vm276_vm5, %v1515_v58  ;;  %v2912_v29 = vunpack.i.l.bf16 %v2911_v18  ;;  %v2913_v37 = vunpack.i.h.bf16 %v2911_v18 }
0x104c   :  { %2824 = vmatpush.xpose.msk.msra.mxu3 %vm276_vm5, %v1229_v16 }
0x104f   :  { %2825 = vmatmul.msk.f32.vlgmr.msra.gmra.mxu3 %vm276_vm5, %v3812_v41  ;;  %v945_v41 = vld [vmem:[%s4602_s1 + $0x430] sm:$0xff] }
0x1052   :  { %v2916_v0 = vpop.permute.xlu0 %2915 }
0x1053   :  { %v1521_v19 = vpop.permute.xlu1 %1520  ;;  %2852 = vmatmul.msk.f32.gmra.mxu0 %vm276_vm5, %v1517_v12  ;;  %v2917_v31 = vunpack.i.l.bf16 %v2916_v0  ;;  %v2918_v20 = vunpack.i.h.bf16 %v2916_v0 }
0x1057   :  { %2826 = vmatmul.msk.f32.gmra.mxu3 %vm276_vm5, %v3820_v39 }
0x105a   :  { %v2921_v33 = vpop.permute.xlu0 %2920 }
0x105b   :  { %v2906_v23 = vpop.permute.xlu1 %2905  ;;  %2853 = vmatmul.msk.f32.gmra.mxu0 %vm276_vm5, %v1519_v30  ;;  %v2922_v25 = vunpack.i.l.bf16 %v2921_v33 }
0x105c   :  { %v2907_v27 = vunpack.i.l.bf16 %v2906_v23  ;;  %v2908_v28 = vunpack.i.h.bf16 %v2906_v23 }
0x105e   :  { %1777 = vmatpush.msra.mxu1 %v2907_v27 }
0x105f   :  { %2827 = vmatmul.msk.f32.gmra.mxu3 %vm276_vm5, %v3808_v38  ;;  %v2923_v38 = vunpack.i.h.bf16 %v2921_v33 }
0x1060   :  { %1778 = vmatpush.msra.mxu1 %v2908_v28 }
0x1062   :  { %1779 = vmatpush.msra.mxu1 %v2912_v29 }
0x1063   :  { %v2931_v14 = vpop.permute.xlu1 %2930  ;;  %2854 = vmatmul.msk.f32.gmra.mxu0 %vm276_vm5, %v1521_v19 }
0x1064   :  { %v2932_v32 = vunpack.i.l.bf16 %v2931_v14  ;;  %1780 = vmatpush.msra.mxu1 %v2913_v37  ;;  %v2933_v34 = vunpack.i.h.bf16 %v2931_v14  ;;  %v950_v37 = vld [vmem:[%s4602_s1 + $0x458] sm:$0xff] }
0x1066   :  { %1477 = vmatpush.msrb.mxu2 %v2932_v32  ;;  %1781 = vmatpush.msra.mxu1 %v2917_v31 }
0x1067   :  { %2828 = vmatmul.msk.f32.gmra.mxu3 %vm276_vm5, %v3800_v43 }
0x1068   :  { %1478 = vmatpush.msrb.mxu2 %v2933_v34  ;;  %1782 = vmatpush.msra.mxu1 %v2918_v20 }
0x106a   :  { %1479 = vmatpush.msrb.mxu2 %v2922_v25 }
0x106b   :  { %2855 = vmatmul.msk.f32.gmra.mxu0 %vm276_vm5, %v1523_v15  ;;  %v949_v15 = vld [vmem:[%s4602_s1 + $0x450] sm:$0xff] }
0x106c   :  { %1480 = vmatpush.msrb.mxu2 %v2923_v38 }
0x106f   :  { %2829 = vmatmul.msk.f32.gmra.mxu3 %vm276_vm5, %v3824_v42 }
0x1073   :  { %2856 = vmatmul.msk.f32.gmra.mxu0 %vm276_vm5, %v3880_v2 }
0x1077   :  { %2830 = vmatmul.msk.f32.gmra.mxu3 %vm276_vm5, %v3796_v35  ;;  %v946_v35 = vld [vmem:[%s4602_s1 + $0x438] sm:$0xff] }
0x107f   :  { %2831 = vmatmul.msk.f32.gmra.mxu3 %vm276_vm5, %v3802_v51 }
0x1087   :  { %2832 = vmatmul.msk.f32.gmra.mxu3 %vm276_vm5, %v3828_v49 }
0x10b8   :  { %v1591_v43 = vpop.f32.mrf.mxu0 }
0x10b9   :  { %v1615_v39 = vmul.f32 0.25, %v1591_v43 }
0x10bb   :  { %v3926_v44 = vadd.f32 %v1615_v39, %v945_v41 }
0x10bd   :  { %v1631_v42 = vsel %vm42_vm0, %v3926_v44, -inf }
0x10be   :  { %1632 = vmax.xlane.f32.xlu1 %v1631_v42 }
0x10c0   :  { %v1594_v50 = vpop.f32.mrf.mxu0 }
0x10c1   :  { %v1616_v51 = vmul.f32 0.25, %v1594_v50  ;;  %v951_v50 = vld [vmem:[%s4602_s1 + $0x460] sm:$0xff] }
0x10c3   :  { %v3933_v52 = vadd.f32 %v1616_v51, %v946_v35 }
0x10c5   :  { %v1634_v49 = vsel %vm42_vm0, %v3933_v52, -inf }
0x10c6   :  { %1635 = vmax.xlane.f32.xlu0 %v1634_v49 }
0x10c8   :  { %v1597_v48 = vpop.f32.mrf.mxu0 }
0x10c9   :  { %v1617_v60 = vmul.f32 0.25, %v1597_v48 }
0x10cb   :  { %v3951_v47 = vadd.f32 %v1617_v60, %v947_v3 }
0x10cd   :  { %v1637_v26 = vsel %vm42_vm0, %v3951_v47, -inf }
0x10d0   :  { %v1600_v53 = vpop.f32.mrf.mxu0 }
0x10d1   :  { %v1618_v57 = vmul.f32 0.25, %v1600_v53 }
0x10d2   :  { %v1293_v59 = vpop.f32.mrf.mxu3 }
0x10d3   :  { %v1317_v61 = vmul.f32 0.25, %v1293_v59  ;;  %v3940_v30 = vadd.f32 %v1618_v57, %v948_v55 }
0x10d5   :  { %v1640_v2 = vsel %vm42_vm0, %v3940_v30, -inf  ;;  %v3944_v40 = vadd.f32 %v1317_v61, %v945_v41  ;;  %v952_v61 = vld [vmem:[%s4602_s1 + $0x468] sm:$0xff] }
0x10d6   :  { %1641 = vmax.xlane.f32.xlu1 %v1640_v2 }
0x10d7   :  { %v1333_v63 = vsel %vm42_vm0, %v3944_v40, -inf }
0x10d8   :  { %1334 = vmax.xlane.f32.xlu2 %v1333_v63  ;;  %v1603_v8 = vpop.f32.mrf.mxu0 }
0x10d9   :  { %v1619_v12 = vmul.f32 0.25, %v1603_v8 }
0x10da   :  { %v1296_v4 = vpop.f32.mrf.mxu3 }
0x10db   :  { %v1318_v5 = vmul.f32 0.25, %v1296_v4  ;;  %v3966_v19 = vadd.f32 %v1619_v12, %v949_v15 }
0x10dd   :  { %v3953_v7 = vadd.f32 %v1318_v5, %v946_v35  ;;  %v1643_v29 = vsel %vm42_vm0, %v3966_v19, -inf }
0x10df   :  { %v1336_v62 = vsel %vm42_vm0, %v3953_v7, -inf }
0x10e0   :  { %1337 = vmax.xlane.f32.xlu0 %v1336_v62  ;;  %1638 = vmax.xlane.f32.xlu2 %v1637_v26  ;;  %v1606_v0 = vpop.f32.mrf.mxu0 }
0x10e1   :  { %v1620_v27 = vmul.f32 0.25, %v1606_v0 }
0x10e2   :  { %v1299_v9 = vpop.f32.mrf.mxu3 }
0x10e3   :  { %v1319_v58 = vmul.f32 0.25, %v1299_v9  ;;  %v3977_v32 = vadd.f32 %v1620_v27, %v950_v37 }
0x10e5   :  { %v3959_v10 = vadd.f32 %v1319_v58, %v947_v3  ;;  %v1646_v34 = vsel %vm42_vm0, %v3977_v32, -inf }
0x10e7   :  { %v1339_v13 = vsel %vm42_vm0, %v3959_v10, -inf }
0x10e8   :  { %1340 = vmax.xlane.f32.xlu0 %v1339_v13  ;;  %v1609_v25 = vpop.f32.mrf.mxu0 }
0x10e9   :  { %v1621_v39 = vmul.f32 0.25, %v1609_v25 }
0x10ea   :  { %v1302_v16 = vpop.f32.mrf.mxu3 }
0x10eb   :  { %v1320_v18 = vmul.f32 0.25, %v1302_v16  ;;  %v3992_v49 = vadd.f32 %v1621_v39, %v951_v50 }
0x10ed   :  { %v3968_v23 = vadd.f32 %v1320_v18, %v948_v55  ;;  %v1649_v59 = vsel %vm42_vm0, %v3992_v49, -inf }
0x10ef   :  { %v1342_v28 = vsel %vm42_vm0, %v3968_v23, -inf }
0x10f0   :  { %1343 = vmax.xlane.f32.xlu1 %v1342_v28  ;;  %1644 = vmax.xlane.f32.xlu0 %v1643_v29  ;;  %v1612_v48 = vpop.f32.mrf.mxu0 }
0x10f1   :  { %v1622_v55 = vmul.f32 0.25, %v1612_v48 }
0x10f2   :  { %v1305_v14 = vpop.f32.mrf.mxu3 }
0x10f3   :  { %v1321_v31 = vmul.f32 0.25, %v1305_v14  ;;  %v4003_v2 = vadd.f32 %v1622_v55, %v952_v61 }
0x10f5   :  { %v3979_v33 = vadd.f32 %v1321_v31, %v949_v15  ;;  %v1652_v60 = vsel %vm42_vm0, %v4003_v2, -inf }
0x10f7   :  { %v1345_v20 = vsel %vm42_vm0, %v3979_v33, -inf }
0x10f8   :  { %1346 = vmax.xlane.f32.xlu2 %v1345_v20  ;;  %1647 = vmax.xlane.f32.xlu1 %v1646_v34 }
0x10fa   :  { %v1308_v38 = vpop.f32.mrf.mxu3 }
0x10fb   :  { %v1322_v43 = vmul.f32 0.25, %v1308_v38 }
0x10fd   :  { %v3985_v41 = vadd.f32 %v1322_v43, %v950_v37 }
0x10ff   :  { %v1348_v42 = vsel %vm42_vm0, %v3985_v41, -inf }
0x1100   :  { %1349 = vmax.xlane.f32.xlu1 %v1348_v42 }
0x1102   :  { %v1311_v35 = vpop.f32.mrf.mxu3 }
0x1103   :  { %v1323_v51 = vmul.f32 0.25, %v1311_v35 }
0x1105   :  { %v3994_v53 = vadd.f32 %v1323_v51, %v951_v50 }
0x1107   :  { %v1351_v57 = vsel %vm42_vm0, %v3994_v53, -inf }
0x1108   :  { %1352 = vmax.xlane.f32.xlu2 %v1351_v57  ;;  %1650 = vmax.xlane.f32.xlu1 %v1649_v59 }
0x110a   :  { %v1314_v16 = vpop.f32.mrf.mxu3 }
0x110b   :  { %v1324_v27 = vmul.f32 0.25, %v1314_v16 }
0x110d   :  { %v4027_v14 = vadd.f32 %v1324_v27, %v952_v61 }
0x110f   :  { %v1354_v20 = vsel %vm42_vm0, %v4027_v14, -inf }
0x1110   :  { %1653 = vmax.xlane.f32.xlu2 %v1652_v60 }
0x1121   :  { %2940 = vrot.lane.b32.xlu1 %v3869_v56, %s3187_s15 }
0x1131   :  { %v1633_v63 = vpop.xlane.xlu1 %1632 }
0x1132   :  { %v1655_v3 = vsub.f32 %v3926_v44, %v1633_v63 }
0x1134   :  { %v1663_v4 = vmul.f32 1.442695, %v1655_v3 }
0x1136   :  { %3026 = vpow2.f32 %v1663_v4 }
0x1139   :  { %v1636_v5 = vpop.xlane.xlu0 %1635 }
0x113a   :  { %v1656_v62 = vsub.f32 %v3933_v52, %v1636_v5 }
0x113c   :  { %v4011_v26 = vpop.eup %3026  ;;  %v1665_v8 = vmul.f32 1.442695, %v1656_v62 }
0x113d   :  { %v1679_v9 = vsel %vm42_vm0, %v4011_v26, 0.0 }
0x113e   :  { %3028 = vpow2.f32 %v1665_v8  ;;  %1680 = vadd.xlane.f32.xlu0 %v1679_v9 }
0x1144   :  { %v4015_v58 = vpop.eup %3028 }
0x1145   :  { %v1682_v56 = vsel %vm42_vm0, %v4015_v58, 0.0 }
0x1146   :  { %1683 = vadd.xlane.f32.xlu0 %v1682_v56 }
0x1149   :  { %v1642_v37 = vpop.xlane.xlu1 %1641 }
0x114a   :  { %v1658_v31 = vsub.f32 %v3940_v30, %v1642_v37 }
0x114b   :  { %v1335_v44 = vpop.xlane.xlu2 %1334 }
0x114c   :  { %v1357_v12 = vsub.f32 %v3944_v40, %v1335_v44 }
0x114e   :  { %v1365_v13 = vmul.f32 1.442695, %v1357_v12 }
0x1150   :  { %3030 = vpow2.f32 %v1365_v13 }
0x1153   :  { %v1639_v52 = vpop.xlane.xlu2 %1638  ;;  %v1338_v15 = vpop.xlane.xlu0 %1337 }
0x1154   :  { %v1657_v0 = vsub.f32 %v3951_v47, %v1639_v52  ;;  %v1669_v47 = vmul.f32 1.442695, %v1658_v31  ;;  %v1358_v50 = vsub.f32 %v3953_v7, %v1338_v15 }
0x1156   :  { %v4020_v18 = vpop.eup %3030  ;;  %v1667_v29 = vmul.f32 1.442695, %v1657_v0  ;;  %v1367_v51 = vmul.f32 1.442695, %v1358_v50 }
0x1157   :  { %v1381_v28 = vsel %vm42_vm0, %v4020_v18, 0.0 }
0x1158   :  { %1382 = vadd.xlane.f32.xlu2 %v1381_v28  ;;  %3032 = vpow2.f32 %v1667_v29 }
0x1159   :  { %3034 = vpow2.f32 %v1669_v47 }
0x115a   :  { %2935 = vrot.lane.b32.xlu0 %v3861_v54, %s3187_s15 }
0x115b   :  { %v1341_v40 = vpop.xlane.xlu0 %1340 }
0x115c   :  { %v1359_v59 = vsub.f32 %v3959_v10, %v1341_v40 }
0x115e   :  { %v4032_v38 = vpop.eup %3032  ;;  %v1369_v7 = vmul.f32 1.442695, %v1359_v59 }
0x115f   :  { %v1685_v54 = vsel %vm42_vm0, %v4032_v38, 0.0  ;;  %v4037_v30 = vpop.eup %3034 }
0x1160   :  { %1355 = vmax.xlane.f32.xlu2 %v1354_v20  ;;  %v1688_v35 = vsel %vm42_vm0, %v4037_v30, 0.0 }
0x1163   :  { %v1344_v34 = vpop.xlane.xlu1 %1343  ;;  %v1645_v25 = vpop.xlane.xlu0 %1644 }
0x1164   :  { %v1659_v43 = vsub.f32 %v3966_v19, %v1645_v25 }
0x1166   :  { %v1671_v39 = vmul.f32 1.442695, %v1659_v43 }
0x1168   :  { %1686 = vadd.xlane.f32.xlu2 %v1685_v54  ;;  %3036 = vpow2.f32 %v1671_v39 }
0x1169   :  { %3038 = vpow2.f32 %v1367_v51 }
0x116b   :  { %v1648_v42 = vpop.xlane.xlu1 %1647  ;;  %v1347_v55 = vpop.xlane.xlu2 %1346 }
0x116c   :  { %v1660_v48 = vsub.f32 %v3977_v32, %v1648_v42  ;;  %v1361_v28 = vsub.f32 %v3979_v33, %v1347_v55 }
0x116e   :  { %v4043_v57 = vpop.eup %3036  ;;  %v1673_v61 = vmul.f32 1.442695, %v1660_v48  ;;  %v1373_v37 = vmul.f32 1.442695, %v1361_v28 }
0x116f   :  { %v1691_v60 = vsel %vm42_vm0, %v4043_v57, 0.0  ;;  %v4048_v4 = vpop.eup %3038 }
0x1170   :  { %1689 = vadd.xlane.f32.xlu2 %v1688_v35  ;;  %3040 = vpow2.f32 %v1673_v61  ;;  %v1384_v10 = vsel %vm42_vm0, %v4048_v4, 0.0 }
0x1171   :  { %3042 = vpow2.f32 %v1369_v7 }
0x1173   :  { %v1350_v19 = vpop.xlane.xlu1 %1349 }
0x1174   :  { %v1362_v31 = vsub.f32 %v3985_v41, %v1350_v19 }
0x1176   :  { %v4054_v9 = vpop.eup %3040  ;;  %v1375_v47 = vmul.f32 1.442695, %v1362_v31 }
0x1177   :  { %v1694_v44 = vsel %vm42_vm0, %v4054_v9, 0.0  ;;  %v4058_v12 = vpop.eup %3042 }
0x1178   :  { %1692 = vadd.xlane.f32.xlu2 %v1691_v60  ;;  %v1387_v15 = vsel %vm42_vm0, %v4058_v12, 0.0 }
0x117b   :  { %v1353_v63 = vpop.xlane.xlu2 %1352  ;;  %v1651_v3 = vpop.xlane.xlu1 %1650 }
0x117c   :  { %v1363_v32 = vsub.f32 %v3994_v53, %v1353_v63  ;;  %v1661_v5 = vsub.f32 %v3992_v49, %v1651_v3  ;;  %v1360_v49 = vsub.f32 %v3968_v23, %v1344_v34 }
0x117e   :  { %v1377_v62 = vmul.f32 1.442695, %v1363_v32  ;;  %v1675_v8 = vmul.f32 1.442695, %v1661_v5  ;;  %v1371_v27 = vmul.f32 1.442695, %v1360_v49 }
0x1180   :  { %1385 = vadd.xlane.f32.xlu2 %v1384_v10  ;;  %3044 = vpow2.f32 %v1675_v8 }
0x1181   :  { %3046 = vpow2.f32 %v1377_v62 }
0x1183   :  { %v1654_v56 = vpop.xlane.xlu2 %1653 }
0x1184   :  { %v1662_v53 = vsub.f32 %v4003_v2, %v1654_v56  ;;  %1695 = vadd.xlane.f32.xlu0 %v1694_v44 }
0x1186   :  { %v1677_v13 = vmul.f32 1.442695, %v1662_v53  ;;  %v4062_v52 = vpop.eup %3044 }
0x1187   :  { %v4066_v16 = vpop.eup %3046  ;;  %v1697_v0 = vsel %vm42_vm0, %v4062_v52, 0.0 }
0x1188   :  { %3048 = vpow2.f32 %v1677_v13  ;;  %1388 = vadd.xlane.f32.xlu2 %v1387_v15  ;;  %1698 = vadd.xlane.f32.xlu1 %v1697_v0  ;;  %v1399_v2 = vsel %vm42_vm0, %v4066_v16, 0.0 }
0x1189   :  { %3050 = vpow2.f32 %v1371_v27 }
0x118a   :  { %3052 = vpow2.f32 %v1373_v37 }
0x118b   :  { %3054 = vpow2.f32 %v1375_v47 }
0x118c   :  { %1400 = vadd.xlane.f32.xlu0 %v1399_v2 }
0x118e   :  { %v4072_v23 = vpop.eup %3048 }
0x118f   :  { %v1700_v29 = vsel %vm42_vm0, %v4072_v23, 0.0  ;;  %v4077_v40 = vpop.eup %3050 }
0x1190   :  { %1701 = vadd.xlane.f32.xlu2 %v1700_v29  ;;  %v1390_v20 = vsel %vm42_vm0, %v4077_v40, 0.0  ;;  %v4082_v34 = vpop.eup %3052 }
0x1191   :  { %v1393_v33 = vsel %vm42_vm0, %v4082_v34, 0.0  ;;  %v4086_v25 = vpop.eup %3054 }
0x1192   :  { %v1396_v43 = vsel %vm42_vm0, %v4086_v25, 0.0 }
0x1193   :  { %v2941_v19 = vpop.permute.xlu1 %2940 }
0x1194   :  { %v2942_v61 = vunpack.i.l.bf16 %v2941_v19 }
0x1198   :  { %1391 = vadd.xlane.f32.xlu2 %v1390_v20 }
0x11a0   :  { %1394 = vadd.xlane.f32.xlu2 %v1393_v33 }
0x11a8   :  { %1397 = vadd.xlane.f32.xlu2 %v1396_v43 }
0x11b1   :  { %v1681_v54 = vpop.xlane.xlu0 %1680 }
0x11b2   :  { %3056 = vrcp.f32 %v1681_v54 }
0x11b8   :  { %v3057_v41 = vpop.eup %3056 }
0x11b9   :  { %v1711_v39 = vmul.f32 %v3057_v41, %v4011_v26  ;;  %v1684_v42 = vpop.xlane.xlu0 %1683  ;;  %v2943_v26 = vunpack.i.h.bf16 %v2941_v19 }
0x11ba   :  { %3058 = vrcp.f32 %v1684_v42 }
0x11bb   :  { %2857 = vmatmul.msk.f32.vlgmr.msra.gmra.mxu1 %vm42_vm0, %v1711_v39 }
0x11c0   :  { %v3059_v50 = vpop.eup %3058 }
0x11c1   :  { %v1712_v35 = vmul.f32 %v3059_v50, %v4015_v58 }
0x11c3   :  { %2858 = vmatmul.msk.f32.gmra.mxu1 %vm42_vm0, %v1712_v35 }
0x11cb   :  { %v1383_v51 = vpop.xlane.xlu2 %1382 }
0x11cc   :  { %3060 = vrcp.f32 %v1383_v51  ;;  %v2936_v48 = vpop.permute.xlu0 %2935 }
0x11cd   :  { %v2937_v55 = vunpack.i.l.bf16 %v2936_v48  ;;  %v2938_v59 = vunpack.i.h.bf16 %v2936_v48 }
0x11cf   :  { %1481 = vmatpush.msrb.mxu2 %v2937_v55 }
0x11d1   :  { %1482 = vmatpush.msrb.mxu2 %v2938_v59  ;;  %v1850_v59 = vld [vmem:[%s4602_s1 + $0x358] sm:$0xff] }
0x11d2   :  { %v3061_v60 = vpop.eup %3060 }
0x11d3   :  { %v1413_v7 = vmul.f32 %v3061_v60, %v4020_v18  ;;  %v1356_v63 = vpop.xlane.xlu2 %1355  ;;  %1483 = vmatpush.msrb.mxu2 %v2942_v61  ;;  %v1849_v61 = vld [vmem:[%s4602_s1 + $0x350] sm:$0xff] }
0x11d4   :  { %v1364_v3 = vsub.f32 %v4027_v14, %v1356_v63 }
0x11d5   :  { %1484 = vmatpush.msrb.mxu2 %v2943_v26  ;;  %v1848_v26 = vld [vmem:[%s4602_s1 + $0x348] sm:$0xff] }
0x11d6   :  { %v1379_v58 = vmul.f32 1.442695, %v1364_v3  ;;  %2833 = vmatmul.msk.f32.vlgmr.msrb.gmra.mxu2 %vm42_vm0, %v1413_v7 }
0x11d8   :  { %3062 = vpow2.f32 %v1379_v58 }
0x11db   :  { %v1687_v32 = vpop.xlane.xlu2 %1686 }
0x11dc   :  { %3064 = vrcp.f32 %v1687_v32 }
0x11de   :  { %v4097_v5 = vpop.eup %3062 }
0x11df   :  { %v1402_v62 = vsel %vm42_vm0, %v4097_v5, 0.0 }
0x11e0   :  { %1403 = vadd.xlane.f32.xlu1 %v1402_v62 }
0x11e2   :  { %v3065_v8 = vpop.eup %3064 }
0x11e3   :  { %v1690_v10 = vpop.xlane.xlu2 %1689  ;;  %v1713_v18 = vmul.f32 %v3065_v8, %v4032_v38 }
0x11e4   :  { %3066 = vrcp.f32 %v1690_v10 }
0x11e5   :  { %2859 = vmatmul.msk.f32.gmra.mxu1 %vm42_vm0, %v1713_v18 }
0x11ea   :  { %v3067_v14 = vpop.eup %3066 }
0x11eb   :  { %v1693_v56 = vpop.xlane.xlu2 %1692  ;;  %v1714_v44 = vmul.f32 %v3067_v14, %v4037_v30 }
0x11ec   :  { %3068 = vrcp.f32 %v1693_v56 }
0x11ed   :  { %2860 = vmatmul.msk.f32.gmra.mxu1 %vm42_vm0, %v1714_v44 }
0x11f2   :  { %v3069_v53 = vpop.eup %3068 }
0x11f3   :  { %v1386_v49 = vpop.xlane.xlu2 %1385  ;;  %v1715_v13 = vmul.f32 %v3069_v53, %v4043_v57 }
0x11f4   :  { %3070 = vrcp.f32 %v1386_v49 }
0x11f5   :  { %2861 = vmatmul.msk.f32.gmra.mxu1 %vm42_vm0, %v1715_v13 }
0x11f7   :  { %v1696_v15 = vpop.xlane.xlu0 %1695 }
0x11f8   :  { %3072 = vrcp.f32 %v1696_v15 }
0x11fa   :  { %v3071_v38 = vpop.eup %3070 }
0x11fb   :  { %v1389_v0 = vpop.xlane.xlu2 %1388  ;;  %v1414_v27 = vmul.f32 %v3071_v38, %v4048_v4  ;;  %v1699_v2 = vpop.xlane.xlu1 %1698 }
0x11fc   :  { %3074 = vrcp.f32 %v1389_v0 }
0x11fd   :  { %2834 = vmatmul.msk.f32.gmra.mxu2 %vm42_vm0, %v1414_v27  ;;  %3076 = vrcp.f32 %v1699_v2 }
0x11fe   :  { %v3073_v30 = vpop.eup %3072 }
0x11ff   :  { %v1716_v28 = vmul.f32 %v3073_v30, %v4054_v9  ;;  %v1401_v39 = vpop.xlane.xlu0 %1400 }
0x1201   :  { %2862 = vmatmul.msk.f32.gmra.mxu1 %vm42_vm0, %v1716_v28 }
0x1202   :  { %v3075_v57 = vpop.eup %3074 }
0x1203   :  { %v1702_v29 = vpop.xlane.xlu2 %1701  ;;  %v1415_v37 = vmul.f32 %v3075_v57, %v4058_v12  ;;  %v3077_v31 = vpop.eup %3076 }
0x1204   :  { %3078 = vrcp.f32 %v1702_v29  ;;  %v1717_v4 = vmul.f32 %v3077_v31, %v4062_v52 }
0x1205   :  { %2835 = vmatmul.msk.f32.gmra.mxu2 %vm42_vm0, %v1415_v37 }
0x1209   :  { %2863 = vmatmul.msk.f32.gmra.mxu1 %vm42_vm0, %v1717_v4  ;;  %v2961_v4 = vld [vmem:[%s4602_s1 + $0x368] ss:$0 sm:$0xff] }
0x120a   :  { %v3079_v47 = vpop.eup %3078 }
0x120b   :  { %v1392_v20 = vpop.xlane.xlu2 %1391  ;;  %v1718_v33 = vmul.f32 %v3079_v47, %v4072_v23 }
0x120c   :  { %3080 = vrcp.f32 %v1392_v20 }
0x1211   :  { %2864 = vmatmul.msk.f32.gmra.mxu1 %vm42_vm0, %v1718_v33 }
0x1212   :  { %v3081_v9 = vpop.eup %3080 }
0x1213   :  { %v1395_v43 = vpop.xlane.xlu2 %1394  ;;  %v1416_v54 = vmul.f32 %v3081_v9, %v4077_v40 }
0x1214   :  { %3082 = vrcp.f32 %v1395_v43 }
0x1215   :  { %2836 = vmatmul.msk.f32.gmra.mxu2 %vm42_vm0, %v1416_v54 }
0x121a   :  { %v3083_v12 = vpop.eup %3082 }
0x121b   :  { %v1398_v41 = vpop.xlane.xlu2 %1397  ;;  %v1417_v52 = vmul.f32 %v3083_v12, %v4082_v34 }
0x121c   :  { %3084 = vrcp.f32 %v1398_v41 }
0x121d   :  { %2837 = vmatmul.msk.f32.gmra.mxu2 %vm42_vm0, %v1417_v52  ;;  %3086 = vrcp.f32 %v1401_v39 }
0x1222   :  { %v3085_v42 = vpop.eup %3084 }
0x1223   :  { %v1418_v23 = vmul.f32 %v3085_v42, %v4086_v25  ;;  %v3087_v50 = vpop.eup %3086 }
0x1224   :  { %v1419_v40 = vmul.f32 %v3087_v50, %v4066_v16  ;;  %v1851_v16 = vld [vmem:[%s4602_s1 + $0x360] sm:$0xff] }
0x1225   :  { %2838 = vmatmul.msk.f32.gmra.mxu2 %vm42_vm0, %v1418_v23 }
0x1226   :  { %1888 = vmatpush.msra.mxu2 %v1851_v16 }
0x1228   :  { %1889 = vmatpush.msra.mxu2 %v1850_v59 }
0x122a   :  { %1890 = vmatpush.msra.mxu2 %v1849_v61 }
0x122c   :  { %1891 = vmatpush.msra.mxu2 %v1848_v26 }
0x122d   :  { %2839 = vmatmul.msk.f32.gmra.mxu2 %vm42_vm0, %v1419_v40 }
0x1238   :  { %v1784_v35 = vpop.f32.mrf.mxu1 }
0x1239   :  { %1816 = vrot.lane.b32.xlu2 %v1784_v35, %s3188_s16 }
0x1240   :  { %v1787_v51 = vpop.f32.mrf.mxu1 }
0x1241   :  { %1818 = vrot.lane.b32.xlu0 %v1787_v51, %s3188_s16 }
0x1253   :  { %v1404_v34 = vpop.xlane.xlu1 %1403 }
0x1254   :  { %3088 = vrcp.f32 %v1404_v34 }
0x1259   :  { %v1486_v58 = vpop.f32.mrf.mxu2 }
0x125a   :  { %v3089_v48 = vpop.eup %3088 }
0x125b   :  { %v1420_v55 = vmul.f32 %v3089_v48, %v4097_v5 }
0x125d   :  { %2840 = vmatmul.msk.f32.gmra.mxu2 %vm42_vm0, %v1420_v55 }
0x1262   :  { %v1790_v25 = vpop.f32.mrf.mxu1 }
0x1263   :  { %1820 = vrot.lane.b32.xlu1 %v1790_v25, %s3188_s16 }
0x126a   :  { %v1793_v19 = vpop.f32.mrf.mxu1 }
0x126b   :  { %1822 = vrot.lane.b32.xlu0 %v1793_v19, %s3188_s16 }
0x1272   :  { %v1796_v60 = vpop.f32.mrf.mxu1 }
0x1273   :  { %1824 = vrot.lane.b32.xlu2 %v1796_v60, %s3188_s16 }
0x127e   :  { %v1799_v7 = vpop.f32.mrf.mxu1 }
0x127f   :  { %1826 = vrot.lane.b32.xlu1 %v1799_v7, %s3188_s16 }
0x1280   :  { %v1489_v62 = vpop.f32.mrf.mxu2 }
0x1286   :  { %v1802_v63 = vpop.f32.mrf.mxu1 }
0x1287   :  { %1828 = vrot.lane.b32.xlu0 %v1802_v63, %s3188_s16 }
0x1288   :  { %v1492_v18 = vpop.f32.mrf.mxu2 }
0x128e   :  { %v1805_v3 = vpop.f32.mrf.mxu1 }
0x128f   :  { %1830 = vrot.lane.b32.xlu2 %v1805_v3, %s3188_s16 }
0x1293   :  { %v1817_v32 = vpop.permute.xlu2 %1816 }
0x1294   :  { %v1840_v5 = vsel %vm276_vm5, %v1486_v58, %v1817_v32 }
0x1295   :  { %2865 = vmatmul.msk.f32.vlgmr.msra.gmra.mxu2 %vm122_vm2, %v1840_v5 }
0x1298   :  { %v1495_v44 = vpop.f32.mrf.mxu2 }
0x12a0   :  { %v1498_v15 = vpop.f32.mrf.mxu2 }
0x12a8   :  { %v1501_v0 = vpop.f32.mrf.mxu2 }
0x12b0   :  { %v1504_v30 = vpop.f32.mrf.mxu2 }
0x12b3   :  { %v1819_v8 = vpop.permute.xlu0 %1818 }
0x12b4   :  { %v1841_v10 = vsel %vm276_vm5, %v1489_v62, %v1819_v8 }
0x12b5   :  { %2866 = vmatmul.msk.f32.gmra.mxu2 %vm122_vm2, %v1841_v10 }
0x12cd   :  { %v1825_v13 = vpop.permute.xlu2 %1824 }
0x12ce   :  { %v1844_v38 = vsel %vm276_vm5, %v1498_v15, %v1825_v13 }
0x12d5   :  { %v1821_v14 = vpop.permute.xlu1 %1820 }
0x12d6   :  { %v1842_v56 = vsel %vm276_vm5, %v1492_v18, %v1821_v14 }
0x12d7   :  { %2867 = vmatmul.msk.f32.gmra.mxu2 %vm122_vm2, %v1842_v56 }
0x12dd   :  { %v1823_v53 = vpop.permute.xlu0 %1822 }
0x12de   :  { %v1843_v49 = vsel %vm276_vm5, %v1495_v44, %v1823_v53 }
0x12df   :  { %2868 = vmatmul.msk.f32.gmra.mxu2 %vm122_vm2, %v1843_v49 }
0x12e0   :  { %v1507_v37 = vpop.f32.mrf.mxu2 }
0x12e7   :  { %2869 = vmatmul.msk.f32.gmra.mxu2 %vm122_vm2, %v1844_v38 }
0x12e9   :  { %v1831_v29 = vpop.permute.xlu2 %1830 }
0x12ea   :  { %v1847_v31 = vsel %vm276_vm5, %v1507_v37, %v1831_v29 }
0x12f1   :  { %v1827_v27 = vpop.permute.xlu1 %1826 }
0x12f2   :  { %v1845_v2 = vsel %vm276_vm5, %v1501_v0, %v1827_v27 }
0x12f3   :  { %2870 = vmatmul.msk.f32.gmra.mxu2 %vm122_vm2, %v1845_v2 }
0x12f9   :  { %v1829_v28 = vpop.permute.xlu0 %1828 }
0x12fa   :  { %v1846_v57 = vsel %vm276_vm5, %v1504_v30, %v1829_v28 }
0x12fb   :  { %2871 = vmatmul.msk.f32.gmra.mxu2 %vm122_vm2, %v1846_v57 }
0x1303   :  { %2872 = vmatmul.msk.f32.gmra.mxu2 %vm122_vm2, %v1847_v31 }
0x1318   :  { %v1893_v20 = vpop.f32.mrf.mxu2 }
0x1319   :  { %v1917_v47 = vadd.f32 %v1893_v20, %v3612_v1 }
0x131b   :  { %v4167_v33 = vadd.f32 %v2961_v4, %v1917_v47 }
0x131d   :  { %v1937_v9 = vsel %vm122_vm2, %v4167_v33, 0.0 }
0x131e   :  { %1938 = vadd.xlane.f32.xlu1 %v1937_v9 }
0x1338   :  { %v1896_v43 = vpop.f32.mrf.mxu2 }
0x1339   :  { %v1918_v54 = vadd.f32 %v1896_v43, %v3619_v6 }
0x133b   :  { %v4172_v12 = vadd.f32 %v2961_v4, %v1918_v54 }
0x133d   :  { %v1940_v41 = vsel %vm122_vm2, %v4172_v12, 0.0 }
0x133e   :  { %1941 = vadd.xlane.f32.xlu0 %v1940_v41  ;;  %v2134_v41 = vld [vmem:[%s4602_s1 + $0x398] sm:$0xff] }
0x133f   :  { %2173 = vmatpush.msrb.mxu3 %v2134_v41 }
0x135a   :  { %v1899_v52 = vpop.f32.mrf.mxu2 }
0x135b   :  { %v1919_v39 = vadd.f32 %v1899_v52, %v3631_v11  ;;  %v2133_v52 = vld [vmem:[%s4602_s1 + $0x390] sm:$0xff] }
0x135c   :  { %2174 = vmatpush.msrb.mxu3 %v2133_v52 }
0x135d   :  { %v4177_v42 = vadd.f32 %v2961_v4, %v1919_v39  ;;  %v2132_v39 = vld [vmem:[%s4602_s1 + $0x388] sm:$0xff] }
0x135e   :  { %2175 = vmatpush.msrb.mxu3 %v2132_v39 }
0x135f   :  { %v1943_v1 = vsel %vm122_vm2, %v4177_v42, 0.0 }
0x1360   :  { %1944 = vadd.xlane.f32.xlu2 %v1943_v1  ;;  %v2131_v1 = vld [vmem:[%s4602_s1 + $0x380] sm:$0xff] }
0x1361   :  { %2176 = vmatpush.msrb.mxu3 %v2131_v1 }
0x1362   :  { %v1902_v23 = vpop.f32.mrf.mxu2 }
0x1363   :  { %v1920_v50 = vadd.f32 %v1902_v23, %v3650_v24 }
0x1365   :  { %v4182_v40 = vadd.f32 %v2961_v4, %v1920_v50 }
0x1367   :  { %v1946_v6 = vsel %vm122_vm2, %v4182_v40, 0.0 }
0x1368   :  { %1947 = vadd.xlane.f32.xlu1 %v1946_v6 }
0x136a   :  { %v1905_v35 = vpop.f32.mrf.mxu2 }
0x136b   :  { %v1921_v51 = vadd.f32 %v1905_v35, %v3626_v22 }
0x136d   :  { %v4187_v34 = vadd.f32 %v2961_v4, %v1921_v51 }
0x136f   :  { %v1949_v11 = vsel %vm122_vm2, %v4187_v34, 0.0 }
0x1370   :  { %1950 = vadd.xlane.f32.xlu0 %v1949_v11 }
0x1376   :  { %v1908_v48 = vpop.f32.mrf.mxu2 }
0x1377   :  { %v1922_v55 = vadd.f32 %v1908_v48, %v3643_v17 }
0x1379   :  { %v4192_v25 = vadd.f32 %v2961_v4, %v1922_v55 }
0x137b   :  { %v1952_v24 = vsel %vm122_vm2, %v4192_v25, 0.0 }
0x137c   :  { %1953 = vadd.xlane.f32.xlu2 %v1952_v24 }
0x137e   :  { %v1911_v19 = vpop.f32.mrf.mxu2 }
0x137f   :  { %v1923_v16 = vadd.f32 %v1911_v19, %v3648_v21 }
0x1381   :  { %v4197_v59 = vadd.f32 %v2961_v4, %v1923_v16 }
0x1383   :  { %v1955_v22 = vsel %vm122_vm2, %v4197_v59, 0.0 }
0x1384   :  { %1956 = vadd.xlane.f32.xlu0 %v1955_v22 }
0x1386   :  { %v1914_v26 = vpop.f32.mrf.mxu2 }
0x1387   :  { %v1924_v63 = vadd.f32 %v1914_v26, %v3669_v36  ;;  %v4278_v26 = vld [vmem:[%s4602_s1 + $0x370] ss:$0 sm:$0xff] }
0x1389   :  { %v4209_v3 = vadd.f32 %v2961_v4, %v1924_v63 }
0x138b   :  { %v1958_v58 = vsel %vm122_vm2, %v4209_v3, 0.0 }
0x1391   :  { %v1939_v61 = vpop.xlane.xlu1 %1938 }
0x1392   :  { %v1961_v60 = vmul.f32 %v1939_v61, %v3305_v45 }
0x1394   :  { %v4203_v17 = vsub.f32 %v4167_v33, %v1961_v60 }
0x1396   :  { %v1977_v7 = vmul.f32 %v4203_v17, %v4203_v17 }
0x1398   :  { %v1985_v21 = vsel %vm122_vm2, %v1977_v7, 0.0 }
0x1399   :  { %1986 = vadd.xlane.f32.xlu1 %v1985_v21  ;;  %v4284_v21 = vld [vmem:[%s4602_s1 + $0x378] ss:$0 sm:$0xff] }
0x13a1   :  { %1959 = vadd.xlane.f32.xlu1 %v1958_v58 }
0x13b1   :  { %v1942_v32 = vpop.xlane.xlu0 %1941 }
0x13b2   :  { %v1962_v5 = vmul.f32 %v1942_v32, %v3305_v45 }
0x13b4   :  { %v4215_v62 = vsub.f32 %v4172_v12, %v1962_v5 }
0x13b6   :  { %v1978_v8 = vmul.f32 %v4215_v62, %v4215_v62 }
0x13b8   :  { %v1988_v36 = vsel %vm122_vm2, %v1978_v8, 0.0 }
0x13b9   :  { %1989 = vadd.xlane.f32.xlu2 %v1988_v36 }
0x13d3   :  { %v1945_v10 = vpop.xlane.xlu2 %1944 }
0x13d4   :  { %v1963_v18 = vmul.f32 %v1945_v10, %v3305_v45 }
0x13d6   :  { %v4222_v14 = vsub.f32 %v4177_v42, %v1963_v18 }
0x13d8   :  { %v1979_v56 = vmul.f32 %v4222_v14, %v4222_v14 }
0x13da   :  { %v1991_v44 = vsel %vm122_vm2, %v1979_v56, 0.0 }
0x13db   :  { %v1948_v53 = vpop.xlane.xlu1 %1947  ;;  %1992 = vadd.xlane.f32.xlu0 %v1991_v44 }
0x13dc   :  { %v1964_v49 = vmul.f32 %v1948_v53, %v3305_v45 }
0x13de   :  { %v4229_v13 = vsub.f32 %v4182_v40, %v1964_v49 }
0x13e0   :  { %v1980_v15 = vmul.f32 %v4229_v13, %v4229_v13 }
0x13e2   :  { %v1994_v38 = vsel %vm122_vm2, %v1980_v15, 0.0 }
0x13e3   :  { %v1951_v0 = vpop.xlane.xlu0 %1950  ;;  %1995 = vadd.xlane.f32.xlu2 %v1994_v38 }
0x13e4   :  { %v1965_v27 = vmul.f32 %v1951_v0, %v3305_v45 }
0x13e6   :  { %v4236_v2 = vsub.f32 %v4187_v34, %v1965_v27 }
0x13e8   :  { %v1981_v30 = vmul.f32 %v4236_v2, %v4236_v2 }
0x13ea   :  { %v1997_v28 = vsel %vm122_vm2, %v1981_v30, 0.0 }
0x13eb   :  { %1998 = vadd.xlane.f32.xlu1 %v1997_v28 }
0x13ef   :  { %v1954_v57 = vpop.xlane.xlu2 %1953 }
0x13f0   :  { %v1966_v29 = vmul.f32 %v1954_v57, %v3305_v45 }
0x13f2   :  { %v4243_v37 = vsub.f32 %v4192_v25, %v1966_v29 }
0x13f4   :  { %v1982_v31 = vmul.f32 %v4243_v37, %v4243_v37 }
0x13f6   :  { %v2000_v4 = vsel %vm122_vm2, %v1982_v31, 0.0 }
0x13f7   :  { %v1957_v20 = vpop.xlane.xlu0 %1956  ;;  %2001 = vadd.xlane.f32.xlu0 %v2000_v4 }
0x13f8   :  { %v1967_v47 = vmul.f32 %v1957_v20, %v3305_v45 }
0x13fa   :  { %v4250_v9 = vsub.f32 %v4197_v59, %v1967_v47 }
0x13fc   :  { %v1983_v43 = vmul.f32 %v4250_v9, %v4250_v9 }
0x13fe   :  { %v2003_v54 = vsel %vm122_vm2, %v1983_v43, 0.0 }
0x13ff   :  { %2004 = vadd.xlane.f32.xlu2 %v2003_v54 }
0x140c   :  { %v1987_v23 = vpop.xlane.xlu1 %1986 }
0x140d   :  { %v2009_v50 = vmul.f32 %v1987_v23, %v3305_v45 }
0x140f   :  { %v2017_v6 = vadd.f32 1e-05, %v2009_v50 }
0x1411   :  { %3090 = vrsqrt.f32 %v2017_v6  ;;  %vm2031_vm8 = vweird.f32 %v2017_v6 }
0x1414   :  { %v1960_v35 = vpop.xlane.xlu1 %1959 }
0x1415   :  { %v1968_v51 = vmul.f32 %v1960_v35, %v3305_v45 }
0x1417   :  { %v3091_v11 = vpop.eup %3090  ;;  %v4270_v48 = vsub.f32 %v4209_v3, %v1968_v51 }
0x1418   :  { %v2026_v55 = vmul.f32 %v3091_v11, %v2017_v6  ;;  %vm2032_vm5 = vweird.f32 %v3091_v11 }
0x1419   :  { %v1984_v24 = vmul.f32 %v4270_v48, %v4270_v48  ;;  %vm2033_vm10 = vmor %vm2031_vm8, %vm2032_vm5 }
0x141a   :  { %v2027_v19 = vmul.f32 %v3091_v11, %v2026_v55 }
0x141b   :  { %v2006_v16 = vsel %vm122_vm2, %v1984_v24, 0.0 }
0x141c   :  { %v2028_v22 = vmul.f32 0.5, %v2027_v19  ;;  %2007 = vadd.xlane.f32.xlu1 %v2006_v16 }
0x141e   :  { %v2029_v61 = vsub.f32 1.5, %v2028_v22 }
0x1420   :  { %v2030_v60 = vmul.f32 %v3091_v11, %v2029_v61 }
0x1422   :  { %v2034_v7 = vsel %vm2033_vm10, %v3091_v11, %v2030_v60 }
0x1423   :  { %v2105_v63 = vmul.f32 %v2034_v7, %v4203_v17 }
0x1425   :  { %v2114_v58 = vmul.f32 %v4278_v26, %v2105_v63 }
0x1427   :  { %v2123_v32 = vadd.f32 %v4284_v21, %v2114_v58 }
0x1429   :  { %2873 = vmatmul.msk.f32.vlgmr.msrb.gmra.mxu3 %vm122_vm2, %v2123_v32 }
0x142c   :  { %v1990_v5 = vpop.xlane.xlu2 %1989 }
0x142d   :  { %v2010_v8 = vmul.f32 %v1990_v5, %v3305_v45 }
0x142f   :  { %v2018_v36 = vadd.f32 1e-05, %v2010_v8 }
0x1431   :  { %3092 = vrsqrt.f32 %v2018_v36  ;;  %vm2041_vm12 = vweird.f32 %v2018_v36 }
0x1437   :  { %v3093_v10 = vpop.eup %3092 }
0x1438   :  { %v2036_v18 = vmul.f32 %v3093_v10, %v2018_v36  ;;  %vm2042_vm11 = vweird.f32 %v3093_v10 }
0x1439   :  { %vm2043_vm13 = vmor %vm2041_vm12, %vm2042_vm11 }
0x143a   :  { %v2037_v56 = vmul.f32 %v3093_v10, %v2036_v18 }
0x143c   :  { %v2038_v17 = vmul.f32 0.5, %v2037_v56 }
0x143e   :  { %v2039_v44 = vsub.f32 1.5, %v2038_v17 }
0x1440   :  { %v2040_v53 = vmul.f32 %v3093_v10, %v2039_v44 }
0x1442   :  { %v2044_v49 = vsel %vm2043_vm13, %v3093_v10, %v2040_v53 }
0x1443   :  { %v2106_v15 = vmul.f32 %v2044_v49, %v4215_v62 }
0x1445   :  { %v2115_v38 = vmul.f32 %v4278_v26, %v2106_v15 }
0x1447   :  { %v2124_v0 = vadd.f32 %v4284_v21, %v2115_v38 }
0x1449   :  { %2874 = vmatmul.msk.f32.gmra.mxu3 %vm122_vm2, %v2124_v0 }
0x144e   :  { %v1993_v27 = vpop.xlane.xlu0 %1992 }
0x144f   :  { %v2011_v30 = vmul.f32 %v1993_v27, %v3305_v45 }
0x1451   :  { %v2019_v28 = vadd.f32 1e-05, %v2011_v30 }
0x1453   :  { %3094 = vrsqrt.f32 %v2019_v28  ;;  %vm2051_vm14 = vweird.f32 %v2019_v28 }
0x1456   :  { %v1996_v57 = vpop.xlane.xlu2 %1995 }
0x1457   :  { %v2012_v29 = vmul.f32 %v1996_v57, %v3305_v45 }
0x1459   :  { %v3095_v31 = vpop.eup %3094  ;;  %v2020_v4 = vadd.f32 1e-05, %v2012_v29 }
0x145a   :  { %v2046_v20 = vmul.f32 %v3095_v31, %v2019_v28  ;;  %vm2052_vm6 = vweird.f32 %v3095_v31 }
0x145b   :  { %3096 = vrsqrt.f32 %v2020_v4  ;;  %vm2053_vm15 = vmor %vm2051_vm14, %vm2052_vm6  ;;  %vm2061_vm4 = vweird.f32 %v2020_v4 }
0x145c   :  { %v2047_v47 = vmul.f32 %v3095_v31, %v2046_v20 }
0x145e   :  { %v2048_v62 = vmul.f32 0.5, %v2047_v47  ;;  %v1999_v43 = vpop.xlane.xlu1 %1998 }
0x145f   :  { %v2013_v54 = vmul.f32 %v1999_v43, %v3305_v45 }
0x1460   :  { %v2049_v41 = vsub.f32 1.5, %v2048_v62 }
0x1461   :  { %v3097_v52 = vpop.eup %3096  ;;  %v2021_v39 = vadd.f32 1e-05, %v2013_v54 }
0x1462   :  { %v2050_v1 = vmul.f32 %v3095_v31, %v2049_v41  ;;  %v2056_v23 = vmul.f32 %v3097_v52, %v2020_v4  ;;  %vm2062_vm3 = vweird.f32 %v3097_v52 }
0x1463   :  { %3098 = vrsqrt.f32 %v2021_v39  ;;  %vm2063_vm7 = vmor %vm2061_vm4, %vm2062_vm3  ;;  %vm2071_vm5 = vweird.f32 %v2021_v39 }
0x1464   :  { %v2054_v50 = vsel %vm2053_vm15, %v3095_v31, %v2050_v1  ;;  %v2057_v6 = vmul.f32 %v3097_v52, %v2056_v23 }
0x1465   :  { %v2107_v35 = vmul.f32 %v2054_v50, %v4222_v14  ;;  %v2385_v50 = vld [vmem:[%s4602_s1 + $0x420] sm:$0xff] }
0x1466   :  { %v2058_v51 = vmul.f32 0.5, %v2057_v6  ;;  %2388 = vmatpush.msrb.mxu0 %v2385_v50 }
0x1467   :  { %v2116_v11 = vmul.f32 %v4278_v26, %v2107_v35  ;;  %v2384_v35 = vld [vmem:[%s4602_s1 + $0x418] sm:$0xff] }
0x1468   :  { %v2059_v55 = vsub.f32 1.5, %v2058_v51  ;;  %2389 = vmatpush.msrb.mxu0 %v2384_v35  ;;  %v2382_v51 = vld [vmem:[%s4602_s1 + $0x408] sm:$0xff] }
0x1469   :  { %v3099_v24 = vpop.eup %3098  ;;  %v2125_v19 = vadd.f32 %v4284_v21, %v2116_v11  ;;  %v2381_v11 = vld [vmem:[%s4602_s1 + $0x400] sm:$0xff] }
0x146a   :  { %v2060_v16 = vmul.f32 %v3097_v52, %v2059_v55  ;;  %v2066_v22 = vmul.f32 %v3099_v24, %v2021_v39  ;;  %v2002_v61 = vpop.xlane.xlu0 %2001  ;;  %vm2072_vm9 = vweird.f32 %v3099_v24 }
0x146b   :  { %v2014_v60 = vmul.f32 %v2002_v61, %v3305_v45  ;;  %2875 = vmatmul.msk.f32.gmra.mxu3 %vm122_vm2, %v2125_v19  ;;  %vm2073_vm8 = vmor %vm2071_vm5, %vm2072_vm9  ;;  %v2378_v61 = vld [vmem:[%s4602_s1 + $0x3e8] sm:$0xff] }
0x146c   :  { %v2064_v7 = vsel %vm2063_vm7, %v3097_v52, %v2060_v16  ;;  %v2067_v63 = vmul.f32 %v3099_v24, %v2066_v22  ;;  %v2379_v16 = vld [vmem:[%s4602_s1 + $0x3f0] sm:$0xff] }
0x146d   :  { %v2022_v14 = vadd.f32 1e-05, %v2014_v60  ;;  %v2108_v58 = vmul.f32 %v2064_v7, %v4229_v13  ;;  %v2377_v7 = vld [vmem:[%s4602_s1 + $0x3e0] sm:$0xff] }
0x146e   :  { %v2068_v32 = vmul.f32 0.5, %v2067_v63 }
0x146f   :  { %3100 = vrsqrt.f32 %v2022_v14  ;;  %v2117_v5 = vmul.f32 %v4278_v26, %v2108_v58  ;;  %vm2081_vm11 = vweird.f32 %v2022_v14 }
0x1470   :  { %v2069_v8 = vsub.f32 1.5, %v2068_v32  ;;  %v2375_v32 = vld [vmem:[%s4602_s1 + $0x3d0] sm:$0xff] }
0x1471   :  { %v2126_v36 = vadd.f32 %v4284_v21, %v2117_v5 }
0x1472   :  { %v2070_v10 = vmul.f32 %v3099_v24, %v2069_v8  ;;  %v2005_v18 = vpop.xlane.xlu2 %2004 }
0x1473   :  { %v2015_v56 = vmul.f32 %v2005_v18, %v3305_v45  ;;  %2876 = vmatmul.msk.f32.gmra.mxu3 %vm122_vm2, %v2126_v36  ;;  %v2374_v36 = vld [vmem:[%s4602_s1 + $0x3c8] sm:$0xff]  ;;  %v2373_v18 = vld [vmem:[%s4602_s1 + $0x3c0] sm:$0xff] }
0x1474   :  { %v2074_v17 = vsel %vm2073_vm8, %v3099_v24, %v2070_v10  ;;  %v2380_v24 = vld [vmem:[%s4602_s1 + $0x3f8] sm:$0xff] }
0x1475   :  { %v3101_v44 = vpop.eup %3100  ;;  %v2023_v53 = vadd.f32 1e-05, %v2015_v56  ;;  %v2109_v13 = vmul.f32 %v2074_v17, %v4236_v2  ;;  %v4364_v56 = vld [vmem:[%s4602_s1 + $0x3a0] ss:$0 sm:$0xff] }
0x1476   :  { %v2076_v49 = vmul.f32 %v3101_v44, %v2022_v14  ;;  %vm2082_vm10 = vweird.f32 %v3101_v44  ;;  %v2376_v14 = vld [vmem:[%s4602_s1 + $0x3d8] sm:$0xff] }
0x1477   :  { %3102 = vrsqrt.f32 %v2023_v53  ;;  %v2118_v15 = vmul.f32 %v4278_v26, %v2109_v13  ;;  %vm2083_vm12 = vmor %vm2081_vm11, %vm2082_vm10  ;;  %vm2091_vm6 = vweird.f32 %v2023_v53  ;;  %v2370_v13 = vld [vmem:[%s4602_s1 + $0x3a8] sm:$0xff] }
0x1478   :  { %v2077_v38 = vmul.f32 %v3101_v44, %v2076_v49 }
0x1479   :  { %v2127_v0 = vadd.f32 %v4284_v21, %v2118_v15 }
0x147a   :  { %v2078_v27 = vmul.f32 0.5, %v2077_v38 }
0x147b   :  { %2877 = vmatmul.msk.f32.gmra.mxu3 %vm122_vm2, %v2127_v0 }
0x147c   :  { %v2079_v30 = vsub.f32 1.5, %v2078_v27 }
0x147d   :  { %v3103_v28 = vpop.eup %3102 }
0x147e   :  { %v2080_v57 = vmul.f32 %v3101_v44, %v2079_v30  ;;  %v2086_v29 = vmul.f32 %v3103_v28, %v2023_v53  ;;  %vm2092_vm13 = vweird.f32 %v3103_v28 }
0x147f   :  { %vm2093_vm14 = vmor %vm2091_vm6, %vm2092_vm13 }
0x1480   :  { %v2084_v31 = vsel %vm2083_vm12, %v3101_v44, %v2080_v57  ;;  %v2087_v4 = vmul.f32 %v3103_v28, %v2086_v29 }
0x1481   :  { %v2110_v2 = vmul.f32 %v2084_v31, %v4243_v37 }
0x1482   :  { %v2088_v20 = vmul.f32 0.5, %v2087_v4 }
0x1483   :  { %v2119_v47 = vmul.f32 %v4278_v26, %v2110_v2 }
0x1484   :  { %v2089_v62 = vsub.f32 1.5, %v2088_v20 }
0x1485   :  { %v2128_v43 = vadd.f32 %v4284_v21, %v2119_v47 }
0x1486   :  { %v2090_v54 = vmul.f32 %v3103_v28, %v2089_v62 }
0x1487   :  { %2878 = vmatmul.msk.f32.gmra.mxu3 %vm122_vm2, %v2128_v43 }
0x1488   :  { %v2094_v41 = vsel %vm2093_vm14, %v3103_v28, %v2090_v54 }
0x1489   :  { %v2111_v52 = vmul.f32 %v2094_v41, %v4250_v9  ;;  %v2383_v9 = vld [vmem:[%s4602_s1 + $0x410] sm:$0xff] }
0x148a   :  { %2390 = vmatpush.msrb.mxu0 %v2383_v9 }
0x148b   :  { %v2120_v39 = vmul.f32 %v4278_v26, %v2111_v52 }
0x148c   :  { %2391 = vmatpush.msrb.mxu0 %v2382_v51 }
0x148d   :  { %v2129_v1 = vadd.f32 %v4284_v21, %v2120_v39 }
0x148e   :  { %2392 = vmatpush.msrb.mxu0 %v2381_v11 }
0x148f   :  { %v2008_v37 = vpop.xlane.xlu1 %2007  ;;  %2879 = vmatmul.msk.f32.gmra.mxu3 %vm122_vm2, %v2129_v1 }
0x1490   :  { %v2016_v23 = vmul.f32 %v2008_v37, %v3305_v45  ;;  %2393 = vmatpush.msrb.mxu0 %v2380_v24 }
0x1492   :  { %v2024_v6 = vadd.f32 1e-05, %v2016_v23  ;;  %2394 = vmatpush.msrb.mxu0 %v2379_v16 }
0x1494   :  { %3104 = vrsqrt.f32 %v2024_v6  ;;  %2395 = vmatpush.msrb.mxu0 %v2378_v61  ;;  %vm2101_vm3 = vweird.f32 %v2024_v6 }
0x1496   :  { %2396 = vmatpush.msrb.mxu0 %v2377_v7 }
0x1498   :  { %2397 = vmatpush.msrb.mxu0 %v2376_v14 }
0x149a   :  { %v3105_v55 = vpop.eup %3104  ;;  %2398 = vmatpush.msrb.mxu0 %v2375_v32 }
0x149b   :  { %v2096_v19 = vmul.f32 %v3105_v55, %v2024_v6  ;;  %vm2102_vm15 = vweird.f32 %v3105_v55 }
0x149c   :  { %vm2103_vm4 = vmor %vm2101_vm3, %vm2102_vm15  ;;  %2399 = vmatpush.msrb.mxu0 %v2374_v36 }
0x149d   :  { %v2097_v22 = vmul.f32 %v3105_v55, %v2096_v19 }
0x149e   :  { %2400 = vmatpush.msrb.mxu0 %v2373_v18 }
0x149f   :  { %v2098_v60 = vmul.f32 0.5, %v2097_v22 }
0x14a1   :  { %v2099_v63 = vsub.f32 1.5, %v2098_v60 }
0x14a3   :  { %v2100_v58 = vmul.f32 %v3105_v55, %v2099_v63 }
0x14a5   :  { %v2104_v5 = vsel %vm2103_vm4, %v3105_v55, %v2100_v58 }
0x14a6   :  { %v2112_v8 = vmul.f32 %v2104_v5, %v4270_v48  ;;  %v2372_v48 = vld [vmem:[%s4602_s1 + $0x3b8] sm:$0xff] }
0x14a7   :  { %2401 = vmatpush.msrb.mxu0 %v2372_v48 }
0x14a8   :  { %v2121_v10 = vmul.f32 %v4278_v26, %v2112_v8  ;;  %v2371_v26 = vld [vmem:[%s4602_s1 + $0x3b0] sm:$0xff] }
0x14a9   :  { %2402 = vmatpush.msrb.mxu0 %v2371_v26 }
0x14aa   :  { %v2130_v17 = vadd.f32 %v4284_v21, %v2121_v10 }
0x14ab   :  { %2403 = vmatpush.msrb.mxu0 %v2370_v13 }
0x14ac   :  { %v2178_v44 = vpop.f32.mrf.mxu3  ;;  %2880 = vmatmul.msk.f32.gmra.mxu3 %vm122_vm2, %v2130_v17 }
0x14ad   :  { %v2179_v53 = vadd.f32 %v4364_v56, %v2178_v44 }
0x14af   :  { %v2881_v21 = vmul.f32 -1.702, %v2179_v53 }
0x14b1   :  { %v2218_v49 = vmul.f32 1.442695, %v2881_v21 }
0x14b3   :  { %3106 = vpow2.f32 %v2218_v49 }
0x14b9   :  { %v3107_v15 = vpop.eup %3106 }
0x14ba   :  { %v2234_v38 = vadd.f32 1.0, %v3107_v15 }
0x14bc   :  { %3108 = vrcp.f32 %v2234_v38  ;;  %v2253_v28 = vand.u32 2147483648, %v2234_v38  ;;  %v2251_v29 = vand.u32 2147483647, %v2234_v38  ;;  %vm2247_vm9 = vweird.f32 %v2234_v38 }
0x14be   :  { %v2254_v4 = vor.u32 1.1754944e-38, %v2253_v28  ;;  %vm2252_vm8 = vcmp.eq.f32.partialorder %v2251_v29, 8.507059e+37 }
0x14c2   :  { %v3109_v0 = vpop.eup %3108 }
0x14c3   :  { %v2243_v27 = vmul.f32 %v3109_v0, %v2234_v38  ;;  %vm2248_vm7 = vweird.f32 %v3109_v0 }
0x14c4   :  { %vm2249_vm5 = vmor %vm2247_vm9, %vm2248_vm7 }
0x14c5   :  { %v2244_v30 = vsub.f32 1.0, %v2243_v27 }
0x14c7   :  { %v2245_v57 = vmul.f32 %v3109_v0, %v2244_v30 }
0x14c9   :  { %v2246_v31 = vadd.f32 %v3109_v0, %v2245_v57 }
0x14cb   :  { %v2250_v2 = vsel %vm2249_vm5, %v3109_v0, %v2246_v31 }
0x14cc   :  { %v2255_v20 = vsel %vm2252_vm8, %v2254_v4, %v2250_v2  ;;  %v2181_v47 = vpop.f32.mrf.mxu3 }
0x14cd   :  { %v2362_v62 = vmul.f32 %v2255_v20, %v2179_v53  ;;  %v2182_v43 = vadd.f32 %v4364_v56, %v2181_v47 }
0x14cf   :  { %v2882_v54 = vmul.f32 -1.702, %v2182_v43  ;;  %2404 = vmatmul.f32.vlgmr.msrb.gmra.mxu0 %v2362_v62 }
0x14d1   :  { %v2220_v41 = vmul.f32 1.442695, %v2882_v54 }
0x14d3   :  { %3110 = vpow2.f32 %v2220_v41 }
0x14d9   :  { %v3111_v52 = vpop.eup %3110 }
0x14da   :  { %v2235_v39 = vadd.f32 1.0, %v3111_v52 }
0x14dc   :  { %3112 = vrcp.f32 %v2235_v39  ;;  %v2268_v50 = vand.u32 2147483648, %v2235_v39  ;;  %v2266_v35 = vand.u32 2147483647, %v2235_v39  ;;  %vm2262_vm11 = vweird.f32 %v2235_v39 }
0x14de   :  { %v2269_v51 = vor.u32 1.1754944e-38, %v2268_v50  ;;  %vm2267_vm13 = vcmp.eq.f32.partialorder %v2266_v35, 8.507059e+37 }
0x14e2   :  { %v3113_v1 = vpop.eup %3112 }
0x14e3   :  { %v2258_v37 = vmul.f32 %v3113_v1, %v2235_v39  ;;  %vm2263_vm10 = vweird.f32 %v3113_v1 }
0x14e4   :  { %vm2264_vm12 = vmor %vm2262_vm11, %vm2263_vm10 }
0x14e5   :  { %v2259_v23 = vsub.f32 1.0, %v2258_v37 }
0x14e7   :  { %v2260_v6 = vmul.f32 %v3113_v1, %v2259_v23 }
0x14e9   :  { %v2261_v9 = vadd.f32 %v3113_v1, %v2260_v6 }
0x14eb   :  { %v2265_v11 = vsel %vm2264_vm12, %v3113_v1, %v2261_v9 }
0x14ec   :  { %v2270_v55 = vsel %vm2267_vm13, %v2269_v51, %v2265_v11 }
0x14ed   :  { %v2363_v24 = vmul.f32 %v2270_v55, %v2182_v43 }
0x14ee   :  { %v2184_v19 = vpop.f32.mrf.mxu3 }
0x14ef   :  { %v2185_v16 = vadd.f32 %v4364_v56, %v2184_v19  ;;  %2407 = vmatmul.f32.gmra.mxu0 %v2363_v24 }
0x14f1   :  { %v2883_v22 = vmul.f32 -1.702, %v2185_v16 }
0x14f3   :  { %v2222_v61 = vmul.f32 1.442695, %v2883_v22 }
0x14f5   :  { %3114 = vpow2.f32 %v2222_v61 }
0x14f6   :  { %v2187_v60 = vpop.f32.mrf.mxu3 }
0x14f7   :  { %v2188_v7 = vadd.f32 %v4364_v56, %v2187_v60 }
0x14f9   :  { %v2884_v63 = vmul.f32 -1.702, %v2188_v7 }
0x14fb   :  { %v3115_v14 = vpop.eup %3114  ;;  %v2224_v58 = vmul.f32 1.442695, %v2884_v63 }
0x14fc   :  { %v2236_v32 = vadd.f32 1.0, %v3115_v14 }
0x14fd   :  { %3116 = vpow2.f32 %v2224_v58 }
0x14fe   :  { %3118 = vrcp.f32 %v2236_v32  ;;  %v2190_v5 = vpop.f32.mrf.mxu3  ;;  %v2283_v53 = vand.u32 2147483648, %v2236_v32  ;;  %v2281_v21 = vand.u32 2147483647, %v2236_v32  ;;  %vm2277_vm14 = vweird.f32 %v2236_v32 }
0x14ff   :  { %v4382_v8 = vadd.f32 %v4364_v56, %v2190_v5 }
0x1500   :  { %v2284_v28 = vor.u32 1.1754944e-38, %v2283_v53  ;;  %vm2282_vm3 = vcmp.eq.f32.partialorder %v2281_v21, 8.507059e+37 }
0x1501   :  { %v2885_v36 = vmul.f32 -1.702, %v4382_v8 }
0x1503   :  { %v3117_v10 = vpop.eup %3116  ;;  %v2226_v18 = vmul.f32 1.442695, %v2885_v36 }
0x1504   :  { %v3119_v17 = vpop.eup %3118  ;;  %v2237_v48 = vadd.f32 1.0, %v3117_v10 }
0x1505   :  { %3120 = vpow2.f32 %v2226_v18  ;;  %v2273_v44 = vmul.f32 %v3119_v17, %v2236_v32  ;;  %vm2278_vm6 = vweird.f32 %v3119_v17 }
0x1506   :  { %3122 = vrcp.f32 %v2237_v48  ;;  %vm2279_vm15 = vmor %vm2277_vm14, %vm2278_vm6  ;;  %v2298_v62 = vand.u32 2147483648, %v2237_v48  ;;  %v2296_v54 = vand.u32 2147483647, %v2237_v48  ;;  %vm2292_vm7 = vweird.f32 %v2237_v48 }
0x1507   :  { %v2274_v26 = vsub.f32 1.0, %v2273_v44 }
0x1508   :  { %v2299_v37 = vor.u32 1.1754944e-38, %v2298_v62  ;;  %vm2297_vm5 = vcmp.eq.f32.partialorder %v2296_v54, 8.507059e+37 }
0x1509   :  { %v2275_v13 = vmul.f32 %v3119_v17, %v2274_v26 }
0x150a   :  { %v2193_v49 = vpop.f32.mrf.mxu3 }
0x150b   :  { %v3121_v15 = vpop.eup %3120  ;;  %v4386_v38 = vadd.f32 %v4364_v56, %v2193_v49  ;;  %v2276_v0 = vadd.f32 %v3119_v17, %v2275_v13 }
0x150c   :  { %v3123_v27 = vpop.eup %3122  ;;  %v2238_v30 = vadd.f32 1.0, %v3121_v15 }
0x150d   :  { %v2886_v57 = vmul.f32 -1.702, %v4386_v38  ;;  %v2280_v29 = vsel %vm2279_vm15, %v3119_v17, %v2276_v0  ;;  %v2288_v31 = vmul.f32 %v3123_v27, %v2237_v48  ;;  %vm2293_vm4 = vweird.f32 %v3123_v27 }
0x150e   :  { %3124 = vrcp.f32 %v2238_v30  ;;  %v2285_v4 = vsel %vm2282_vm3, %v2284_v28, %v2280_v29  ;;  %vm2294_vm9 = vmor %vm2292_vm7, %vm2293_vm4  ;;  %v2313_v19 = vand.u32 2147483648, %v2238_v30  ;;  %v2311_v22 = vand.u32 2147483647, %v2238_v30 }
0x150f   :  { %v2228_v2 = vmul.f32 1.442695, %v2886_v57  ;;  %v2364_v20 = vmul.f32 %v2285_v4, %v2185_v16  ;;  %v2289_v47 = vsub.f32 1.0, %v2288_v31  ;;  %vm2307_vm10 = vweird.f32 %v2238_v30 }
0x1510   :  { %v2314_v60 = vor.u32 1.1754944e-38, %v2313_v19  ;;  %vm2312_vm12 = vcmp.eq.f32.partialorder %v2311_v22, 8.507059e+37  ;;  %v2965_v19 = vld [vmem:[%s4602_s1 + $0x428] ss:$0 sm:$0xff] }
0x1511   :  { %3126 = vpow2.f32 %v2228_v2  ;;  %2410 = vmatmul.f32.gmra.mxu0 %v2364_v20  ;;  %v2290_v43 = vmul.f32 %v3123_v27, %v2289_v47 }
0x1512   :  { %v2196_v41 = vpop.f32.mrf.mxu3 }
0x1513   :  { %v4390_v52 = vadd.f32 %v4364_v56, %v2196_v41  ;;  %v2291_v39 = vadd.f32 %v3123_v27, %v2290_v43 }
0x1514   :  { %v3125_v1 = vpop.eup %3124 }
0x1515   :  { %v2887_v23 = vmul.f32 -1.702, %v4390_v52  ;;  %v2295_v50 = vsel %vm2294_vm9, %v3123_v27, %v2291_v39  ;;  %v2303_v6 = vmul.f32 %v3125_v1, %v2238_v30  ;;  %vm2308_vm8 = vweird.f32 %v3125_v1 }
0x1516   :  { %v2300_v35 = vsel %vm2297_vm5, %v2299_v37, %v2295_v50  ;;  %vm2309_vm11 = vmor %vm2307_vm10, %vm2308_vm8 }
0x1517   :  { %v3127_v9 = vpop.eup %3126  ;;  %v2230_v51 = vmul.f32 1.442695, %v2887_v23  ;;  %v2365_v11 = vmul.f32 %v2300_v35, %v2188_v7  ;;  %v2304_v55 = vsub.f32 1.0, %v2303_v6 }
0x1518   :  { %v2239_v24 = vadd.f32 1.0, %v3127_v9 }
0x1519   :  { %3128 = vpow2.f32 %v2230_v51  ;;  %2413 = vmatmul.f32.gmra.mxu0 %v2365_v11  ;;  %v2305_v16 = vmul.f32 %v3125_v1, %v2304_v55 }
0x151a   :  { %3130 = vrcp.f32 %v2239_v24  ;;  %v2328_v18 = vand.u32 2147483648, %v2239_v24  ;;  %v2326_v48 = vand.u32 2147483647, %v2239_v24  ;;  %vm2322_vm6 = vweird.f32 %v2239_v24 }
0x151b   :  { %v2306_v61 = vadd.f32 %v3125_v1, %v2305_v16 }
0x151c   :  { %v2329_v53 = vor.u32 1.1754944e-38, %v2328_v18  ;;  %vm2327_vm15 = vcmp.eq.f32.partialorder %v2326_v48, 8.507059e+37 }
0x151d   :  { %v2310_v63 = vsel %vm2309_vm11, %v3125_v1, %v2306_v61 }
0x151e   :  { %v2315_v14 = vsel %vm2312_vm12, %v2314_v60, %v2310_v63 }
0x151f   :  { %v3129_v58 = vpop.eup %3128  ;;  %v2366_v32 = vmul.f32 %v2315_v14, %v4382_v8 }
0x1520   :  { %v3131_v7 = vpop.eup %3130  ;;  %v2240_v5 = vadd.f32 1.0, %v3129_v58 }
0x1521   :  { %2416 = vmatmul.f32.gmra.mxu0 %v2366_v32  ;;  %v2318_v36 = vmul.f32 %v3131_v7, %v2239_v24  ;;  %vm2323_vm13 = vweird.f32 %v3131_v7 }
0x1522   :  { %3132 = vrcp.f32 %v2240_v5  ;;  %vm2324_vm14 = vmor %vm2322_vm6, %vm2323_vm13  ;;  %v2343_v0 = vand.u32 2147483648, %v2240_v5  ;;  %v2341_v30 = vand.u32 2147483647, %v2240_v5  ;;  %vm2337_vm4 = vweird.f32 %v2240_v5 }
0x1523   :  { %v2319_v10 = vsub.f32 1.0, %v2318_v36 }
0x1524   :  { %v2344_v31 = vor.u32 1.1754944e-38, %v2343_v0  ;;  %vm2342_vm9 = vcmp.eq.f32.partialorder %v2341_v30, 8.507059e+37 }
0x1525   :  { %v2320_v17 = vmul.f32 %v3131_v7, %v2319_v10 }
0x1527   :  { %v2321_v44 = vadd.f32 %v3131_v7, %v2320_v17 }
0x1528   :  { %v3133_v26 = vpop.eup %3132 }
0x1529   :  { %v2325_v13 = vsel %vm2324_vm14, %v3131_v7, %v2321_v44  ;;  %v2333_v21 = vmul.f32 %v3133_v26, %v2240_v5  ;;  %vm2338_vm3 = vweird.f32 %v3133_v26 }
0x152a   :  { %v2330_v49 = vsel %vm2327_vm15, %v2329_v53, %v2325_v13  ;;  %vm2339_vm7 = vmor %vm2337_vm4, %vm2338_vm3 }
0x152b   :  { %v2367_v8 = vmul.f32 %v2330_v49, %v4386_v38  ;;  %v2334_v15 = vsub.f32 1.0, %v2333_v21 }
0x152d   :  { %2419 = vmatmul.f32.gmra.mxu0 %v2367_v8  ;;  %v2335_v27 = vmul.f32 %v3133_v26, %v2334_v15 }
0x152f   :  { %v2199_v28 = vpop.f32.mrf.mxu3  ;;  %v2336_v57 = vadd.f32 %v3133_v26, %v2335_v27 }
0x1530   :  { %v2200_v29 = vadd.f32 %v4364_v56, %v2199_v28 }
0x1531   :  { %v2340_v4 = vsel %vm2339_vm7, %v3133_v26, %v2336_v57 }
0x1532   :  { %v2888_v2 = vmul.f32 -1.702, %v2200_v29  ;;  %v2345_v20 = vsel %vm2342_vm9, %v2344_v31, %v2340_v4 }
0x1533   :  { %v2368_v47 = vmul.f32 %v2345_v20, %v4390_v52 }
0x1534   :  { %v2232_v38 = vmul.f32 1.442695, %v2888_v2 }
0x1535   :  { %2422 = vmatmul.f32.gmra.mxu0 %v2368_v47 }
0x1536   :  { %3134 = vpow2.f32 %v2232_v38 }
0x153c   :  { %v3135_v62 = vpop.eup %3134 }
0x153d   :  { %v2241_v43 = vadd.f32 1.0, %v3135_v62 }
0x153f   :  { %3136 = vrcp.f32 %v2241_v43  ;;  %v2358_v1 = vand.u32 2147483648, %v2241_v43  ;;  %v2356_v56 = vand.u32 2147483647, %v2241_v43  ;;  %vm2352_vm8 = vweird.f32 %v2241_v43 }
0x1541   :  { %v2359_v50 = vor.u32 1.1754944e-38, %v2358_v1  ;;  %vm2357_vm11 = vcmp.eq.f32.partialorder %v2356_v56, 8.507059e+37 }
0x1545   :  { %v3137_v54 = vpop.eup %3136 }
0x1546   :  { %v2348_v41 = vmul.f32 %v3137_v54, %v2241_v43  ;;  %vm2353_vm5 = vweird.f32 %v3137_v54 }
0x1547   :  { %vm2354_vm10 = vmor %vm2352_vm8, %vm2353_vm5 }
0x1548   :  { %v2349_v39 = vsub.f32 1.0, %v2348_v41 }
0x154a   :  { %v2350_v37 = vmul.f32 %v3137_v54, %v2349_v39 }
0x154c   :  { %v2351_v23 = vadd.f32 %v3137_v54, %v2350_v37  ;;  %v2405_v9 = vpop.f32.mrf.mxu0 }
0x154e   :  { %v2355_v6 = vsel %vm2354_vm10, %v3137_v54, %v2351_v23 }
0x154f   :  { %v2360_v52 = vsel %vm2357_vm11, %v2359_v50, %v2355_v6 }
0x1550   :  { %v2369_v35 = vmul.f32 %v2360_v52, %v2200_v29 }
0x1552   :  { %2425 = vmatmul.f32.gmra.mxu0 %v2369_v35 }
0x156c   :  { %v2408_v51 = vpop.f32.mrf.mxu0 }
0x158e   :  { %v2411_v11 = vpop.f32.mrf.mxu0 }
0x158f   :  { %v2412_v60 = vadd.f32 %v2965_v19, %v2411_v11 }
0x1591   :  { %v2431_v32 = vadd.f32 %v2412_v60, %v4177_v42 }
0x1593   :  { %v2445_v36 = vsel %vm122_vm2, %v2431_v32, 0.0 }
0x1596   :  { %v2414_v55 = vpop.f32.mrf.mxu0 }
0x1597   :  { %v2415_v5 = vadd.f32 %v2965_v19, %v2414_v55 }
0x1599   :  { %v2432_v18 = vadd.f32 %v2415_v5, %v4182_v40  ;;  %v2409_v40 = vadd.f32 %v2965_v19, %v2408_v51 }
0x159b   :  { %v2448_v17 = vsel %vm122_vm2, %v2432_v18, 0.0  ;;  %v2430_v8 = vadd.f32 %v2409_v40, %v4172_v12 }
0x159e   :  { %v2417_v24 = vpop.f32.mrf.mxu0 }
0x159f   :  { %v2418_v53 = vadd.f32 %v2965_v19, %v2417_v24 }
0x15a1   :  { %v2433_v21 = vadd.f32 %v2418_v53, %v4187_v34 }
0x15a3   :  { %v2451_v49 = vsel %vm122_vm2, %v2433_v21, 0.0 }
0x15aa   :  { %v2420_v16 = vpop.f32.mrf.mxu0 }
0x15ab   :  { %v2421_v22 = vadd.f32 %v2965_v19, %v2420_v16 }
0x15ad   :  { %v2434_v61 = vadd.f32 %v2421_v22, %v4192_v25  ;;  %v2406_v25 = vadd.f32 %v2965_v19, %v2405_v9 }
0x15af   :  { %v2454_v63 = vsel %vm122_vm2, %v2434_v61, 0.0  ;;  %v2429_v48 = vadd.f32 %v2406_v25, %v4167_v33  ;;  %v2442_v33 = vsel %vm122_vm2, %v2430_v8, 0.0 }
0x15b0   :  { %2455 = vadd.xlane.f32.xlu1 %v2454_v63 }
0x15b1   :  { %v2439_v44 = vsel %vm122_vm2, %v2429_v48, 0.0 }
0x15b2   :  { %v2423_v14 = vpop.f32.mrf.mxu0 }
0x15b3   :  { %v2424_v58 = vadd.f32 %v2965_v19, %v2423_v14 }
0x15b5   :  { %v2435_v7 = vadd.f32 %v2424_v58, %v4197_v59 }
0x15b7   :  { %v2457_v10 = vsel %vm122_vm2, %v2435_v7, 0.0 }
0x15b8   :  { %2446 = vadd.xlane.f32.xlu1 %v2445_v36  ;;  %2458 = vadd.xlane.f32.xlu2 %v2457_v10 }
0x15c0   :  { %2449 = vadd.xlane.f32.xlu2 %v2448_v17 }
0x15c8   :  { %2440 = vadd.xlane.f32.xlu2 %v2439_v44 }
0x15cf   :  { %v2426_v42 = vpop.f32.mrf.mxu0 }
0x15d0   :  { %v2427_v59 = vadd.f32 %v2965_v19, %v2426_v42 }
0x15d2   :  { %v2436_v26 = vadd.f32 %v2427_v59, %v4209_v3 }
0x15d4   :  { %v2460_v13 = vsel %vm122_vm2, %v2436_v26, 0.0 }
0x15d5   :  { %2461 = vadd.xlane.f32.xlu0 %v2460_v13 }
0x15dd   :  { %2452 = vadd.xlane.f32.xlu0 %v2451_v49 }
0x15e5   :  { %2443 = vadd.xlane.f32.xlu0 %v2442_v33 }
0x1623   :  { %v2456_v15 = vpop.xlane.xlu1 %2455 }
0x1624   :  { %v2468_v0 = vmul.f32 %v2456_v15, %v3305_v45 }
0x1626   :  { %v4417_v27 = vsub.f32 %v2434_v61, %v2468_v0 }
0x1628   :  { %v2484_v3 = vmul.f32 %v4417_v27, %v4417_v27 }
0x162a   :  { %v2502_v30 = vsel %vm122_vm2, %v2484_v3, 0.0 }
0x162b   :  { %v2447_v34 = vpop.xlane.xlu1 %2446  ;;  %2503 = vadd.xlane.f32.xlu2 %v2502_v30  ;;  %v2459_v28 = vpop.xlane.xlu2 %2458 }
0x162c   :  { %v2465_v57 = vmul.f32 %v2447_v34, %v3305_v45  ;;  %v2469_v12 = vmul.f32 %v2459_v28, %v3305_v45 }
0x162e   :  { %v4424_v29 = vsub.f32 %v2431_v32, %v2465_v57  ;;  %v4426_v31 = vsub.f32 %v2435_v7, %v2469_v12 }
0x1630   :  { %v2481_v4 = vmul.f32 %v4424_v29, %v4424_v29  ;;  %v2485_v2 = vmul.f32 %v4426_v31, %v4426_v31 }
0x1632   :  { %v2493_v20 = vsel %vm122_vm2, %v2481_v4, 0.0  ;;  %v2505_v47 = vsel %vm122_vm2, %v2485_v2, 0.0 }
0x1633   :  { %2494 = vadd.xlane.f32.xlu2 %v2493_v20  ;;  %2506 = vadd.xlane.f32.xlu0 %v2505_v47  ;;  %v2450_v38 = vpop.xlane.xlu2 %2449 }
0x1634   :  { %v2466_v62 = vmul.f32 %v2450_v38, %v3305_v45 }
0x1636   :  { %v4435_v43 = vsub.f32 %v2432_v18, %v2466_v62 }
0x1638   :  { %v2482_v54 = vmul.f32 %v4435_v43, %v4435_v43 }
0x163a   :  { %v2496_v41 = vsel %vm122_vm2, %v2482_v54, 0.0 }
0x163b   :  { %2497 = vadd.xlane.f32.xlu0 %v2496_v41  ;;  %v2441_v39 = vpop.xlane.xlu2 %2440 }
0x163c   :  { %v2463_v1 = vmul.f32 %v2441_v39, %v3305_v45 }
0x163e   :  { %v4441_v37 = vsub.f32 %v2429_v48, %v2463_v1 }
0x1640   :  { %v2479_v56 = vmul.f32 %v4441_v37, %v4441_v37 }
0x1642   :  { %v2487_v23 = vsel %vm122_vm2, %v2479_v56, 0.0 }
0x1643   :  { %2488 = vadd.xlane.f32.xlu0 %v2487_v23 }
0x1648   :  { %v2462_v50 = vpop.xlane.xlu0 %2461 }
0x1649   :  { %v2470_v6 = vmul.f32 %v2462_v50, %v3305_v45 }
0x164b   :  { %v4447_v52 = vsub.f32 %v2436_v26, %v2470_v6 }
0x164d   :  { %v2486_v35 = vmul.f32 %v4447_v52, %v4447_v52 }
0x164f   :  { %v2508_v9 = vsel %vm122_vm2, %v2486_v35, 0.0 }
0x1650   :  { %2509 = vadd.xlane.f32.xlu1 %v2508_v9  ;;  %v2453_v51 = vpop.xlane.xlu0 %2452 }
0x1651   :  { %v2467_v11 = vmul.f32 %v2453_v51, %v3305_v45 }
0x1653   :  { %v4453_v55 = vsub.f32 %v2433_v21, %v2467_v11 }
0x1655   :  { %v2483_v24 = vmul.f32 %v4453_v55, %v4453_v55 }
0x1657   :  { %v2499_v19 = vsel %vm122_vm2, %v2483_v24, 0.0 }
0x1658   :  { %2500 = vadd.xlane.f32.xlu1 %v2499_v19  ;;  %v2444_v16 = vpop.xlane.xlu0 %2443 }
0x1659   :  { %v2464_v22 = vmul.f32 %v2444_v16, %v3305_v45 }
0x165b   :  { %v4459_v61 = vsub.f32 %v2430_v8, %v2464_v22  ;;  %v2657_v22 = vld [vmem:[%s4602_s1 + $0x488] sm:$0xff] }
0x165d   :  { %v2480_v60 = vmul.f32 %v4459_v61, %v4459_v61 }
0x165f   :  { %v2490_v63 = vsel %vm122_vm2, %v2480_v60, 0.0 }
0x1660   :  { %2491 = vadd.xlane.f32.xlu1 %v2490_v63 }
0x169e   :  { %v2504_v58 = vpop.xlane.xlu2 %2503 }
0x169f   :  { %v2516_v7 = vmul.f32 %v2504_v58, %v3305_v45 }
0x16a1   :  { %v2524_v10 = vadd.f32 1e-05, %v2516_v7 }
0x16a3   :  { %vm2583_vm15 = vweird.f32 %v2524_v10 }
0x16a6   :  { %v2507_v14 = vpop.xlane.xlu0 %2506  ;;  %v2495_v18 = vpop.xlane.xlu2 %2494 }
0x16a7   :  { %v2517_v32 = vmul.f32 %v2507_v14, %v3305_v45  ;;  %v2513_v17 = vmul.f32 %v2495_v18, %v3305_v45 }
0x16a9   :  { %v2525_v36 = vadd.f32 1e-05, %v2517_v32  ;;  %v4472_v59 = vadd.f32 1e-05, %v2513_v17 }
0x16ab   :  { %3138 = vrsqrt.f32 %v2525_v36  ;;  %vm2593_vm6 = vweird.f32 %v2525_v36  ;;  %vm2553_vm11 = vweird.f32 %v4472_v59 }
0x16ac   :  { %3140 = vrsqrt.f32 %v2524_v10 }
0x16ae   :  { %v2498_v5 = vpop.xlane.xlu0 %2497 }
0x16af   :  { %v2514_v25 = vmul.f32 %v2498_v5, %v3305_v45 }
0x16b1   :  { %v4468_v48 = vadd.f32 1e-05, %v2514_v25  ;;  %v4470_v42 = vpop.eup %3138 }
0x16b2   :  { %v4474_v26 = vpop.eup %3140  ;;  %v2588_v13 = vmul.f32 %v4470_v42, %v2525_v36  ;;  %vm2594_vm12 = vweird.f32 %v4470_v42 }
0x16b3   :  { %3142 = vrsqrt.f32 %v4468_v48  ;;  %v2578_v21 = vmul.f32 %v4474_v26, %v2524_v10  ;;  %vm2584_vm13 = vweird.f32 %v4474_v26  ;;  %vm4509_vm14 = vmor %vm2593_vm6, %vm2594_vm12  ;;  %vm2563_vm10 = vweird.f32 %v4468_v48 }
0x16b4   :  { %3144 = vrsqrt.f32 %v4472_v59  ;;  %v2589_v8 = vmul.f32 %v4470_v42, %v2588_v13  ;;  %vm4517_vm3 = vmor %vm2583_vm15, %vm2584_vm13 }
0x16b5   :  { %v2579_v0 = vmul.f32 %v4474_v26, %v2578_v21 }
0x16b6   :  { %v2489_v44 = vpop.xlane.xlu0 %2488  ;;  %v2590_v34 = vmul.f32 0.5, %v2589_v8 }
0x16b7   :  { %v2511_v53 = vmul.f32 %v2489_v44, %v3305_v45  ;;  %v2580_v57 = vmul.f32 0.5, %v2579_v0 }
0x16b8   :  { %v2591_v2 = vsub.f32 1.5, %v2590_v34 }
0x16b9   :  { %v4481_v40 = vadd.f32 1e-05, %v2511_v53  ;;  %v4485_v15 = vpop.eup %3142  ;;  %v2581_v54 = vsub.f32 1.5, %v2580_v57 }
0x16ba   :  { %v4489_v30 = vpop.eup %3144  ;;  %v2558_v28 = vmul.f32 %v4485_v15, %v4468_v48  ;;  %v2592_v56 = vmul.f32 %v4470_v42, %v2591_v2  ;;  %vm2564_vm9 = vweird.f32 %v4485_v15 }
0x16bb   :  { %3146 = vrsqrt.f32 %v4481_v40  ;;  %v2548_v12 = vmul.f32 %v4489_v30, %v4472_v59  ;;  %v2582_v35 = vmul.f32 %v4474_v26, %v2581_v54  ;;  %vm2554_vm8 = vweird.f32 %v4489_v30  ;;  %vm4540_vm12 = vmor %vm2563_vm10, %vm2564_vm9 }
0x16bc   :  { %v2559_v38 = vmul.f32 %v4485_v15, %v2558_v28  ;;  %v2596_v19 = vsel %vm4509_vm14, %v4470_v42, %v2592_v56  ;;  %vm4550_vm6 = vmor %vm2553_vm11, %vm2554_vm8 }
0x16bd   :  { %v2549_v39 = vmul.f32 %v4489_v30, %v2548_v12  ;;  %v2586_v32 = vsel %vm4517_vm3, %v4474_v26, %v2582_v35  ;;  %v2613_v10 = vmul.f32 %v2596_v19, %v4426_v31  ;;  %v2966_v26 = vld [vmem:[%s4602_s1 + $0x470] ss:$0 sm:$0xff]  ;;  %v2633_v19 = vld [vmem:[%s4602_s1 + $0x480] sm:$0xff] }
0x16be   :  { %v2560_v23 = vmul.f32 0.5, %v2559_v38  ;;  %v2612_v53 = vmul.f32 %v2586_v32, %v4417_v27  ;;  %v2967_v27 = vld [vmem:[%s4602_s1 + $0x478] ss:$0 sm:$0xff] }
0x16bf   :  { %v2550_v51 = vmul.f32 0.5, %v2549_v39 }
0x16c0   :  { %v2561_v60 = vsub.f32 1.5, %v2560_v23  ;;  %v2621_v34 = vmul.f32 %v2966_v26, %v2612_v53 }
0x16c1   :  { %v4496_v47 = vpop.eup %3146  ;;  %v2551_v5 = vsub.f32 1.5, %v2550_v51 }
0x16c2   :  { %v2528_v50 = vmul.f32 %v4496_v47, %v4481_v40  ;;  %v2562_v18 = vmul.f32 %v4485_v15, %v2561_v60  ;;  %vm2534_vm3 = vweird.f32 %v4496_v47 }
0x16c3   :  { %v2510_v49 = vpop.xlane.xlu1 %2509  ;;  %v2552_v13 = vmul.f32 %v4489_v30, %v2551_v5 }
0x16c4   :  { %v2518_v33 = vmul.f32 %v2510_v49, %v3305_v45  ;;  %v2529_v63 = vmul.f32 %v4496_v47, %v2528_v50  ;;  %v2622_v49 = vmul.f32 %v2966_v26, %v2613_v10  ;;  %v2566_v8 = vsel %vm4540_vm12, %v4485_v15, %v2562_v18 }
0x16c5   :  { %v2556_v28 = vsel %vm4550_vm6, %v4489_v30, %v2552_v13 }
0x16c6   :  { %v2526_v3 = vadd.f32 1e-05, %v2518_v33  ;;  %v2530_v25 = vmul.f32 0.5, %v2529_v63  ;;  %v2631_v15 = vadd.f32 %v2967_v27, %v2622_v49  ;;  %v2609_v30 = vmul.f32 %v2556_v28, %v4424_v29 }
0x16c8   :  { %3148 = vrsqrt.f32 %v2526_v3  ;;  %vm2603_vm7 = vweird.f32 %v2526_v3  ;;  %v2531_v48 = vsub.f32 1.5, %v2530_v25  ;;  %v2618_v50 = vmul.f32 %v2966_v26, %v2609_v30 }
0x16ca   :  { %v2532_v2 = vmul.f32 %v4496_v47, %v2531_v48 }
0x16cb   :  { %v2501_v4 = vpop.xlane.xlu1 %2500 }
0x16cc   :  { %v2515_v20 = vmul.f32 %v2501_v4, %v3305_v45  ;;  %v2610_v4 = vmul.f32 %v2566_v8, %v4435_v43 }
0x16ce   :  { %v3149_v62 = vpop.eup %3148  ;;  %v4499_v41 = vadd.f32 1e-05, %v2515_v20 }
0x16cf   :  { %v2598_v1 = vmul.f32 %v3149_v62, %v2526_v3  ;;  %vm2604_vm4 = vweird.f32 %v3149_v62 }
0x16d0   :  { %3150 = vrsqrt.f32 %v4499_v41  ;;  %vm2605_vm5 = vmor %vm2603_vm7, %vm2604_vm4  ;;  %vm2573_vm14 = vweird.f32 %v4499_v41  ;;  %vm2533_vm4 = vweird.f32 %v4481_v40  ;;  %v2627_v40 = vadd.f32 %v2967_v27, %v2618_v50 }
0x16d1   :  { %v2599_v6 = vmul.f32 %v3149_v62, %v2598_v1  ;;  %vm2535_vm7 = vmor %vm2533_vm4, %vm2534_vm3  ;;  %v2619_v1 = vmul.f32 %v2966_v26, %v2610_v4 }
0x16d2   :  { %v2536_v43 = vsel %vm2535_vm7, %v4496_v47, %v2532_v2 }
0x16d3   :  { %v2600_v11 = vmul.f32 0.5, %v2599_v6  ;;  %v2492_v24 = vpop.xlane.xlu1 %2491  ;;  %v2607_v29 = vmul.f32 %v2536_v43, %v4441_v37  ;;  %v2659_v37 = vld [vmem:[%s4602_s1 + $0x498] sm:$0xff] }
0x16d4   :  { %v2512_v16 = vmul.f32 %v2492_v24, %v3305_v45 }
0x16d5   :  { %v2601_v14 = vsub.f32 1.5, %v2600_v11  ;;  %v2616_v11 = vmul.f32 %v2966_v26, %v2607_v29 }
0x16d6   :  { %v3151_v58 = vpop.eup %3150  ;;  %v2520_v7 = vadd.f32 1e-05, %v2512_v16  ;;  %v2660_v16 = vld [vmem:[%s4602_s1 + $0x4a0] sm:$0xff] }
0x16d7   :  { %v2602_v36 = vmul.f32 %v3149_v62, %v2601_v14  ;;  %v2568_v45 = vmul.f32 %v3151_v58, %v4499_v41  ;;  %vm2574_vm13 = vweird.f32 %v3151_v58  ;;  %v2625_v24 = vadd.f32 %v2967_v27, %v2616_v11 }
0x16d8   :  { %3152 = vrsqrt.f32 %v2520_v7  ;;  %vm2575_vm15 = vmor %vm2573_vm14, %vm2574_vm13 }
0x16d9   :  { %v2606_v17 = vsel %vm2605_vm5, %v3149_v62, %v2602_v36  ;;  %v2569_v44 = vmul.f32 %v3151_v58, %v2568_v45  ;;  %v2630_v62 = vadd.f32 %v2967_v27, %v2621_v34  ;;  %vm2543_vm5 = vweird.f32 %v2520_v7 }
0x16da   :  { %v2614_v42 = vmul.f32 %v2606_v17, %v4447_v52 }
0x16db   :  { %v2570_v31 = vmul.f32 0.5, %v2569_v44 }
0x16dc   :  { %v2623_v52 = vmul.f32 %v2966_v26, %v2614_v42  ;;  %v2725_v42 = vld [vmem:[%s4602_s1 + $0x4b0] sm:$0xff] }
0x16dd   :  { %v2571_v33 = vsub.f32 1.5, %v2570_v31  ;;  %v2750_v31 = vstv %s4603_s2 }
0x16de   :  { %v3153_v59 = vpop.eup %3152  ;;  %v2632_v3 = vadd.f32 %v2967_v27, %v2623_v52 }
0x16df   :  { %v2572_v57 = vmul.f32 %v3151_v58, %v2571_v33  ;;  %v2538_v12 = vmul.f32 %v3153_v59, %v2520_v7  ;;  %vm2544_vm9 = vweird.f32 %v3153_v59 }
0x16e0   :  { %2645 = vmatpush.msrb.mxu1 %v2632_v3  ;;  %vm2545_vm8 = vmor %vm2543_vm5, %vm2544_vm9 }
0x16e1   :  { %v2576_v20 = vsel %vm2575_vm15, %v3151_v58, %v2572_v57  ;;  %v2539_v38 = vmul.f32 %v3153_v59, %v2538_v12 }
0x16e2   :  { %2646 = vmatpush.msrb.mxu1 %v2631_v15  ;;  %v2611_v54 = vmul.f32 %v2576_v20, %v4453_v55  ;;  %v2628_v55 = vadd.f32 %v2967_v27, %v2619_v1 }
0x16e3   :  { %v2540_v41 = vmul.f32 0.5, %v2539_v38 }
0x16e4   :  { %2647 = vmatpush.msrb.mxu1 %v2630_v62  ;;  %v2620_v39 = vmul.f32 %v2966_v26, %v2611_v54 }
0x16e5   :  { %v2541_v56 = vsub.f32 1.5, %v2540_v41 }
0x16e6   :  { %v2629_v23 = vadd.f32 %v2967_v27, %v2620_v39 }
0x16e7   :  { %v2542_v6 = vmul.f32 %v3153_v59, %v2541_v56 }
0x16e8   :  { %2648 = vmatpush.msrb.mxu1 %v2629_v23 }
0x16e9   :  { %v2546_v35 = vsel %vm2545_vm8, %v3153_v59, %v2542_v6 }
0x16ea   :  { %2649 = vmatpush.msrb.mxu1 %v2628_v55  ;;  %v2608_v9 = vmul.f32 %v2546_v35, %v4459_v61  ;;  %v2658_v61 = vld [vmem:[%s4602_s1 + $0x490] sm:$0xff] }
0x16ec   :  { %2650 = vmatpush.msrb.mxu1 %v2627_v40  ;;  %v2617_v51 = vmul.f32 %v2966_v26, %v2608_v9  ;;  %v2723_v26 = vld [vmem:[%s4602_s1 + $0x4a8] sm:$0x3] }
0x16ee   :  { %v2626_v47 = vadd.f32 %v2967_v27, %v2617_v51 }
0x16f0   :  { %2651 = vmatpush.msrb.mxu1 %v2626_v47 }
0x16f2   :  { %2652 = vmatpush.msrb.mxu1 %v2625_v24 }
0x16f3   :  { %2889 = vmatmul.msk.f32.vlgmr.msrb.gmra.mxu1 %vm42_vm0, %v2633_v19 }
0x16f4   :  { %2676 = vmatpush.msra.mxu1 %v2660_v16 }
0x16f6   :  { %2677 = vmatpush.msra.mxu1 %v2659_v37 }
0x16f8   :  { %2678 = vmatpush.msra.mxu1 %v2658_v61 }
0x16fa   :  { %2679 = vmatpush.msra.mxu1 %v2657_v22 }
0x16fc   :  { %2744 = vmatpush.msrb.mxu1 %v2725_v42 }
0x1770   :  { %v2654_v60 = vpop.f32.mrf.mxu1 }
0x1771   :  { %2890 = vmatmul.msk.f32.vlgmr.msra.gmra.mxu1 %vm122_vm2, %v2654_v60 }
0x17ee   :  { %v2681_v63 = vpop.f32.mrf.mxu1 }
0x17ef   :  { %v2684_v14 = vmul.f32 %v2681_v63, %v2681_v63 }
0x17f1   :  { %v2685_v58 = vsel %vm122_vm2, %v2684_v14, 0.0 }
0x17f2   :  { %2686 = vadd.xlane.f32.xlu2 %v2685_v58 }
0x1865   :  { %v2687_v32 = vpop.xlane.xlu2 %2686 }
0x1866   :  { %v2688_v7 = vadd.f32 1e-12, %v2687_v32 }
0x1868   :  { %3154 = vrsqrt.f32 %v2688_v7  ;;  %vm2695_vm10 = vweird.f32 %v2688_v7 }
0x186e   :  { %v3155_v5 = vpop.eup %3154 }
0x186f   :  { %v2690_v36 = vmul.f32 %v3155_v5, %v2688_v7  ;;  %vm2696_vm0 = vweird.f32 %v3155_v5 }
0x1870   :  { %vm2697_vm11 = vmor %vm2695_vm10, %vm2696_vm0 }
0x1871   :  { %v2691_v45 = vmul.f32 %v3155_v5, %v2690_v36 }
0x1873   :  { %v2692_v10 = vmul.f32 0.5, %v2691_v45 }
0x1875   :  { %v2693_v18 = vsub.f32 1.5, %v2692_v10 }
0x1877   :  { %v2694_v25 = vmul.f32 %v3155_v5, %v2693_v18 }
0x1879   :  { %v2698_v17 = vsel %vm2697_vm11, %v3155_v5, %v2694_v25 }
0x187a   :  { %v2699_v44 = vmul.f32 %v2698_v17, %v2681_v63 }
0x187c   :  { %2891 = vmatpush.xpose.msk.msrb.mxu2 %vm122_vm2, %v2699_v44 }
0x187f   :  { %2892 = vmatmul.msk.f32.vlgmr.msrb.gmra.mxu2 %vm122_vm2, %v3560_v46 }
0x1902   :  { %v2720_v53 = vpop.f32.mrf.mxu2 }
0x1903   :  { %v2724_v13 = vmul.f32 %v2723_v26, %v2720_v53 }
0x1905   :  { %2893 = vmatmul.msk.f32.vlgmr.msrb.gmra.mxu1 %vm90_vm1, %v2724_v13 }
0x1982   :  { %v2746_v46 = vpop.f32.mrf.mxu1 }
0x1983   :  { %v2751_v21 = vmul.f32 %v2750_v31, %v2746_v46 }
0x1985   :  { %2752 = vst [vmem:[#allocation3] sm:$0x3] %v2751_v21 }
0x1986   :  { %2763 = dma.vmem_to_hbm [thread:$0]  %s2759_s24, 32, %s2761_s27, [#allocation4]  }
0x1987   :  { %3180 = dma.done.wait [#allocation4], 32  }
0x1988   :  { %3181 = vsyncadd [#allocation4], 4294967264 }
0x1989   :  { %2768 = vsyncpa [#allocation4], 1 }

</bundles_post_ra>
